<compile_context>
chip_gen: v7x
topology: tpu7x:2x2x1
jax: 0.10.0
libtpu: 0.0.40
codegen_flags: <defaults>
</compile_context>

<pallas_src>
import jax
import jax.numpy as jnp
from jax.experimental import pallas as pl
from jax.experimental.pallas import tpu as pltpu


# Left padding of the W axis inside the VMEM activation scratch.  Using 8
# (instead of 1) keeps every per-layer interior store sublane-aligned; column
# LPAD-1 is the real zero pad, columns 0..LPAD-2 are unused (always zero).
LPAD = 8


def _convnet_kernel(x_ref, w_ref, b_ref, o_ref, xpad_ref):
    """One grid step == one ConvBlock applied to the whole batch.

    x_ref:    (N, H, W, C)          input batch (only read at layer 0)
    w_ref:    (1, 9*C, C)           this layer's weights, rows = (ky, kx, cin)
    b_ref:    (1, 1, C)             this layer's bias
    o_ref:    (N, H, W, C)          final output (written at the last layer)
    xpad_ref: (N, H+2, LPAD+W+8, C) zero-padded activation, resident in VMEM
                                    across all layers of the grid.
    """
    layer = pl.program_id(0)
    last = pl.num_programs(0) - 1

    n, hp, _, c = xpad_ref.shape
    h = hp - 2
    w = x_ref.shape[2]
    m = n * h * w

    @pl.when(layer == 0)
    def _init():
        xpad_ref[...] = jnp.zeros_like(xpad_ref)
        # Sublane-aligned interior store (starts at column LPAD=8).
        xpad_ref[:, 1:1 + h, LPAD:LPAD + w, :] = x_ref[...]

    xpad = xpad_ref[...]               # single VMEM load per layer
    w2d = w_ref[0]                     # (9*C, C) dense weight slab
    bias = b_ref[...].reshape(1, c)    # (1, C)

    acc = jnp.zeros((m, c), jnp.float32)
    # 3x3 conv: 9 shifted windows of the padded activation (register-level
    # slices of the single load above), each contracted against the matching
    # (C, C) rows of the weight slab, accumulated in f32.
    for t in range(9):
        ky, kx = t // 3, t % 3
        win = xpad[:, ky:ky + h, LPAD - 1 + kx:LPAD - 1 + kx + w, :]
        acc = acc + jnp.dot(win.reshape(m, c), w2d[t * c:(t + 1) * c, :],
                            preferred_element_type=jnp.float32)

    act = jnp.maximum(acc + bias, 0.0).reshape(n, h, w, c)

    @pl.when(layer < last)
    def _carry():
        # Write the activation back into the (still-zero-ringed) padded
        # scratch for the next layer; aligned start column again.
        xpad_ref[:, 1:1 + h, LPAD:LPAD + w, :] = act.astype(xpad_ref.dtype)

    @pl.when(layer == last)
    def _finalize():
        o_ref[...] = act.astype(o_ref.dtype)


@jax.jit
def convnet_forward(x_nchw, w_all, b_all):
    """ConvNet.forward with all ConvBlocks fused into one pallas_call.

    x_nchw: (N, C, H, W) float32 (PyTorch layout)
    w_all:  (L, 9*C, C)  float32 stacked per-layer conv weights
    b_all:  (L, 1, C)    float32 stacked per-layer biases
    """
    n, c, h, w = x_nchw.shape
    num_layers = w_all.shape[0]
    # NOTE: W should be a multiple of 8 so the in-kernel (N,H,W,C)->(N*H*W,C)
    # reshapes are layout no-ops (true for CIFAR-like spatial sizes).
    x_nhwc = jnp.transpose(x_nchw, (0, 2, 3, 1))      # once per forward
    wp = LPAD + w + 8                                 # padded scratch width

    out_nhwc = pl.pallas_call(
        _convnet_kernel,
        out_shape=jax.ShapeDtypeStruct((n, h, w, c), x_nhwc.dtype),
        grid_spec=pltpu.PrefetchScalarGridSpec(
            num_scalar_prefetch=0,
            grid=(num_layers,),
            in_specs=[
                # Constant index map -> block stays resident across the whole
                # layer loop (DMA'd in once, not re-fetched per layer).
                pl.BlockSpec((n, h, w, c), lambda l: (0, 0, 0, 0)),
                # Per-layer weight/bias blocks: varying index map, so the
                # default double buffering prefetches layer l+1 while layer l
                # computes.
                pl.BlockSpec((1, 9 * c, c), lambda l: (l, 0, 0)),
                pl.BlockSpec((1, 1, c), lambda l: (l, 0, 0)),
            ],
            out_specs=pl.BlockSpec((n, h, w, c), lambda l: (0, 0, 0, 0)),
            scratch_shapes=[
                pltpu.VMEM((n, h + 2, wp, c), jnp.float32),
            ],
        ),
        compiler_params=pltpu.CompilerParams(
            dimension_semantics=("arbitrary",)),
    )(x_nhwc, w_all, b_all)

    return jnp.transpose(out_nhwc, (0, 3, 1, 2))      # back to NCHW once


def init_params(key, num_layers, channels):
    """Deterministic PyTorch-style uniform init, weights in (kh, kw, Cin, Cout)."""
    params = []
    fan_in = channels * 3 * 3
    bound = 1.0 / jnp.sqrt(fan_in)
    for i in range(num_layers):
        kw, kb = jax.random.split(jax.random.fold_in(key, i))
        w = jax.random.uniform(kw, (3, 3, channels, channels),
                               jnp.float32, -bound, bound)
        b = jax.random.uniform(kb, (channels,), jnp.float32, -bound, bound)
        params.append((w, b))
    return params


def pack_params(params):
    """Stack per-layer params into the dense slabs the fused kernel consumes."""
    c = params[0][0].shape[2]
    # (3,3,Cin,Cout) -> rows ordered (ky*3+kx)*Cin + cin, matching the kernel.
    w_all = jnp.stack([w.reshape(9 * c, c) for w, _ in params])   # (L, 9C, C)
    b_all = jnp.stack([b.reshape(1, c) for _, b in params])       # (L, 1, C)
    return w_all, b_all


def _reference_forward(x_nchw, params):
    """Pure-JAX reference (lax.conv) for a correctness sanity check."""
    x = x_nchw
    for w, b in params:
        w_oihw = jnp.transpose(w, (3, 2, 0, 1))
        x = jax.lax.conv_general_dilated(
            x, w_oihw, window_strides=(1, 1), padding="SAME",
            dimension_numbers=("NCHW", "OIHW", "NCHW"))
        x = jnp.maximum(x + b[None, :, None, None], 0.0)
    return x


if __name__ == "__main__":
    batch, channels, spatial, num_layers = 2, 4, 16, 3

    key = jax.random.PRNGKey(0)
    kx, kp = jax.random.split(key)
    x = jax.random.normal(kx, (batch, channels, spatial, spatial), jnp.float32)
    params = init_params(kp, num_layers, channels)
    w_all, b_all = pack_params(params)

    out = jax.block_until_ready(convnet_forward(x, w_all, b_all))

    ref = jax.block_until_ready(_reference_forward(x, params))
    assert out.shape == (batch, channels, spatial, spatial)
    assert jnp.allclose(out, ref, atol=1e-4, rtol=1e-4), (
        float(jnp.max(jnp.abs(out - ref))))

    print("KERNEL_OK")
</pallas_src>

<mosaic_0001>
module attributes {stable_mosaic.version = 11 : i64} {
  func.func @_convnet_kernel(%arg0: i32, %arg1: memref<2x16x16x4xf32, #tpu.memory_space<vmem>>, %arg2: memref<1x36x4xf32, #tpu.memory_space<vmem>>, %arg3: memref<1x1x4xf32, #tpu.memory_space<vmem>>, %arg4: memref<2x16x16x4xf32, #tpu.memory_space<vmem>>, %arg5: memref<2x18x32x4xf32, #tpu.memory_space<vmem>>) attributes {dimension_semantics = [#tpu.dimension_semantics<arbitrary>], iteration_bounds = array<i64: 3>, scalar_prefetch = 0 : i64, scratch_operands = 1 : i64, tpu.core_type = #tpu.core_type<tc>, window_params = [{pipeline_mode = #tpu.pipeline_mode<synchronous>, transform_indices = @transform_0, window_bounds = array<i64: 2, 16, 16, 4>}, {transform_indices = @transform_1, window_bounds = array<i64: 1, 36, 4>}, {transform_indices = @transform_2, window_bounds = array<i64: 1, 1, 4>}, {pipeline_mode = #tpu.pipeline_mode<synchronous>, transform_indices = @transform_3, window_bounds = array<i64: 2, 16, 16, 4>}]} {
    %c0_i32 = arith.constant 0 : i32
    %0 = arith.cmpi eq, %arg0, %c0_i32 : i32
    %1 = arith.extui %0 : i1 to i32
    %c0_i32_0 = arith.constant 0 : i32
    %2 = arith.cmpi ne, %1, %c0_i32_0 : i32
    scf.if %2 {
      %cst_23 = arith.constant 0.000000e+00 : f32
      %65 = vector.broadcast %cst_23 : f32 to vector<2x18x32x4xf32>
      %c0_24 = arith.constant 0 : index
      %c0_25 = arith.constant 0 : index
      %c0_26 = arith.constant 0 : index
      %c0_27 = arith.constant 0 : index
      %66 = vector.load %arg5[%c0_24, %c0_25, %c0_26, %c0_27] : memref<2x18x32x4xf32, #tpu.memory_space<vmem>>, vector<2x18x32x4xf32>
      tpu.vector_store %arg5[%c0_24, %c0_25, %c0_26, %c0_27], %65 {strides = array<i32>} : memref<2x18x32x4xf32, #tpu.memory_space<vmem>>, vector<2x18x32x4xf32>,
      %c0_28 = arith.constant 0 : index
      %c0_29 = arith.constant 0 : index
      %c0_30 = arith.constant 0 : index
      %c0_31 = arith.constant 0 : index
      %67 = vector.load %arg1[%c0_28, %c0_29, %c0_30, %c0_31] : memref<2x16x16x4xf32, #tpu.memory_space<vmem>>, vector<2x16x16x4xf32>
      %c0_32 = arith.constant 0 : index
      %c1 = arith.constant 1 : index
      %c8 = arith.constant 8 : index
      %c0_33 = arith.constant 0 : index
      %68 = vector.load %arg5[%c0_32, %c1, %c8, %c0_33] : memref<2x18x32x4xf32, #tpu.memory_space<vmem>>, vector<2x16x16x4xf32>
      tpu.vector_store %arg5[%c0_32, %c1, %c8, %c0_33], %67 {strides = array<i32>} : memref<2x18x32x4xf32, #tpu.memory_space<vmem>>, vector<2x16x16x4xf32>,
    } else {
    }
    %c0 = arith.constant 0 : index
    %c0_1 = arith.constant 0 : index
    %c0_2 = arith.constant 0 : index
    %c0_3 = arith.constant 0 : index
    %3 = vector.load %arg5[%c0, %c0_1, %c0_2, %c0_3] : memref<2x18x32x4xf32, #tpu.memory_space<vmem>>, vector<2x18x32x4xf32>
    %c0_4 = arith.constant 0 : index
    %c0_5 = arith.constant 0 : index
    %c0_6 = arith.constant 0 : index
    %4 = vector.load %arg2[%c0_4, %c0_5, %c0_6] : memref<1x36x4xf32, #tpu.memory_space<vmem>>, vector<1x36x4xf32>
    %5 = vector.shape_cast %4 : vector<1x36x4xf32> to vector<36x4xf32>
    %c0_7 = arith.constant 0 : index
    %c0_8 = arith.constant 0 : index
    %c0_9 = arith.constant 0 : index
    %6 = vector.load %arg3[%c0_7, %c0_8, %c0_9] : memref<1x1x4xf32, #tpu.memory_space<vmem>>, vector<1x1x4xf32>
    %7 = vector.shape_cast %6 : vector<1x1x4xf32> to vector<1x4xf32>
    %cst = arith.constant 0.000000e+00 : f32
    %8 = vector.broadcast %cst : f32 to vector<512x4xf32>
    %9 = vector.extract_strided_slice %3 {offsets = [0, 0, 7, 0], sizes = [2, 16, 16, 4], strides = [1, 1, 1, 1]} : vector<2x18x32x4xf32> to vector<2x16x16x4xf32>
    %10 = vector.shape_cast %9 : vector<2x16x16x4xf32> to vector<512x4xf32>
    %11 = vector.extract_strided_slice %5 {offsets = [0, 0], sizes = [4, 4], strides = [1, 1]} : vector<36x4xf32> to vector<4x4xf32>
    %cst_10 = arith.constant dense<0.000000e+00> : vector<512x4xf32>
    %12 = tpu.matmul %10, %11, %cst_10 {dimension_numbers = #tpu.dot_dimension_numbers<[1], [0], [0], [1], [0, 0, 1, 1], [], []>} : vector<512x4xf32>, vector<4x4xf32>, vector<512x4xf32> -> vector<512x4xf32>
    %13 = arith.addf %8, %12 : vector<512x4xf32>
    %14 = vector.extract_strided_slice %3 {offsets = [0, 0, 8, 0], sizes = [2, 16, 16, 4], strides = [1, 1, 1, 1]} : vector<2x18x32x4xf32> to vector<2x16x16x4xf32>
    %15 = vector.shape_cast %14 : vector<2x16x16x4xf32> to vector<512x4xf32>
    %16 = vector.extract_strided_slice %5 {offsets = [4, 0], sizes = [4, 4], strides = [1, 1]} : vector<36x4xf32> to vector<4x4xf32>
    %cst_11 = arith.constant dense<0.000000e+00> : vector<512x4xf32>
    %17 = tpu.matmul %15, %16, %cst_11 {dimension_numbers = #tpu.dot_dimension_numbers<[1], [0], [0], [1], [0, 0, 1, 1], [], []>} : vector<512x4xf32>, vector<4x4xf32>, vector<512x4xf32> -> vector<512x4xf32>
    %18 = arith.addf %13, %17 : vector<512x4xf32>
    %19 = vector.extract_strided_slice %3 {offsets = [0, 0, 9, 0], sizes = [2, 16, 16, 4], strides = [1, 1, 1, 1]} : vector<2x18x32x4xf32> to vector<2x16x16x4xf32>
    %20 = vector.shape_cast %19 : vector<2x16x16x4xf32> to vector<512x4xf32>
    %21 = vector.extract_strided_slice %5 {offsets = [8, 0], sizes = [4, 4], strides = [1, 1]} : vector<36x4xf32> to vector<4x4xf32>
    %cst_12 = arith.constant dense<0.000000e+00> : vector<512x4xf32>
    %22 = tpu.matmul %20, %21, %cst_12 {dimension_numbers = #tpu.dot_dimension_numbers<[1], [0], [0], [1], [0, 0, 1, 1], [], []>} : vector<512x4xf32>, vector<4x4xf32>, vector<512x4xf32> -> vector<512x4xf32>
    %23 = arith.addf %18, %22 : vector<512x4xf32>
    %24 = vector.extract_strided_slice %3 {offsets = [0, 1, 7, 0], sizes = [2, 16, 16, 4], strides = [1, 1, 1, 1]} : vector<2x18x32x4xf32> to vector<2x16x16x4xf32>
    %25 = vector.shape_cast %24 : vector<2x16x16x4xf32> to vector<512x4xf32>
    %26 = vector.extract_strided_slice %5 {offsets = [12, 0], sizes = [4, 4], strides = [1, 1]} : vector<36x4xf32> to vector<4x4xf32>
    %cst_13 = arith.constant dense<0.000000e+00> : vector<512x4xf32>
    %27 = tpu.matmul %25, %26, %cst_13 {dimension_numbers = #tpu.dot_dimension_numbers<[1], [0], [0], [1], [0, 0, 1, 1], [], []>} : vector<512x4xf32>, vector<4x4xf32>, vector<512x4xf32> -> vector<512x4xf32>
    %28 = arith.addf %23, %27 : vector<512x4xf32>
    %29 = vector.extract_strided_slice %3 {offsets = [0, 1, 8, 0], sizes = [2, 16, 16, 4], strides = [1, 1, 1, 1]} : vector<2x18x32x4xf32> to vector<2x16x16x4xf32>
    %30 = vector.shape_cast %29 : vector<2x16x16x4xf32> to vector<512x4xf32>
    %31 = vector.extract_strided_slice %5 {offsets = [16, 0], sizes = [4, 4], strides = [1, 1]} : vector<36x4xf32> to vector<4x4xf32>
    %cst_14 = arith.constant dense<0.000000e+00> : vector<512x4xf32>
    %32 = tpu.matmul %30, %31, %cst_14 {dimension_numbers = #tpu.dot_dimension_numbers<[1], [0], [0], [1], [0, 0, 1, 1], [], []>} : vector<512x4xf32>, vector<4x4xf32>, vector<512x4xf32> -> vector<512x4xf32>
    %33 = arith.addf %28, %32 : vector<512x4xf32>
    %34 = vector.extract_strided_slice %3 {offsets = [0, 1, 9, 0], sizes = [2, 16, 16, 4], strides = [1, 1, 1, 1]} : vector<2x18x32x4xf32> to vector<2x16x16x4xf32>
    %35 = vector.shape_cast %34 : vector<2x16x16x4xf32> to vector<512x4xf32>
    %36 = vector.extract_strided_slice %5 {offsets = [20, 0], sizes = [4, 4], strides = [1, 1]} : vector<36x4xf32> to vector<4x4xf32>
    %cst_15 = arith.constant dense<0.000000e+00> : vector<512x4xf32>
    %37 = tpu.matmul %35, %36, %cst_15 {dimension_numbers = #tpu.dot_dimension_numbers<[1], [0], [0], [1], [0, 0, 1, 1], [], []>} : vector<512x4xf32>, vector<4x4xf32>, vector<512x4xf32> -> vector<512x4xf32>
    %38 = arith.addf %33, %37 : vector<512x4xf32>
    %39 = vector.extract_strided_slice %3 {offsets = [0, 2, 7, 0], sizes = [2, 16, 16, 4], strides = [1, 1, 1, 1]} : vector<2x18x32x4xf32> to vector<2x16x16x4xf32>
    %40 = vector.shape_cast %39 : vector<2x16x16x4xf32> to vector<512x4xf32>
    %41 = vector.extract_strided_slice %5 {offsets = [24, 0], sizes = [4, 4], strides = [1, 1]} : vector<36x4xf32> to vector<4x4xf32>
    %cst_16 = arith.constant dense<0.000000e+00> : vector<512x4xf32>
    %42 = tpu.matmul %40, %41, %cst_16 {dimension_numbers = #tpu.dot_dimension_numbers<[1], [0], [0], [1], [0, 0, 1, 1], [], []>} : vector<512x4xf32>, vector<4x4xf32>, vector<512x4xf32> -> vector<512x4xf32>
    %43 = arith.addf %38, %42 : vector<512x4xf32>
    %44 = vector.extract_strided_slice %3 {offsets = [0, 2, 8, 0], sizes = [2, 16, 16, 4], strides = [1, 1, 1, 1]} : vector<2x18x32x4xf32> to vector<2x16x16x4xf32>
    %45 = vector.shape_cast %44 : vector<2x16x16x4xf32> to vector<512x4xf32>
    %46 = vector.extract_strided_slice %5 {offsets = [28, 0], sizes = [4, 4], strides = [1, 1]} : vector<36x4xf32> to vector<4x4xf32>
    %cst_17 = arith.constant dense<0.000000e+00> : vector<512x4xf32>
    %47 = tpu.matmul %45, %46, %cst_17 {dimension_numbers = #tpu.dot_dimension_numbers<[1], [0], [0], [1], [0, 0, 1, 1], [], []>} : vector<512x4xf32>, vector<4x4xf32>, vector<512x4xf32> -> vector<512x4xf32>
    %48 = arith.addf %43, %47 : vector<512x4xf32>
    %49 = vector.extract_strided_slice %3 {offsets = [0, 2, 9, 0], sizes = [2, 16, 16, 4], strides = [1, 1, 1, 1]} : vector<2x18x32x4xf32> to vector<2x16x16x4xf32>
    %50 = vector.shape_cast %49 : vector<2x16x16x4xf32> to vector<512x4xf32>
    %51 = vector.extract_strided_slice %5 {offsets = [32, 0], sizes = [4, 4], strides = [1, 1]} : vector<36x4xf32> to vector<4x4xf32>
    %cst_18 = arith.constant dense<0.000000e+00> : vector<512x4xf32>
    %52 = tpu.matmul %50, %51, %cst_18 {dimension_numbers = #tpu.dot_dimension_numbers<[1], [0], [0], [1], [0, 0, 1, 1], [], []>} : vector<512x4xf32>, vector<4x4xf32>, vector<512x4xf32> -> vector<512x4xf32>
    %53 = arith.addf %48, %52 : vector<512x4xf32>
    %54 = vector.broadcast %7 : vector<1x4xf32> to vector<512x4xf32>
    %55 = arith.addf %53, %54 : vector<512x4xf32>
    %cst_19 = arith.constant 0.000000e+00 : f32
    %56 = vector.broadcast %cst_19 : f32 to vector<512x4xf32>
    %57 = arith.maximumf %55, %56 : vector<512x4xf32>
    %58 = vector.shape_cast %57 : vector<512x4xf32> to vector<2x16x16x4xf32>
    %c2_i32 = arith.constant 2 : i32
    %59 = arith.cmpi slt, %arg0, %c2_i32 : i32
    %60 = arith.extui %59 : i1 to i32
    %c0_i32_20 = arith.constant 0 : i32
    %61 = arith.cmpi ne, %60, %c0_i32_20 : i32
    scf.if %61 {
      %c0_23 = arith.constant 0 : index
      %c1 = arith.constant 1 : index
      %c8 = arith.constant 8 : index
      %c0_24 = arith.constant 0 : index
      %65 = vector.load %arg5[%c0_23, %c1, %c8, %c0_24] : memref<2x18x32x4xf32, #tpu.memory_space<vmem>>, vector<2x16x16x4xf32>
      tpu.vector_store %arg5[%c0_23, %c1, %c8, %c0_24], %58 {strides = array<i32>} : memref<2x18x32x4xf32, #tpu.memory_space<vmem>>, vector<2x16x16x4xf32>,
    } else {
    }
    %c2_i32_21 = arith.constant 2 : i32
    %62 = arith.cmpi eq, %arg0, %c2_i32_21 : i32
    %63 = arith.extui %62 : i1 to i32
    %c0_i32_22 = arith.constant 0 : i32
    %64 = arith.cmpi ne, %63, %c0_i32_22 : i32
    scf.if %64 {
      %c0_23 = arith.constant 0 : index
      %c0_24 = arith.constant 0 : index
      %c0_25 = arith.constant 0 : index
      %c0_26 = arith.constant 0 : index
      %65 = vector.load %arg4[%c0_23, %c0_24, %c0_25, %c0_26] : memref<2x16x16x4xf32, #tpu.memory_space<vmem>>, vector<2x16x16x4xf32>
      tpu.vector_store %arg4[%c0_23, %c0_24, %c0_25, %c0_26], %58 {strides = array<i32>} : memref<2x16x16x4xf32, #tpu.memory_space<vmem>>, vector<2x16x16x4xf32>,
    } else {
    }
    return
  }
  func.func @transform_0(%arg0: i32) -> (i32, i32, i32, i32) {
    %c0_i32 = arith.constant 0 : i32
    %c0_i32_0 = arith.constant 0 : i32
    %c0_i32_1 = arith.constant 0 : i32
    %c0_i32_2 = arith.constant 0 : i32
    %c0_i32_3 = arith.constant 0 : i32
    return %c0_i32, %c0_i32_0, %c0_i32_1, %c0_i32_2 : i32, i32, i32, i32
  }
  func.func @transform_1(%arg0: i32) -> (i32, i32, i32) {
    %c0_i32 = arith.constant 0 : i32
    %c0_i32_0 = arith.constant 0 : i32
    %c0_i32_1 = arith.constant 0 : i32
    return %arg0, %c0_i32, %c0_i32_0 : i32, i32, i32
  }
  func.func @transform_2(%arg0: i32) -> (i32, i32, i32) {
    %c0_i32 = arith.constant 0 : i32
    %c0_i32_0 = arith.constant 0 : i32
    %c0_i32_1 = arith.constant 0 : i32
    return %arg0, %c0_i32, %c0_i32_0 : i32, i32, i32
  }
  func.func @transform_3(%arg0: i32) -> (i32, i32, i32, i32) {
    %c0_i32 = arith.constant 0 : i32
    %c0_i32_0 = arith.constant 0 : i32
    %c0_i32_1 = arith.constant 0 : i32
    %c0_i32_2 = arith.constant 0 : i32
    %c0_i32_3 = arith.constant 0 : i32
    return %c0_i32, %c0_i32_0, %c0_i32_1, %c0_i32_2 : i32, i32, i32, i32
  }
}

</mosaic_0001>

<bundles_post_ra>
// kernel: convnet_forward.1
= control target key start
LH: loop header
LB: loop body
LE: loop exit
PB: predicated region body
PF: predicated region fallthrough
CT: control target
= control target key end

     0   :  { %s8465_s12 = smov 0   ;;  %s11889_s0 = inlined_call_operand.vmem [shape: f32[2,16,16,4], index: 0, kind: input, shape index: {}]   ;;  %s11890_s1 = inlined_call_operand.vmem [shape: f32[3,36,4], index: 1, kind: input, shape index: {}]   ;;  %s11891_s2 = inlined_call_operand.vmem [shape: f32[3,1,4], index: 2, kind: input, shape index: {}]   ;;  %s11892_s3 = inlined_call_operand.vmem [shape: f32[2,16,16,4], index: 3, kind: output, shape index: {}]  }
   0x1 LB: > { %s8471_s13 = sadd.s32 4294967295, %s8442_s12   ;;  %p5789_p0 = scmp.ge.s32.totalorder %s8442_s12, 1  ;;  %s8442_s12 = sphi %s8465_s12, %s13_s12  }
   0x2   : > { %p140_p1 = scmp.lt.s32.totalorder %s8442_s12, 4 }
   0x4   : > { %p141_p2 = pnand %p5789_p0, %p140_p1 }
   0x6   : > { %144 = sbr.rel (%p141_p2) target bundleno = 977 (0x3d1), region = 32 }
   0xd   : > { %p162_p3 = scmp.lt.s32.totalorder %s8471_s13, 2  ;;  %p5791_p4 = scmp.ne.s32.totalorder %s8471_s13, 0 }
   0xe   : > { %vm174_vm0 = vcmask (!%p5791_p4), 31744   ;;  %v8493_v0 = vld [vmem:[%s11889_s0] sm:$0xff] (!%p5791_p4)  ;;  %v8498_v1 = vld [vmem:[%s11889_s0 + $0x8] sm:$0xff] (!%p5791_p4)  ;;  %v8503_v2 = vld [vmem:[%s11889_s0 + $0x10] sm:$0xff] (!%p5791_p4)  ;;  %v8444_v3 = vmov (!%p5791_p4), 0.0  }
   0xf   : > { %s8477_s14 = scalar_select %p162_p3, %s8471_s13, 2 }
  0x10   : > { %173 = sbr.rel (%p5791_p4) target bundleno = 120 (0x78), region = 36  ;;  %180 = vst.msk [vmem:[#allocation2 + $0x28] sm:$0xff] (!%p5791_p4), %vm174_vm0, %v8444_v3  ;;  %175 = vst.msk [vmem:[#allocation2] sm:$0xff] (!%p5791_p4), %vm174_vm0, %v8444_v3  ;;  %v322_v4 = vld [vmem:[%s11889_s0 + $0x18] sm:$0xff] (!%p5791_p4)  ;;  %v323_v5 = vld [vmem:[%s11889_s0 + $0x20] sm:$0xff] (!%p5791_p4) }
  0x11   : > { %s8363_s15 = smul.u32 40, %s8477_s14  ;;  %s169_s18 = scalar_lea.vmem %s11891_s2, %s8477_s14  ;;  %176 = vst.msk [vmem:[#allocation2 + $0x8] sm:$0xff] (!%p5791_p4), %vm174_vm0, %v8444_v3  ;;  %177 = vst.msk [vmem:[#allocation2 + $0x10] sm:$0xff] (!%p5791_p4), %vm174_vm0, %v8444_v3  ;;  %v324_v6 = vld [vmem:[%s11889_s0 + $0x28] sm:$0xff] (!%p5791_p4)  ;;  %v325_v7 = vld [vmem:[%s11889_s0 + $0x30] sm:$0xff] (!%p5791_p4) }
  0x12   : > { %178 = vst.msk [vmem:[#allocation2 + $0x18] sm:$0xff] (!%p5791_p4), %vm174_vm0, %v8444_v3  ;;  %179 = vst.msk [vmem:[#allocation2 + $0x20] sm:$0xff] (!%p5791_p4), %vm174_vm0, %v8444_v3  ;;  %v326_v8 = vld [vmem:[%s11889_s0 + $0x38] sm:$0xff] (!%p5791_p4)  ;;  %v327_v9 = vld [vmem:[%s11889_s0 + $0x40] sm:$0xff] (!%p5791_p4) }
  0x13   : > { %s8487_s21 = scalar_lea.vmem %s11890_s1, %s8363_s15  ;;  %181 = vst.msk [vmem:[#allocation2 + $0x30] sm:$0xff] (!%p5791_p4), %vm174_vm0, %v8444_v3  ;;  %182 = vst.msk [vmem:[#allocation2 + $0x38] sm:$0xff] (!%p5791_p4), %vm174_vm0, %v8444_v3  ;;  %v328_v10 = vld [vmem:[%s11889_s0 + $0x48] sm:$0xff] (!%p5791_p4)  ;;  %v329_v11 = vld [vmem:[%s11889_s0 + $0x50] sm:$0xff] (!%p5791_p4) }
  0x14   : > { %183 = vst.msk [vmem:[#allocation2 + $0x40] sm:$0xff] (!%p5791_p4), %vm174_vm0, %v8444_v3  ;;  %184 = vst.msk [vmem:[#allocation2 + $0x48] sm:$0xff] (!%p5791_p4), %vm174_vm0, %v8444_v3  ;;  %v330_v12 = vld [vmem:[%s11889_s0 + $0x58] sm:$0xff] (!%p5791_p4)  ;;  %v331_v13 = vld [vmem:[%s11889_s0 + $0x60] sm:$0xff] (!%p5791_p4) }
  0x15   : > { %185 = vst.msk [vmem:[#allocation2 + $0x50] sm:$0xff] (!%p5791_p4), %vm174_vm0, %v8444_v3  ;;  %186 = vst.msk [vmem:[#allocation2 + $0x58] sm:$0xff] (!%p5791_p4), %vm174_vm0, %v8444_v3  ;;  %v332_v14 = vld [vmem:[%s11889_s0 + $0x68] sm:$0xff] (!%p5791_p4)  ;;  %v333_v15 = vld [vmem:[%s11889_s0 + $0x70] sm:$0xff] (!%p5791_p4) }
  0x16   : > { %187 = vst.msk [vmem:[#allocation2 + $0x60] sm:$0xff] (!%p5791_p4), %vm174_vm0, %v8444_v3  ;;  %188 = vst.msk [vmem:[#allocation2 + $0x68] sm:$0xff] (!%p5791_p4), %vm174_vm0, %v8444_v3  ;;  %v334_v16 = vld [vmem:[%s11889_s0 + $0x78] sm:$0xff] (!%p5791_p4)  ;;  %v335_v17 = vld [vmem:[%s11889_s0 + $0x80] sm:$0xff] (!%p5791_p4) }
  0x17   : > { %189 = vst.msk [vmem:[#allocation2 + $0x70] sm:$0xff] %vm174_vm0, %v8444_v3  ;;  %190 = vst.msk [vmem:[#allocation2 + $0x78] sm:$0xff] %vm174_vm0, %v8444_v3  ;;  %v336_v18 = vld [vmem:[%s11889_s0 + $0x88] sm:$0xff]  ;;  %v337_v19 = vld [vmem:[%s11889_s0 + $0x90] sm:$0xff] }
  0x18   : > { %191 = vst.msk [vmem:[#allocation2 + $0x80] sm:$0xff] %vm174_vm0, %v8444_v3  ;;  %192 = vst.msk [vmem:[#allocation2 + $0x88] sm:$0xff] %vm174_vm0, %v8444_v3  ;;  %v338_v20 = vld [vmem:[%s11889_s0 + $0x98] sm:$0xff]  ;;  %v339_v21 = vld [vmem:[%s11889_s0 + $0xa0] sm:$0xff] }
  0x19   : > { %193 = vst.msk [vmem:[#allocation2 + $0x90] sm:$0xff] %vm174_vm0, %v8444_v3  ;;  %194 = vst.msk [vmem:[#allocation2 + $0x98] sm:$0xff] %vm174_vm0, %v8444_v3  ;;  %v340_v22 = vld [vmem:[%s11889_s0 + $0xa8] sm:$0xff]  ;;  %v341_v23 = vld [vmem:[%s11889_s0 + $0xb0] sm:$0xff] }
  0x1a   : > { %195 = vst.msk [vmem:[#allocation2 + $0xa0] sm:$0xff] %vm174_vm0, %v8444_v3  ;;  %196 = vst.msk [vmem:[#allocation2 + $0xa8] sm:$0xff] %vm174_vm0, %v8444_v3  ;;  %v342_v24 = vld [vmem:[%s11889_s0 + $0xb8] sm:$0xff]  ;;  %v343_v25 = vld [vmem:[%s11889_s0 + $0xc0] sm:$0xff] }
  0x1b   : > { %197 = vst.msk [vmem:[#allocation2 + $0xb0] sm:$0xff] %vm174_vm0, %v8444_v3  ;;  %198 = vst.msk [vmem:[#allocation2 + $0xb8] sm:$0xff] %vm174_vm0, %v8444_v3  ;;  %v344_v26 = vld [vmem:[%s11889_s0 + $0xc8] sm:$0xff]  ;;  %v345_v27 = vld [vmem:[%s11889_s0 + $0xd0] sm:$0xff] }
  0x1c   : > { %199 = vst.msk [vmem:[#allocation2 + $0xc0] sm:$0xff] %vm174_vm0, %v8444_v3  ;;  %200 = vst.msk [vmem:[#allocation2 + $0xc8] sm:$0xff] %vm174_vm0, %v8444_v3  ;;  %v346_v28 = vld [vmem:[%s11889_s0 + $0xd8] sm:$0xff]  ;;  %v347_v29 = vld [vmem:[%s11889_s0 + $0xe0] sm:$0xff] }
  0x1d   : > { %201 = vst.msk [vmem:[#allocation2 + $0xd0] sm:$0xff] %vm174_vm0, %v8444_v3  ;;  %202 = vst.msk [vmem:[#allocation2 + $0xd8] sm:$0xff] %vm174_vm0, %v8444_v3  ;;  %v348_v30 = vld [vmem:[%s11889_s0 + $0xe8] sm:$0xff]  ;;  %v349_v31 = vld [vmem:[%s11889_s0 + $0xf0] sm:$0xff] }
  0x1e   : > { %203 = vst.msk [vmem:[#allocation2 + $0xe0] sm:$0xff] %vm174_vm0, %v8444_v3  ;;  %204 = vst.msk [vmem:[#allocation2 + $0xe8] sm:$0xff] %vm174_vm0, %v8444_v3  ;;  %v350_v32 = vld [vmem:[%s11889_s0 + $0xf8] sm:$0xff]  ;;  %v351_v33 = vld [vmem:[%s11889_s0 + $0x100] sm:$0xff] }
  0x1f   : > { %205 = vst.msk [vmem:[#allocation2 + $0xf0] sm:$0xff] %vm174_vm0, %v8444_v3  ;;  %206 = vst.msk [vmem:[#allocation2 + $0xf8] sm:$0xff] %vm174_vm0, %v8444_v3  ;;  %v352_v34 = vld [vmem:[%s11889_s0 + $0x108] sm:$0xff]  ;;  %v353_v35 = vld [vmem:[%s11889_s0 + $0x110] sm:$0xff] }
  0x20   : > { %207 = vst.msk [vmem:[#allocation2 + $0x100] sm:$0xff] %vm174_vm0, %v8444_v3  ;;  %208 = vst.msk [vmem:[#allocation2 + $0x108] sm:$0xff] %vm174_vm0, %v8444_v3  ;;  %v354_v36 = vld [vmem:[%s11889_s0 + $0x118] sm:$0xff]  ;;  %v355_v37 = vld [vmem:[%s11889_s0 + $0x120] sm:$0xff] }
  0x21   : > { %209 = vst.msk [vmem:[#allocation2 + $0x110] sm:$0xff] %vm174_vm0, %v8444_v3  ;;  %210 = vst.msk [vmem:[#allocation2 + $0x118] sm:$0xff] %vm174_vm0, %v8444_v3  ;;  %v356_v38 = vld [vmem:[%s11889_s0 + $0x128] sm:$0xff]  ;;  %v357_v39 = vld [vmem:[%s11889_s0 + $0x130] sm:$0xff] }
  0x22   : > { %211 = vst.msk [vmem:[#allocation2 + $0x120] sm:$0xff] %vm174_vm0, %v8444_v3  ;;  %212 = vst.msk [vmem:[#allocation2 + $0x128] sm:$0xff] %vm174_vm0, %v8444_v3  ;;  %v358_v40 = vld [vmem:[%s11889_s0 + $0x138] sm:$0xff]  ;;  %v359_v41 = vld [vmem:[%s11889_s0 + $0x140] sm:$0xff] }
  0x23   : > { %213 = vst.msk [vmem:[#allocation2 + $0x130] sm:$0xff] %vm174_vm0, %v8444_v3  ;;  %214 = vst.msk [vmem:[#allocation2 + $0x138] sm:$0xff] %vm174_vm0, %v8444_v3  ;;  %v360_v42 = vld [vmem:[%s11889_s0 + $0x148] sm:$0xff]  ;;  %v361_v43 = vld [vmem:[%s11889_s0 + $0x150] sm:$0xff] }
  0x24   : > { %215 = vst.msk [vmem:[#allocation2 + $0x140] sm:$0xff] %vm174_vm0, %v8444_v3  ;;  %216 = vst.msk [vmem:[#allocation2 + $0x148] sm:$0xff] %vm174_vm0, %v8444_v3  ;;  %v362_v44 = vld [vmem:[%s11889_s0 + $0x158] sm:$0xff]  ;;  %v363_v45 = vld [vmem:[%s11889_s0 + $0x160] sm:$0xff] }
  0x25   : > { %217 = vst.msk [vmem:[#allocation2 + $0x150] sm:$0xff] %vm174_vm0, %v8444_v3  ;;  %218 = vst.msk [vmem:[#allocation2 + $0x158] sm:$0xff] %vm174_vm0, %v8444_v3  ;;  %v364_v46 = vld [vmem:[%s11889_s0 + $0x168] sm:$0xff]  ;;  %v365_v47 = vld [vmem:[%s11889_s0 + $0x170] sm:$0xff] }
  0x26   : > { %219 = vst.msk [vmem:[#allocation2 + $0x160] sm:$0xff] %vm174_vm0, %v8444_v3  ;;  %220 = vst.msk [vmem:[#allocation2 + $0x168] sm:$0xff] %vm174_vm0, %v8444_v3  ;;  %v366_v48 = vld [vmem:[%s11889_s0 + $0x178] sm:$0xff]  ;;  %v367_v49 = vld [vmem:[%s11889_s0 + $0x180] sm:$0xff] }
  0x27   : > { %221 = vst.msk [vmem:[#allocation2 + $0x170] sm:$0xff] %vm174_vm0, %v8444_v3  ;;  %222 = vst.msk [vmem:[#allocation2 + $0x178] sm:$0xff] %vm174_vm0, %v8444_v3  ;;  %v368_v50 = vld [vmem:[%s11889_s0 + $0x188] sm:$0xff]  ;;  %v369_v51 = vld [vmem:[%s11889_s0 + $0x190] sm:$0xff] }
  0x28   : > { %223 = vst.msk [vmem:[#allocation2 + $0x180] sm:$0xff] %vm174_vm0, %v8444_v3  ;;  %224 = vst.msk [vmem:[#allocation2 + $0x188] sm:$0xff] %vm174_vm0, %v8444_v3  ;;  %v370_v52 = vld [vmem:[%s11889_s0 + $0x198] sm:$0xff]  ;;  %v371_v53 = vld [vmem:[%s11889_s0 + $0x1a0] sm:$0xff] }
  0x29   : > { %225 = vst.msk [vmem:[#allocation2 + $0x190] sm:$0xff] %vm174_vm0, %v8444_v3  ;;  %226 = vst.msk [vmem:[#allocation2 + $0x198] sm:$0xff] %vm174_vm0, %v8444_v3  ;;  %v372_v54 = vld [vmem:[%s11889_s0 + $0x1a8] sm:$0xff]  ;;  %v373_v55 = vld [vmem:[%s11889_s0 + $0x1b0] sm:$0xff] }
  0x2a   : > { %227 = vst.msk [vmem:[#allocation2 + $0x1a0] sm:$0xff] %vm174_vm0, %v8444_v3  ;;  %228 = vst.msk [vmem:[#allocation2 + $0x1a8] sm:$0xff] %vm174_vm0, %v8444_v3  ;;  %v374_v56 = vld [vmem:[%s11889_s0 + $0x1b8] sm:$0xff]  ;;  %v375_v57 = vld [vmem:[%s11889_s0 + $0x1c0] sm:$0xff] }
  0x2b   : > { %229 = vst.msk [vmem:[#allocation2 + $0x1b0] sm:$0xff] %vm174_vm0, %v8444_v3  ;;  %230 = vst.msk [vmem:[#allocation2 + $0x1b8] sm:$0xff] %vm174_vm0, %v8444_v3  ;;  %v376_v58 = vld [vmem:[%s11889_s0 + $0x1c8] sm:$0xff]  ;;  %v377_v59 = vld [vmem:[%s11889_s0 + $0x1d0] sm:$0xff] }
  0x2c   : > { %231 = vst.msk [vmem:[#allocation2 + $0x1c0] sm:$0xff] %vm174_vm0, %v8444_v3  ;;  %232 = vst.msk [vmem:[#allocation2 + $0x1c8] sm:$0xff] %vm174_vm0, %v8444_v3  ;;  %v378_v60 = vld [vmem:[%s11889_s0 + $0x1d8] sm:$0xff]  ;;  %v379_v61 = vld [vmem:[%s11889_s0 + $0x1e0] sm:$0xff] }
  0x2d   : > { %233 = vst.msk [vmem:[#allocation2 + $0x1d0] sm:$0xff] %vm174_vm0, %v8444_v3  ;;  %234 = vst.msk [vmem:[#allocation2 + $0x1d8] sm:$0xff] %vm174_vm0, %v8444_v3  ;;  %v380_v62 = vld [vmem:[%s11889_s0 + $0x1e8] sm:$0xff]  ;;  %v381_v63 = vld [vmem:[%s11889_s0 + $0x1f0] sm:$0xff] }
  0x2e   : > { %235 = vst.msk [vmem:[#allocation2 + $0x1e0] sm:$0xff] %vm174_vm0, %v8444_v3  ;;  %236 = vst.msk [vmem:[#allocation2 + $0x1e8] sm:$0xff] %vm174_vm0, %v8444_v3 }
  0x2f   : > { %237 = vst.msk [vmem:[#allocation2 + $0x1f0] sm:$0xff] %vm174_vm0, %v8444_v3  ;;  %238 = vst.msk [vmem:[#allocation2 + $0x1f8] sm:$0xff] %vm174_vm0, %v8444_v3 }
  0x30   : > { %239 = vst.msk [vmem:[#allocation2 + $0x200] sm:$0xff] %vm174_vm0, %v8444_v3  ;;  %240 = vst.msk [vmem:[#allocation2 + $0x208] sm:$0xff] %vm174_vm0, %v8444_v3 }
  0x31   : > { %241 = vst.msk [vmem:[#allocation2 + $0x210] sm:$0xff] %vm174_vm0, %v8444_v3  ;;  %242 = vst.msk [vmem:[#allocation2 + $0x218] sm:$0xff] %vm174_vm0, %v8444_v3 }
  0x32   : > { %243 = vst.msk [vmem:[#allocation2 + $0x220] sm:$0xff] %vm174_vm0, %v8444_v3  ;;  %244 = vst.msk [vmem:[#allocation2 + $0x228] sm:$0xff] %vm174_vm0, %v8444_v3 }
  0x33   : > { %245 = vst.msk [vmem:[#allocation2 + $0x230] sm:$0xff] %vm174_vm0, %v8444_v3  ;;  %246 = vst.msk [vmem:[#allocation2 + $0x238] sm:$0xff] %vm174_vm0, %v8444_v3 }
  0x34   : > { %247 = vst.msk [vmem:[#allocation2 + $0x240] sm:$0xff] %vm174_vm0, %v8444_v3  ;;  %248 = vst.msk [vmem:[#allocation2 + $0x248] sm:$0xff] %vm174_vm0, %v8444_v3 }
  0x35   : > { %249 = vst.msk [vmem:[#allocation2 + $0x250] sm:$0xff] %vm174_vm0, %v8444_v3  ;;  %250 = vst.msk [vmem:[#allocation2 + $0x258] sm:$0xff] %vm174_vm0, %v8444_v3 }
  0x36   : > { %251 = vst.msk [vmem:[#allocation2 + $0x260] sm:$0xff] %vm174_vm0, %v8444_v3  ;;  %252 = vst.msk [vmem:[#allocation2 + $0x268] sm:$0xff] %vm174_vm0, %v8444_v3 }
  0x37   : > { %253 = vst.msk [vmem:[#allocation2 + $0x270] sm:$0xff] %vm174_vm0, %v8444_v3  ;;  %254 = vst.msk [vmem:[#allocation2 + $0x278] sm:$0xff] %vm174_vm0, %v8444_v3 }
  0x38   : > { %255 = vst.msk [vmem:[#allocation2 + $0x280] sm:$0xff] %vm174_vm0, %v8444_v3  ;;  %256 = vst.msk [vmem:[#allocation2 + $0x288] sm:$0xff] %vm174_vm0, %v8444_v3 }
  0x39   : > { %257 = vst.msk [vmem:[#allocation2 + $0x290] sm:$0xff] %vm174_vm0, %v8444_v3  ;;  %258 = vst.msk [vmem:[#allocation2 + $0x298] sm:$0xff] %vm174_vm0, %v8444_v3 }
  0x3a   : > { %259 = vst.msk [vmem:[#allocation2 + $0x2a0] sm:$0xff] %vm174_vm0, %v8444_v3  ;;  %260 = vst.msk [vmem:[#allocation2 + $0x2a8] sm:$0xff] %vm174_vm0, %v8444_v3 }
  0x3b   : > { %261 = vst.msk [vmem:[#allocation2 + $0x2b0] sm:$0xff] %vm174_vm0, %v8444_v3  ;;  %262 = vst.msk [vmem:[#allocation2 + $0x2b8] sm:$0xff] %vm174_vm0, %v8444_v3 }
  0x3c   : > { %263 = vst.msk [vmem:[#allocation2 + $0x2c0] sm:$0xff] %vm174_vm0, %v8444_v3  ;;  %264 = vst.msk [vmem:[#allocation2 + $0x2c8] sm:$0xff] %vm174_vm0, %v8444_v3 }
  0x3d   : > { %265 = vst.msk [vmem:[#allocation2 + $0x2d0] sm:$0xff] %vm174_vm0, %v8444_v3  ;;  %266 = vst.msk [vmem:[#allocation2 + $0x2d8] sm:$0xff] %vm174_vm0, %v8444_v3 }
  0x3e   : > { %267 = vst.msk [vmem:[#allocation2 + $0x2e0] sm:$0xff] %vm174_vm0, %v8444_v3  ;;  %268 = vst.msk [vmem:[#allocation2 + $0x2e8] sm:$0xff] %vm174_vm0, %v8444_v3 }
  0x3f   : > { %269 = vst.msk [vmem:[#allocation2 + $0x2f0] sm:$0xff] %vm174_vm0, %v8444_v3  ;;  %270 = vst.msk [vmem:[#allocation2 + $0x2f8] sm:$0xff] %vm174_vm0, %v8444_v3 }
  0x40   : > { %271 = vst.msk [vmem:[#allocation2 + $0x300] sm:$0xff] %vm174_vm0, %v8444_v3  ;;  %272 = vst.msk [vmem:[#allocation2 + $0x308] sm:$0xff] %vm174_vm0, %v8444_v3 }
  0x41   : > { %273 = vst.msk [vmem:[#allocation2 + $0x310] sm:$0xff] %vm174_vm0, %v8444_v3  ;;  %274 = vst.msk [vmem:[#allocation2 + $0x318] sm:$0xff] %vm174_vm0, %v8444_v3 }
  0x42   : > { %275 = vst.msk [vmem:[#allocation2 + $0x320] sm:$0xff] %vm174_vm0, %v8444_v3  ;;  %276 = vst.msk [vmem:[#allocation2 + $0x328] sm:$0xff] %vm174_vm0, %v8444_v3 }
  0x43   : > { %277 = vst.msk [vmem:[#allocation2 + $0x330] sm:$0xff] %vm174_vm0, %v8444_v3  ;;  %278 = vst.msk [vmem:[#allocation2 + $0x338] sm:$0xff] %vm174_vm0, %v8444_v3 }
  0x44   : > { %279 = vst.msk [vmem:[#allocation2 + $0x340] sm:$0xff] %vm174_vm0, %v8444_v3  ;;  %280 = vst.msk [vmem:[#allocation2 + $0x348] sm:$0xff] %vm174_vm0, %v8444_v3 }
  0x45   : > { %281 = vst.msk [vmem:[#allocation2 + $0x350] sm:$0xff] %vm174_vm0, %v8444_v3  ;;  %282 = vst.msk [vmem:[#allocation2 + $0x358] sm:$0xff] %vm174_vm0, %v8444_v3 }
  0x46   : > { %283 = vst.msk [vmem:[#allocation2 + $0x360] sm:$0xff] %vm174_vm0, %v8444_v3  ;;  %284 = vst.msk [vmem:[#allocation2 + $0x368] sm:$0xff] %vm174_vm0, %v8444_v3 }
  0x47   : > { %285 = vst.msk [vmem:[#allocation2 + $0x370] sm:$0xff] %vm174_vm0, %v8444_v3  ;;  %286 = vst.msk [vmem:[#allocation2 + $0x378] sm:$0xff] %vm174_vm0, %v8444_v3 }
  0x48   : > { %287 = vst.msk [vmem:[#allocation2 + $0x380] sm:$0xff] %vm174_vm0, %v8444_v3  ;;  %288 = vst.msk [vmem:[#allocation2 + $0x388] sm:$0xff] %vm174_vm0, %v8444_v3 }
  0x49   : > { %289 = vst.msk [vmem:[#allocation2 + $0x390] sm:$0xff] %vm174_vm0, %v8444_v3  ;;  %290 = vst.msk [vmem:[#allocation2 + $0x398] sm:$0xff] %vm174_vm0, %v8444_v3 }
  0x4a   : > { %291 = vst.msk [vmem:[#allocation2 + $0x3a0] sm:$0xff] %vm174_vm0, %v8444_v3  ;;  %292 = vst.msk [vmem:[#allocation2 + $0x3a8] sm:$0xff] %vm174_vm0, %v8444_v3 }
  0x4b   : > { %293 = vst.msk [vmem:[#allocation2 + $0x3b0] sm:$0xff] %vm174_vm0, %v8444_v3  ;;  %294 = vst.msk [vmem:[#allocation2 + $0x3b8] sm:$0xff] %vm174_vm0, %v8444_v3 }
  0x4c   : > { %295 = vst.msk [vmem:[#allocation2 + $0x3c0] sm:$0xff] %vm174_vm0, %v8444_v3  ;;  %296 = vst.msk [vmem:[#allocation2 + $0x3c8] sm:$0xff] %vm174_vm0, %v8444_v3 }
  0x4d   : > { %297 = vst.msk [vmem:[#allocation2 + $0x3d0] sm:$0xff] %vm174_vm0, %v8444_v3  ;;  %298 = vst.msk [vmem:[#allocation2 + $0x3d8] sm:$0xff] %vm174_vm0, %v8444_v3 }
  0x4e   : > { %299 = vst.msk [vmem:[#allocation2 + $0x3e0] sm:$0xff] %vm174_vm0, %v8444_v3  ;;  %300 = vst.msk [vmem:[#allocation2 + $0x3e8] sm:$0xff] %vm174_vm0, %v8444_v3 }
  0x4f   : > { %301 = vst.msk [vmem:[#allocation2 + $0x3f0] sm:$0xff] %vm174_vm0, %v8444_v3  ;;  %302 = vst.msk [vmem:[#allocation2 + $0x3f8] sm:$0xff] %vm174_vm0, %v8444_v3 }
  0x50   : > { %303 = vst.msk [vmem:[#allocation2 + $0x400] sm:$0xff] %vm174_vm0, %v8444_v3  ;;  %304 = vst.msk [vmem:[#allocation2 + $0x408] sm:$0xff] %vm174_vm0, %v8444_v3 }
  0x51   : > { %305 = vst.msk [vmem:[#allocation2 + $0x410] sm:$0xff] %vm174_vm0, %v8444_v3  ;;  %306 = vst.msk [vmem:[#allocation2 + $0x418] sm:$0xff] %vm174_vm0, %v8444_v3 }
  0x52   : > { %307 = vst.msk [vmem:[#allocation2 + $0x420] sm:$0xff] %vm174_vm0, %v8444_v3  ;;  %308 = vst.msk [vmem:[#allocation2 + $0x428] sm:$0xff] %vm174_vm0, %v8444_v3 }
  0x53   : > { %309 = vst.msk [vmem:[#allocation2 + $0x430] sm:$0xff] %vm174_vm0, %v8444_v3  ;;  %310 = vst.msk [vmem:[#allocation2 + $0x438] sm:$0xff] %vm174_vm0, %v8444_v3 }
  0x54   : > { %311 = vst.msk [vmem:[#allocation2 + $0x440] sm:$0xff] %vm174_vm0, %v8444_v3  ;;  %312 = vst.msk [vmem:[#allocation2 + $0x448] sm:$0xff] %vm174_vm0, %v8444_v3 }
  0x55   : > { %313 = vst.msk [vmem:[#allocation2 + $0x450] sm:$0xff] %vm174_vm0, %v8444_v3  ;;  %314 = vst.msk [vmem:[#allocation2 + $0x458] sm:$0xff] %vm174_vm0, %v8444_v3 }
  0x56   : > { %315 = vst.msk [vmem:[#allocation2 + $0x460] sm:$0xff] %vm174_vm0, %v8444_v3  ;;  %316 = vst.msk [vmem:[#allocation2 + $0x468] sm:$0xff] %vm174_vm0, %v8444_v3 }
  0x57   : > { %317 = vst.msk [vmem:[#allocation2 + $0x470] sm:$0xff] %vm174_vm0, %v8444_v3  ;;  %318 = vst.msk [vmem:[#allocation2 + $0x478] sm:$0xff] %vm174_vm0, %v8444_v3 }
  0x58   : > { %384 = vst.msk [vmem:[#allocation2 + $0x28] sm:$0xff] %vm174_vm0, %v8493_v0  ;;  %385 = vst.msk [vmem:[#allocation2 + $0x30] sm:$0xff] %vm174_vm0, %v8498_v1  ;;  %v382_v0 = vld [vmem:[%s11889_s0 + $0x1f8] sm:$0xff] }
  0x59   : > { %386 = vst.msk [vmem:[#allocation2 + $0x48] sm:$0xff] %vm174_vm0, %v8503_v2  ;;  %387 = vst.msk [vmem:[#allocation2 + $0x50] sm:$0xff] %vm174_vm0, %v322_v4 }
  0x5a   : > { %388 = vst.msk [vmem:[#allocation2 + $0x68] sm:$0xff] %vm174_vm0, %v323_v5  ;;  %389 = vst.msk [vmem:[#allocation2 + $0x70] sm:$0xff] %vm174_vm0, %v324_v6 }
  0x5b   : > { %390 = vst.msk [vmem:[#allocation2 + $0x88] sm:$0xff] %vm174_vm0, %v325_v7  ;;  %391 = vst.msk [vmem:[#allocation2 + $0x90] sm:$0xff] %vm174_vm0, %v326_v8 }
  0x5c   : > { %392 = vst.msk [vmem:[#allocation2 + $0xa8] sm:$0xff] %vm174_vm0, %v327_v9  ;;  %393 = vst.msk [vmem:[#allocation2 + $0xb0] sm:$0xff] %vm174_vm0, %v328_v10 }
  0x5d   : > { %394 = vst.msk [vmem:[#allocation2 + $0xc8] sm:$0xff] %vm174_vm0, %v329_v11  ;;  %395 = vst.msk [vmem:[#allocation2 + $0xd0] sm:$0xff] %vm174_vm0, %v330_v12 }
  0x5e   : > { %396 = vst.msk [vmem:[#allocation2 + $0xe8] sm:$0xff] %vm174_vm0, %v331_v13  ;;  %397 = vst.msk [vmem:[#allocation2 + $0xf0] sm:$0xff] %vm174_vm0, %v332_v14 }
  0x5f   : > { %398 = vst.msk [vmem:[#allocation2 + $0x108] sm:$0xff] %vm174_vm0, %v333_v15  ;;  %399 = vst.msk [vmem:[#allocation2 + $0x110] sm:$0xff] %vm174_vm0, %v334_v16 }
  0x60   : > { %400 = vst.msk [vmem:[#allocation2 + $0x128] sm:$0xff] %vm174_vm0, %v335_v17  ;;  %401 = vst.msk [vmem:[#allocation2 + $0x130] sm:$0xff] %vm174_vm0, %v336_v18 }
  0x61   : > { %402 = vst.msk [vmem:[#allocation2 + $0x148] sm:$0xff] %vm174_vm0, %v337_v19  ;;  %403 = vst.msk [vmem:[#allocation2 + $0x150] sm:$0xff] %vm174_vm0, %v338_v20 }
  0x62   : > { %404 = vst.msk [vmem:[#allocation2 + $0x168] sm:$0xff] %vm174_vm0, %v339_v21  ;;  %405 = vst.msk [vmem:[#allocation2 + $0x170] sm:$0xff] %vm174_vm0, %v340_v22 }
  0x63   : > { %406 = vst.msk [vmem:[#allocation2 + $0x188] sm:$0xff] %vm174_vm0, %v341_v23  ;;  %407 = vst.msk [vmem:[#allocation2 + $0x190] sm:$0xff] %vm174_vm0, %v342_v24 }
  0x64   : > { %408 = vst.msk [vmem:[#allocation2 + $0x1a8] sm:$0xff] %vm174_vm0, %v343_v25  ;;  %409 = vst.msk [vmem:[#allocation2 + $0x1b0] sm:$0xff] %vm174_vm0, %v344_v26 }
  0x65   : > { %410 = vst.msk [vmem:[#allocation2 + $0x1c8] sm:$0xff] %vm174_vm0, %v345_v27  ;;  %411 = vst.msk [vmem:[#allocation2 + $0x1d0] sm:$0xff] %vm174_vm0, %v346_v28 }
  0x66   : > { %412 = vst.msk [vmem:[#allocation2 + $0x1e8] sm:$0xff] %vm174_vm0, %v347_v29  ;;  %413 = vst.msk [vmem:[#allocation2 + $0x1f0] sm:$0xff] %vm174_vm0, %v348_v30 }
  0x67   : > { %414 = vst.msk [vmem:[#allocation2 + $0x208] sm:$0xff] %vm174_vm0, %v349_v31  ;;  %415 = vst.msk [vmem:[#allocation2 + $0x210] sm:$0xff] %vm174_vm0, %v350_v32 }
  0x68   : > { %416 = vst.msk [vmem:[#allocation2 + $0x268] sm:$0xff] %vm174_vm0, %v351_v33  ;;  %417 = vst.msk [vmem:[#allocation2 + $0x270] sm:$0xff] %vm174_vm0, %v352_v34 }
  0x69   : > { %418 = vst.msk [vmem:[#allocation2 + $0x288] sm:$0xff] %vm174_vm0, %v353_v35  ;;  %419 = vst.msk [vmem:[#allocation2 + $0x290] sm:$0xff] %vm174_vm0, %v354_v36 }
  0x6a   : > { %420 = vst.msk [vmem:[#allocation2 + $0x2a8] sm:$0xff] %vm174_vm0, %v355_v37  ;;  %421 = vst.msk [vmem:[#allocation2 + $0x2b0] sm:$0xff] %vm174_vm0, %v356_v38 }
  0x6b   : > { %422 = vst.msk [vmem:[#allocation2 + $0x2c8] sm:$0xff] %vm174_vm0, %v357_v39  ;;  %423 = vst.msk [vmem:[#allocation2 + $0x2d0] sm:$0xff] %vm174_vm0, %v358_v40 }
  0x6c   : > { %424 = vst.msk [vmem:[#allocation2 + $0x2e8] sm:$0xff] %vm174_vm0, %v359_v41  ;;  %425 = vst.msk [vmem:[#allocation2 + $0x2f0] sm:$0xff] %vm174_vm0, %v360_v42 }
  0x6d   : > { %426 = vst.msk [vmem:[#allocation2 + $0x308] sm:$0xff] %vm174_vm0, %v361_v43  ;;  %427 = vst.msk [vmem:[#allocation2 + $0x310] sm:$0xff] %vm174_vm0, %v362_v44 }
  0x6e   : > { %428 = vst.msk [vmem:[#allocation2 + $0x328] sm:$0xff] %vm174_vm0, %v363_v45  ;;  %429 = vst.msk [vmem:[#allocation2 + $0x330] sm:$0xff] %vm174_vm0, %v364_v46 }
  0x6f   : > { %430 = vst.msk [vmem:[#allocation2 + $0x348] sm:$0xff] %vm174_vm0, %v365_v47  ;;  %431 = vst.msk [vmem:[#allocation2 + $0x350] sm:$0xff] %vm174_vm0, %v366_v48 }
  0x70   : > { %432 = vst.msk [vmem:[#allocation2 + $0x368] sm:$0xff] %vm174_vm0, %v367_v49  ;;  %433 = vst.msk [vmem:[#allocation2 + $0x370] sm:$0xff] %vm174_vm0, %v368_v50 }
  0x71   : > { %434 = vst.msk [vmem:[#allocation2 + $0x388] sm:$0xff] %vm174_vm0, %v369_v51  ;;  %435 = vst.msk [vmem:[#allocation2 + $0x390] sm:$0xff] %vm174_vm0, %v370_v52 }
  0x72   : > { %436 = vst.msk [vmem:[#allocation2 + $0x3a8] sm:$0xff] %vm174_vm0, %v371_v53  ;;  %437 = vst.msk [vmem:[#allocation2 + $0x3b0] sm:$0xff] %vm174_vm0, %v372_v54 }
  0x73   : > { %438 = vst.msk [vmem:[#allocation2 + $0x3c8] sm:$0xff] %vm174_vm0, %v373_v55  ;;  %439 = vst.msk [vmem:[#allocation2 + $0x3d0] sm:$0xff] %vm174_vm0, %v374_v56 }
  0x74   : > { %440 = vst.msk [vmem:[#allocation2 + $0x3e8] sm:$0xff] %vm174_vm0, %v375_v57  ;;  %441 = vst.msk [vmem:[#allocation2 + $0x3f0] sm:$0xff] %vm174_vm0, %v376_v58 }
  0x75   : > { %442 = vst.msk [vmem:[#allocation2 + $0x408] sm:$0xff] %vm174_vm0, %v377_v59  ;;  %443 = vst.msk [vmem:[#allocation2 + $0x410] sm:$0xff] %vm174_vm0, %v378_v60 }
  0x76   : > { %444 = vst.msk [vmem:[#allocation2 + $0x428] sm:$0xff] %vm174_vm0, %v379_v61  ;;  %445 = vst.msk [vmem:[#allocation2 + $0x430] sm:$0xff] %vm174_vm0, %v380_v62 }
  0x77   : > { %446 = vst.msk [vmem:[#allocation2 + $0x448] sm:$0xff] %vm174_vm0, %v381_v63  ;;  %447 = vst.msk [vmem:[#allocation2 + $0x450] sm:$0xff] %vm174_vm0, %v382_v0 }
  0x78 PF: > { %v594_v1 = vld [vmem:[%s8487_s21 + $0x10] sm:$0xff]  ;;  %vm986_vm1 = vcmask 1043456   ;;  %v9044_v2 = vld [vmem:[#allocation2 + $0x28] sm:$0xff]  ;;  %vm857_vm2 = vcmask 31744   ;;  %v592_v3 = vld [vmem:[%s8487_s21] sm:$0xff]  ;;  %vm694_vm3 = vcmask 1040384  }
  0x79   : > { %7359 = vmatprep.subr.msk.mxu0 %vm986_vm1, %v594_v1  ;;  %7361 = vmatprep.mubr.msk.f32.mxu0 %vm857_vm2, %v9044_v2  ;;  %v856_v4 = vrot.slane %v592_v3, 4  ;;  %v9052_v6 = vld [vmem:[#allocation2 + $0x8] sm:$0xff]  ;;  %v9057_v7 = vld [vmem:[#allocation2 + $0x10] sm:$0xff]  ;;  %v3610_v9 = vrot.slane %v594_v1, 4  ;;  %v9100_v15 = vld [vmem:[%s8487_s21 + $0x18] sm:$0xff]  ;;  %v11895_v21 = vrot.slane %v9044_v2, 7 }
  0x7a   : > { %7360 = vmatpush3.msk.msra.mxu0 %vm986_vm1, %v594_v1  ;;  %6969 = vmatprep.mubr.msk.f32.mxu1 %vm857_vm2, %v9052_v6  ;;  %12111 = vst [vmem:[#allocation3_spill] sm:$0xff] %v9057_v7  ;;  %v9089_v13 = vld [vmem:[#allocation2 + $0x88] sm:$0xff]  ;;  %v9097_v14 = vld [vmem:[#allocation2 + $0x90] sm:$0xff]  ;;  %12112 = vst [vmem:[#allocation4_spill] sm:$0xff] %v9100_v15  ;;  %v11896_v19 = vrot.slane %v9052_v6, 7  ;;  %v698_v20 = vrot.slane %v9057_v7, 7 }
  0x7b   : > { %v9050_v5 = vld [vmem:[#allocation2 + $0x30] sm:$0xff]  ;;  %6967 = vmatprep.subr.msk.mxu1 %vm986_vm1, %v856_v4  ;;  %7457 = vmatprep.subr.msk.mxu0 %vm986_vm1, %v3610_v9  ;;  %v9104_v16 = vld [vmem:[#allocation2 + $0xa8] sm:$0xff]  ;;  %v1927_v45 = vrot.slane %v9044_v2, 1  ;;  %v455_v48 = vld [vmem:[#allocation2 + $0x38] sm:$0xff]  ;;  %vm1921_vm4 = vcmask 1046528   ;;  %v11893_v1 = vrot.slane %v9100_v15, 4 }
  0x7c   : > { %v9059_v8 = vld [vmem:[#allocation2 + $0x48] sm:$0xff]  ;;  %7362 = vmatmul.mubr.msk.f32.vlgmr.msra.gmra.mrb[0].mxu0 %vm857_vm2, %v9050_v5  ;;  %6968 = vmatpush3.msk.msra.mxu1 %vm986_vm1, %v856_v4  ;;  %v9114_v17 = vld [vmem:[#allocation2 + $0xb0] sm:$0xff]  ;;  %v703_v22 = vrot.slane %v9050_v5, 7  ;;  %v9139_v25 = vsel %vm694_vm3, %v11896_v19, %v698_v20  ;;  %v1928_v46 = vrot.slane %v9050_v5, 1  ;;  %v1930_v50 = vrot.slane %v455_v48, 1  ;;  %v467_v48 = vld [vmem:[#allocation2 + $0x98] sm:$0xff] }
  0x7d   : > { %7364 = vmatprep.mubr.msk.f32.mxu0 %vm857_vm2, %v9059_v8  ;;  %6970 = vmatmul.mubr.msk.f32.vlgmr.msra.gmra.mrb[0].mxu1 %vm857_vm2, %v9057_v7  ;;  %v9070_v10 = vld [vmem:[#allocation2 + $0x50] sm:$0xff]  ;;  %v9118_v18 = vld [vmem:[#allocation2 + $0xc8] sm:$0xff]  ;;  %v1932_v52 = vrot.slane %v9059_v8, 1  ;;  %v459_v54 = vld [vmem:[#allocation2 + $0x58] sm:$0xff]  ;;  %p6378_p5 = scmp.ge.s32.totalorder %s8471_s13, 2 }
  0x7e   : > { %7065 = vmatprep.subr.msk.mxu1 %vm986_vm1, %v592_v3  ;;  %v9074_v11 = vld [vmem:[#allocation2 + $0x68] sm:$0xff]  ;;  %7458 = vmatpush3.msk.msra.mxu0 %vm986_vm1, %v3610_v9  ;;  %v9130_v23 = vld [vmem:[#allocation2 + $0xd0] sm:$0xff]  ;;  %v9146_v26 = vsel %vm694_vm3, %v11895_v21, %v703_v22  ;;  %v9272_v51 = vsel %vm1921_vm4, %v1927_v45, %v1928_v46  ;;  %v1933_v53 = vrot.slane %v9070_v10, 1  ;;  %v9289_v59 = vsel %vm1921_vm4, %v1928_v46, %v1930_v50  ;;  %v475_v19 = vld [vmem:[#allocation2 + $0xd8] sm:$0xff] }
  0x7f   : > { %7066 = vmatpush3.msk.msra.mxu1 %vm986_vm1, %v592_v3  ;;  %6972 = vmatprep.mubr.msk.f32.mxu1 %vm857_vm2, %v9044_v2  ;;  %v9085_v12 = vld [vmem:[#allocation2 + $0x70] sm:$0xff]  ;;  %v9134_v24 = vld [vmem:[#allocation2 + $0xe8] sm:$0xff]  ;;  %12113 = vst [vmem:[#allocation5_spill] sm:$0xff] %v9146_v26  ;;  %12126 = vst [vmem:[#allocation18_spill] sm:$0xff] %v9272_v51  ;;  %v1935_v60 = vrot.slane %v459_v54, 1  ;;  %v1937_v62 = vrot.slane %v9074_v11, 1 }
  0x80   : > { %7365 = vmatmul.mubr.msk.f32.gmra.mrb[2].mxu0 %vm857_vm2, %v9070_v10  ;;  %7555 = vmatprep.subr.msk.mxu0 %vm986_vm1, %v9100_v15  ;;  %v9152_v27 = vld [vmem:[#allocation2 + $0xf0] sm:$0xff]  ;;  %v9156_v28 = vld [vmem:[#allocation2 + $0x108] sm:$0xff]  ;;  %12129 = vst [vmem:[#allocation21_spill] sm:$0xff] %v9289_v59  ;;  %v9294_v61 = vsel %vm1921_vm4, %v1932_v52, %v1933_v53  ;;  %v1938_v63 = vrot.slane %v9085_v12, 1  ;;  %v463_v0 = vld [vmem:[#allocation2 + $0x78] sm:$0xff]  ;;  %v1942_v45 = vrot.slane %v9089_v13, 1 }
  0x81   : > { %6973 = vmatmul.mubr.msk.f32.gmra.mrb[2].mxu1 %vm857_vm2, %v9050_v5  ;;  %7367 = vmatprep.mubr.msk.f32.mxu0 %vm857_vm2, %v9074_v11  ;;  %v9164_v29 = vld [vmem:[#allocation2 + $0x110] sm:$0xff]  ;;  %v9168_v30 = vld [vmem:[#allocation2 + $0x128] sm:$0xff]  ;;  %12130 = vst [vmem:[#allocation22_spill] sm:$0xff] %v9294_v61  ;;  %v9313_v5 = vsel %vm1921_vm4, %v1933_v53, %v1935_v60  ;;  %v1940_v9 = vrot.slane %v463_v0, 1  ;;  %v1943_v46 = vrot.slane %v9097_v14, 1  ;;  %v1945_v53 = vrot.slane %v467_v48, 1 }
  0x82   : > { %6975 = vmatprep.mubr.msk.f32.mxu1 %vm857_vm2, %v9059_v8  ;;  %v9171_v31 = vld [vmem:[%s8487_s21 + $0x8] sm:$0xff]  ;;  %v9181_v32 = vld [vmem:[#allocation2 + $0x130] sm:$0xff]  ;;  %12133 = vst [vmem:[#allocation25_spill] sm:$0xff] %v9313_v5  ;;  %v9322_v22 = vsel %vm1921_vm4, %v1937_v62, %v1938_v63  ;;  %v1947_v60 = vrot.slane %v9104_v16, 1  ;;  %v1948_v62 = vrot.slane %v9114_v17, 1  ;;  %v471_v0 = vld [vmem:[#allocation2 + $0xb8] sm:$0xff] }
  0x83   : > { %12114 = vst [vmem:[#allocation6_spill] sm:$0xff] %v9171_v31  ;;  %7163 = vmatprep.subr.msk.mxu1 %vm986_vm1, %v9171_v31  ;;  %v9185_v33 = vld [vmem:[#allocation2 + $0x148] sm:$0xff]  ;;  %v9193_v34 = vld [vmem:[#allocation2 + $0x150] sm:$0xff]  ;;  %12135 = vst [vmem:[#allocation27_spill] sm:$0xff] %v9322_v22  ;;  %v9338_v52 = vsel %vm1921_vm4, %v1938_v63, %v1940_v9  ;;  %v9358_v63 = vsel %vm1921_vm4, %v1943_v46, %v1945_v53  ;;  %v1950_v9 = vrot.slane %v471_v0, 1  ;;  %v1953_v21 = vrot.slane %v9130_v23, 1 }
  0x84   : > { %7368 = vmatmul.mubr.msk.f32.gmra.mrb[4].mxu0 %vm857_vm2, %v9085_v12  ;;  %12115 = vst [vmem:[#allocation7_spill] sm:$0xff] %v9193_v34  ;;  %v9197_v35 = vld [vmem:[#allocation2 + $0x168] sm:$0xff]  ;;  %v9205_v36 = vld [vmem:[#allocation2 + $0x170] sm:$0xff]  ;;  %12136 = vst [vmem:[#allocation28_spill] sm:$0xff] %v9338_v52  ;;  %v9365_v48 = vsel %vm1921_vm4, %v1947_v60, %v1948_v62  ;;  %v1955_v53 = vrot.slane %v475_v19, 1 }
  0x85   : > { %6976 = vmatmul.mubr.msk.f32.gmra.mrb[4].mxu1 %vm857_vm2, %v9070_v10  ;;  %7370 = vmatprep.mubr.msk.f32.mxu0 %vm857_vm2, %v9089_v13  ;;  %12116 = vst [vmem:[#allocation8_spill] sm:$0xff] %v9197_v35  ;;  %12117 = vst [vmem:[#allocation9_spill] sm:$0xff] %v9205_v36  ;;  %v9209_v37 = vld [vmem:[#allocation2 + $0x188] sm:$0xff]  ;;  %v9217_v38 = vld [vmem:[#allocation2 + $0x190] sm:$0xff] }
  0x86   : > { %6978 = vmatprep.mubr.msk.f32.mxu1 %vm857_vm2, %v9074_v11  ;;  %12118 = vst [vmem:[#allocation10_spill] sm:$0xff] %v9209_v37  ;;  %12119 = vst [vmem:[#allocation11_spill] sm:$0xff] %v9217_v38  ;;  %v9221_v39 = vld [vmem:[#allocation2 + $0x1a8] sm:$0xff]  ;;  %v9229_v40 = vld [vmem:[#allocation2 + $0x1b0] sm:$0xff]  ;;  %v9398_v19 = vsel %vm1921_vm4, %v1953_v21, %v1955_v53 }
  0x87   : > { %12120 = vst [vmem:[#allocation12_spill] sm:$0xff] %v9221_v39  ;;  %12121 = vst [vmem:[#allocation13_spill] sm:$0xff] %v9229_v40  ;;  %v9233_v41 = vld [vmem:[#allocation2 + $0x1c8] sm:$0xff]  ;;  %v9241_v42 = vld [vmem:[#allocation2 + $0x1d0] sm:$0xff] }
  0x88   : > { %7371 = vmatmul.mubr.msk.f32.gmra.mrb[6].mxu0 %vm857_vm2, %v9097_v14  ;;  %12122 = vst [vmem:[#allocation14_spill] sm:$0xff] %v9233_v41  ;;  %12123 = vst [vmem:[#allocation15_spill] sm:$0xff] %v9241_v42  ;;  %v9245_v43 = vld [vmem:[#allocation2 + $0x1e8] sm:$0xff]  ;;  %v9253_v44 = vld [vmem:[#allocation2 + $0x1f0] sm:$0xff] }
  0x89   : > { %6979 = vmatmul.mubr.msk.f32.gmra.mrb[6].mxu1 %vm857_vm2, %v9085_v12  ;;  %7373 = vmatprep.mubr.msk.f32.mxu0 %vm857_vm2, %v9104_v16  ;;  %12124 = vst [vmem:[#allocation16_spill] sm:$0xff] %v9245_v43  ;;  %12125 = vst [vmem:[#allocation17_spill] sm:$0xff] %v9253_v44  ;;  %v9259_v47 = vld [vmem:[#allocation2 + $0x208] sm:$0xff]  ;;  %v9267_v49 = vld [vmem:[#allocation2 + $0x210] sm:$0xff] }
  0x8a   : > { %6981 = vmatprep.mubr.msk.f32.mxu1 %vm857_vm2, %v9089_v13  ;;  %v9276_v55 = vld [vmem:[#allocation2 + $0x248] sm:$0xff]  ;;  %v9278_v56 = vld [vmem:[#allocation2 + $0x250] sm:$0xff]  ;;  %12139 = vst [vmem:[#allocation31_spill] sm:$0xff] %v9358_v63  ;;  %12140 = vst [vmem:[#allocation32_spill] sm:$0xff] %v9365_v48 }
  0x8b   : > { %12127 = vst [vmem:[#allocation19_spill] sm:$0xff] %v9276_v55  ;;  %12128 = vst [vmem:[#allocation20_spill] sm:$0xff] %v9278_v56  ;;  %v11894_v57 = vrot.slane %v9276_v55, 7  ;;  %v778_v58 = vrot.slane %v9278_v56, 7  ;;  %v9299_v3 = vld [vmem:[#allocation2 + $0x268] sm:$0xff]  ;;  %v9319_v20 = vld [vmem:[#allocation2 + $0x270] sm:$0xff] }
  0x8c   : > { %7374 = vmatmul.mubr.msk.f32.gmra.mrb[8].mxu0 %vm857_vm2, %v9114_v17  ;;  %12131 = vst [vmem:[#allocation23_spill] sm:$0xff] %v9299_v3  ;;  %12134 = vst [vmem:[#allocation26_spill] sm:$0xff] %v9319_v20  ;;  %v9326_v50 = vld [vmem:[#allocation2 + $0x288] sm:$0xff]  ;;  %v9342_v54 = vld [vmem:[#allocation2 + $0x290] sm:$0xff] }
  0x8d   : > { %6982 = vmatmul.mubr.msk.f32.gmra.mrb[8].mxu1 %vm857_vm2, %v9097_v14  ;;  %7376 = vmatprep.mubr.msk.f32.mxu0 %vm857_vm2, %v9118_v18  ;;  %v9306_v4 = vsel %vm694_vm3, %v11894_v57, %v778_v58  ;;  %12137 = vst [vmem:[#allocation29_spill] sm:$0xff] %v9342_v54  ;;  %v9345_v58 = vsel %vm1921_vm4, %v1942_v45, %v1943_v46  ;;  %v9362_v45 = vld [vmem:[#allocation2 + $0x2b0] sm:$0xff]  ;;  %v1952_v57 = vrot.slane %v9118_v18, 1  ;;  %12143 = vst [vmem:[#allocation35_spill] sm:$0xff] %v9398_v19 }
  0x8e   : > { %6984 = vmatprep.mubr.msk.f32.mxu1 %vm857_vm2, %v9104_v16  ;;  %12132 = vst [vmem:[#allocation24_spill] sm:$0xff] %v9306_v4  ;;  %12138 = vst [vmem:[#allocation30_spill] sm:$0xff] %v9345_v58  ;;  %v9378_v46 = vsel %vm1921_vm4, %v1948_v62, %v1950_v9  ;;  %v9382_v60 = vld [vmem:[#allocation2 + $0x2d0] sm:$0xff]  ;;  %v491_v4 = vld [vmem:[#allocation2 + $0x158] sm:$0xff] }
  0x8f   : > { %12141 = vst [vmem:[#allocation33_spill] sm:$0xff] %v9378_v46  ;;  %v9385_v0 = vsel %vm1921_vm4, %v1952_v57, %v1953_v21  ;;  %v9402_v62 = vld [vmem:[#allocation2 + $0x2f0] sm:$0xff] }
  0x90   : > { %7377 = vmatmul.mubr.msk.f32.gmra.mrb[10].mxu0 %vm857_vm2, %v9130_v23  ;;  %12142 = vst [vmem:[#allocation34_spill] sm:$0xff] %v9385_v0 }
  0x91   : > { %6985 = vmatmul.mubr.msk.f32.gmra.mrb[10].mxu1 %vm857_vm2, %v9114_v17  ;;  %7379 = vmatprep.mubr.msk.f32.mxu0 %vm857_vm2, %v9134_v24 }
  0x92   : > { %6987 = vmatprep.mubr.msk.f32.mxu1 %vm857_vm2, %v9118_v18 }
  0x94   : > { %7380 = vmatmul.mubr.msk.f32.gmra.mrb[12].mxu0 %vm857_vm2, %v9152_v27 }
  0x95   : > { %6988 = vmatmul.mubr.msk.f32.gmra.mrb[12].mxu1 %vm857_vm2, %v9130_v23  ;;  %7382 = vmatprep.mubr.msk.f32.mxu0 %vm857_vm2, %v9156_v28 }
  0x96   : > { %6990 = vmatprep.mubr.msk.f32.mxu1 %vm857_vm2, %v9134_v24 }
  0x98   : > { %7383 = vmatmul.mubr.msk.f32.gmra.mrb[14].mxu0 %vm857_vm2, %v9164_v29 }
  0x99   : > { %6991 = vmatmul.mubr.msk.f32.gmra.mrb[14].mxu1 %vm857_vm2, %v9152_v27  ;;  %7385 = vmatprep.mubr.msk.f32.mxu0 %vm857_vm2, %v9168_v30 }
  0x9a   : > { %6993 = vmatprep.mubr.msk.f32.mxu1 %vm857_vm2, %v9156_v28 }
  0x9c   : > { %7386 = vmatmul.mubr.msk.f32.gmra.mrb[16].mxu0 %vm857_vm2, %v9181_v32 }
  0x9d   : > { %6994 = vmatmul.mubr.msk.f32.gmra.mrb[16].mxu1 %vm857_vm2, %v9164_v29  ;;  %7388 = vmatprep.mubr.msk.f32.mxu0 %vm857_vm2, %v9185_v33 }
  0x9e   : > { %6996 = vmatprep.mubr.msk.f32.mxu1 %vm857_vm2, %v9168_v30 }
  0xa0   : > { %7389 = vmatmul.mubr.msk.f32.gmra.mrb[18].mxu0 %vm857_vm2, %v9193_v34 }
  0xa1   : > { %6997 = vmatmul.mubr.msk.f32.gmra.mrb[18].mxu1 %vm857_vm2, %v9181_v32  ;;  %7391 = vmatprep.mubr.msk.f32.mxu0 %vm857_vm2, %v9197_v35 }
  0xa2   : > { %6999 = vmatprep.mubr.msk.f32.mxu1 %vm857_vm2, %v9185_v33 }
  0xa4   : > { %7392 = vmatmul.mubr.msk.f32.gmra.mrb[20].mxu0 %vm857_vm2, %v9205_v36 }
  0xa5   : > { %7000 = vmatmul.mubr.msk.f32.gmra.mrb[20].mxu1 %vm857_vm2, %v9193_v34  ;;  %7394 = vmatprep.mubr.msk.f32.mxu0 %vm857_vm2, %v9209_v37 }
  0xa6   : > { %7002 = vmatprep.mubr.msk.f32.mxu1 %vm857_vm2, %v9197_v35 }
  0xa8   : > { %7395 = vmatmul.mubr.msk.f32.gmra.mrb[22].mxu0 %vm857_vm2, %v9217_v38 }
  0xa9   : > { %7003 = vmatmul.mubr.msk.f32.gmra.mrb[22].mxu1 %vm857_vm2, %v9205_v36  ;;  %7397 = vmatprep.mubr.msk.f32.mxu0 %vm857_vm2, %v9221_v39 }
  0xaa   : > { %7005 = vmatprep.mubr.msk.f32.mxu1 %vm857_vm2, %v9209_v37 }
  0xac   : > { %7398 = vmatmul.mubr.msk.f32.gmra.mrb[24].mxu0 %vm857_vm2, %v9229_v40 }
  0xad   : > { %7006 = vmatmul.mubr.msk.f32.gmra.mrb[24].mxu1 %vm857_vm2, %v9217_v38  ;;  %7400 = vmatprep.mubr.msk.f32.mxu0 %vm857_vm2, %v9233_v41 }
  0xae   : > { %7008 = vmatprep.mubr.msk.f32.mxu1 %vm857_vm2, %v9221_v39 }
  0xb0   : > { %7401 = vmatmul.mubr.msk.f32.gmra.mrb[26].mxu0 %vm857_vm2, %v9241_v42 }
  0xb1   : > { %7009 = vmatmul.mubr.msk.f32.gmra.mrb[26].mxu1 %vm857_vm2, %v9229_v40  ;;  %7403 = vmatprep.mubr.msk.f32.mxu0 %vm857_vm2, %v9245_v43 }
  0xb2   : > { %7011 = vmatprep.mubr.msk.f32.mxu1 %vm857_vm2, %v9233_v41 }
  0xb4   : > { %7404 = vmatmul.mubr.msk.f32.gmra.mrb[28].mxu0 %vm857_vm2, %v9253_v44 }
  0xb5   : > { %7012 = vmatmul.mubr.msk.f32.gmra.mrb[28].mxu1 %vm857_vm2, %v9241_v42  ;;  %7406 = vmatprep.mubr.msk.f32.mxu0 %vm857_vm2, %v9259_v47 }
  0xb6   : > { %7014 = vmatprep.mubr.msk.f32.mxu1 %vm857_vm2, %v9245_v43 }
  0xb8   : > { %7407 = vmatmul.mubr.msk.f32.gmra.mrb[30].mxu0 %vm857_vm2, %v9267_v49 }
  0xb9   : > { %7015 = vmatmul.mubr.msk.f32.gmra.mrb[30].mxu1 %vm857_vm2, %v9253_v44  ;;  %7459 = vmatprep.mubr.msk.f32.mxu0 %vm857_vm2, %v9272_v51  ;;  %v487_v51 = vld [vmem:[#allocation2 + $0x138] sm:$0xff] }
  0xba   : > { %7017 = vmatprep.mubr.msk.f32.mxu1 %vm857_vm2, %v9276_v55  ;;  %v495_v55 = vld [vmem:[#allocation2 + $0x178] sm:$0xff] }
  0xbc   : > { %7460 = vmatmul.mubr.msk.f32.vlgmr.msra.gmra.mrb[0].mxu0 %vm857_vm2, %v9289_v59  ;;  %v9409_v59 = vld [vmem:[#allocation2 + $0x308] sm:$0xff] }
  0xbd   : > { %7018 = vmatmul.mubr.msk.f32.gmra.mrb[32].mxu1 %vm857_vm2, %v9278_v56  ;;  %7462 = vmatprep.mubr.msk.f32.mxu0 %vm857_vm2, %v9294_v61  ;;  %v483_v61 = vld [vmem:[#allocation2 + $0x118] sm:$0xff]  ;;  %v9449_v56 = vld [vmem:[#allocation2 + $0x348] sm:$0xff] }
  0xbe   : > { %7556 = vmatpush3.msk.msra.mxu0 %vm986_vm1, %v9100_v15  ;;  %7020 = vmatprep.mubr.msk.f32.mxu1 %vm857_vm2, %v9299_v3  ;;  %v9429_v15 = vld [vmem:[#allocation2 + $0x328] sm:$0xff] }
  0xbf   : > { %7653 = vmatprep.subr.msk.mxu0 %vm986_vm1, %v11893_v1  ;;  %v9349_v1 = vld [vmem:[#allocation2 + $0x2a8] sm:$0xff] }
  0xc0   : > { %7463 = vmatmul.mubr.msk.f32.gmra.mrb[2].mxu0 %vm857_vm2, %v9313_v5  ;;  %v9389_v5 = vld [vmem:[#allocation2 + $0x2e8] sm:$0xff] }
  0xc1   : > { %7021 = vmatmul.mubr.msk.f32.gmra.mrb[34].mxu1 %vm857_vm2, %v9319_v20  ;;  %7465 = vmatprep.mubr.msk.f32.mxu0 %vm857_vm2, %v9322_v22  ;;  %v479_v22 = vld [vmem:[#allocation2 + $0xf8] sm:$0xff] }
  0xc2   : > { %7023 = vmatprep.mubr.msk.f32.mxu1 %vm857_vm2, %v9326_v50  ;;  %v1960_v57 = vrot.slane %v479_v22, 1  ;;  %v1965_v22 = vrot.slane %v483_v61, 1 }
  0xc4   : > { %7466 = vmatmul.mubr.msk.f32.gmra.mrb[4].mxu0 %vm857_vm2, %v9338_v52  ;;  %v9369_v52 = vld [vmem:[#allocation2 + $0x2c8] sm:$0xff] }
  0xc5   : > { %7024 = vmatmul.mubr.msk.f32.gmra.mrb[36].mxu1 %vm857_vm2, %v9342_v54  ;;  %7468 = vmatprep.mubr.msk.f32.mxu0 %vm857_vm2, %v9345_v58  ;;  %v1958_v58 = vrot.slane %v9152_v27, 1 }
  0xc6   : > { %7026 = vmatprep.mubr.msk.f32.mxu1 %vm857_vm2, %v9349_v1 }
  0xc7   : > { %v9418_v21 = vsel %vm1921_vm4, %v1958_v58, %v1960_v57 }
  0xc8   : > { %7469 = vmatmul.mubr.msk.f32.gmra.mrb[6].mxu0 %vm857_vm2, %v9358_v63  ;;  %v1957_v63 = vrot.slane %v9134_v24, 1  ;;  %12145 = vst [vmem:[#allocation37_spill] sm:$0xff] %v9418_v21 }
  0xc9   : > { %7027 = vmatmul.mubr.msk.f32.gmra.mrb[38].mxu1 %vm857_vm2, %v9362_v45  ;;  %7471 = vmatprep.mubr.msk.f32.mxu0 %vm857_vm2, %v9365_v48  ;;  %v1963_v48 = vrot.slane %v9164_v29, 1 }
  0xca   : > { %7029 = vmatprep.mubr.msk.f32.mxu1 %vm857_vm2, %v9369_v52  ;;  %v9405_v9 = vsel %vm1921_vm4, %v1957_v63, %v1958_v58  ;;  %v9422_v63 = vld [vmem:[#allocation2 + $0x310] sm:$0xff]  ;;  %v1970_v58 = vrot.slane %v487_v51, 1 }
  0xcb   : > { %12144 = vst [vmem:[#allocation36_spill] sm:$0xff] %v9405_v9  ;;  %v9438_v61 = vsel %vm1921_vm4, %v1963_v48, %v1965_v22 }
  0xcc   : > { %7472 = vmatmul.mubr.msk.f32.gmra.mrb[8].mxu0 %vm857_vm2, %v9378_v46  ;;  %v1962_v46 = vrot.slane %v9156_v28, 1  ;;  %12147 = vst [vmem:[#allocation39_spill] sm:$0xff] %v9438_v61 }
  0xcd   : > { %7030 = vmatmul.mubr.msk.f32.gmra.mrb[40].mxu1 %vm857_vm2, %v9382_v60  ;;  %7474 = vmatprep.mubr.msk.f32.mxu0 %vm857_vm2, %v9385_v0  ;;  %v1968_v0 = vrot.slane %v9181_v32, 1 }
  0xce   : > { %7032 = vmatprep.mubr.msk.f32.mxu1 %vm857_vm2, %v9389_v5  ;;  %v9425_v53 = vsel %vm1921_vm4, %v1962_v46, %v1963_v48  ;;  %v9442_v46 = vld [vmem:[#allocation2 + $0x330] sm:$0xff]  ;;  %v1975_v48 = vrot.slane %v491_v4, 1 }
  0xcf   : > { %12146 = vst [vmem:[#allocation38_spill] sm:$0xff] %v9425_v53  ;;  %v9458_v51 = vsel %vm1921_vm4, %v1968_v0, %v1970_v58 }
  0xd0   : > { %7475 = vmatmul.mubr.msk.f32.gmra.mrb[10].mxu0 %vm857_vm2, %v9398_v19  ;;  %v1967_v19 = vrot.slane %v9168_v30, 1  ;;  %12149 = vst [vmem:[#allocation41_spill] sm:$0xff] %v9458_v51 }
  0xd1   : > { %7033 = vmatmul.mubr.msk.f32.gmra.mrb[42].mxu1 %vm857_vm2, %v9402_v62  ;;  %7477 = vmatprep.mubr.msk.f32.mxu0 %vm857_vm2, %v9405_v9  ;;  %v1973_v9 = vrot.slane %v9193_v34, 1  ;;  %v9469_v34 = vld [vmem:[#allocation2 + $0x368] sm:$0xff] }
  0xd2   : > { %7035 = vmatprep.mubr.msk.f32.mxu1 %vm857_vm2, %v9409_v59  ;;  %v9445_v57 = vsel %vm1921_vm4, %v1967_v19, %v1968_v0  ;;  %v9462_v19 = vld [vmem:[#allocation2 + $0x350] sm:$0xff]  ;;  %v1980_v0 = vrot.slane %v495_v55, 1 }
  0xd3   : > { %12148 = vst [vmem:[#allocation40_spill] sm:$0xff] %v9445_v57  ;;  %v9478_v4 = vsel %vm1921_vm4, %v1973_v9, %v1975_v48 }
  0xd4   : > { %7478 = vmatmul.mubr.msk.f32.gmra.mrb[12].mxu0 %vm857_vm2, %v9418_v21  ;;  %v1972_v21 = vrot.slane %v9185_v33, 1  ;;  %12151 = vst [vmem:[#allocation43_spill] sm:$0xff] %v9478_v4 }
  0xd5   : > { %7036 = vmatmul.mubr.msk.f32.gmra.mrb[44].mxu1 %vm857_vm2, %v9422_v63  ;;  %7480 = vmatprep.mubr.msk.f32.mxu0 %vm857_vm2, %v9425_v53  ;;  %v1978_v53 = vrot.slane %v9205_v36, 1  ;;  %v499_v36 = vld [vmem:[#allocation2 + $0x198] sm:$0xff] }
  0xd6   : > { %7038 = vmatprep.mubr.msk.f32.mxu1 %vm857_vm2, %v9429_v15  ;;  %v9465_v22 = vsel %vm1921_vm4, %v1972_v21, %v1973_v9  ;;  %v9482_v21 = vld [vmem:[#allocation2 + $0x370] sm:$0xff]  ;;  %v1985_v9 = vrot.slane %v499_v36, 1 }
  0xd7   : > { %12150 = vst [vmem:[#allocation42_spill] sm:$0xff] %v9465_v22  ;;  %v9498_v55 = vsel %vm1921_vm4, %v1978_v53, %v1980_v0 }
  0xd8   : > { %7481 = vmatmul.mubr.msk.f32.gmra.mrb[14].mxu0 %vm857_vm2, %v9438_v61  ;;  %v1977_v61 = vrot.slane %v9197_v35, 1  ;;  %v9489_v35 = vld [vmem:[#allocation2 + $0x388] sm:$0xff]  ;;  %12153 = vst [vmem:[#allocation45_spill] sm:$0xff] %v9498_v55 }
  0xd9   : > { %7039 = vmatmul.mubr.msk.f32.gmra.mrb[46].mxu1 %vm857_vm2, %v9442_v46  ;;  %7483 = vmatprep.mubr.msk.f32.mxu0 %vm857_vm2, %v9445_v57  ;;  %v1983_v57 = vrot.slane %v9217_v38, 1  ;;  %v503_v38 = vld [vmem:[#allocation2 + $0x1b8] sm:$0xff] }
  0xda   : > { %7041 = vmatprep.mubr.msk.f32.mxu1 %vm857_vm2, %v9449_v56  ;;  %v9485_v58 = vsel %vm1921_vm4, %v1977_v61, %v1978_v53  ;;  %v9502_v61 = vld [vmem:[#allocation2 + $0x390] sm:$0xff]  ;;  %v1990_v53 = vrot.slane %v503_v38, 1 }
  0xdb   : > { %12152 = vst [vmem:[#allocation44_spill] sm:$0xff] %v9485_v58  ;;  %v9518_v36 = vsel %vm1921_vm4, %v1983_v57, %v1985_v9 }
  0xdc   : > { %7484 = vmatmul.mubr.msk.f32.gmra.mrb[16].mxu0 %vm857_vm2, %v9458_v51  ;;  %v1982_v51 = vrot.slane %v9209_v37, 1  ;;  %v9509_v37 = vld [vmem:[#allocation2 + $0x3a8] sm:$0xff]  ;;  %12155 = vst [vmem:[#allocation47_spill] sm:$0xff] %v9518_v36 }
  0xdd   : > { %7042 = vmatmul.mubr.msk.f32.gmra.mrb[48].mxu1 %vm857_vm2, %v9462_v19  ;;  %7486 = vmatprep.mubr.msk.f32.mxu0 %vm857_vm2, %v9465_v22  ;;  %v1988_v22 = vrot.slane %v9229_v40, 1  ;;  %v507_v40 = vld [vmem:[#allocation2 + $0x1d8] sm:$0xff] }
  0xde   : > { %7044 = vmatprep.mubr.msk.f32.mxu1 %vm857_vm2, %v9469_v34  ;;  %v9505_v48 = vsel %vm1921_vm4, %v1982_v51, %v1983_v57  ;;  %v9522_v51 = vld [vmem:[#allocation2 + $0x3b0] sm:$0xff]  ;;  %v1995_v57 = vrot.slane %v507_v40, 1 }
  0xdf   : > { %12154 = vst [vmem:[#allocation46_spill] sm:$0xff] %v9505_v48  ;;  %v9538_v38 = vsel %vm1921_vm4, %v1988_v22, %v1990_v53  ;;  %v3601_v53 = vrot.slane %v9267_v49, 1  ;;  %v2007_v49 = vrot.slane %v9299_v3, 1  ;;  %v531_v3 = vld [vmem:[#allocation2 + $0x298] sm:$0xff] }
  0xe0   : > { %7487 = vmatmul.mubr.msk.f32.gmra.mrb[18].mxu0 %vm857_vm2, %v9478_v4  ;;  %v1987_v4 = vrot.slane %v9221_v39, 1  ;;  %v9529_v39 = vld [vmem:[#allocation2 + $0x3c8] sm:$0xff]  ;;  %12157 = vst [vmem:[#allocation49_spill] sm:$0xff] %v9538_v38 }
  0xe1   : > { %7045 = vmatmul.mubr.msk.f32.gmra.mrb[50].mxu1 %vm857_vm2, %v9482_v21  ;;  %7489 = vmatprep.mubr.msk.f32.mxu0 %vm857_vm2, %v9485_v58  ;;  %v1993_v58 = vrot.slane %v9241_v42, 1  ;;  %v511_v42 = vld [vmem:[#allocation2 + $0x1f8] sm:$0xff] }
  0xe2   : > { %7047 = vmatprep.mubr.msk.f32.mxu1 %vm857_vm2, %v9489_v35  ;;  %v9525_v0 = vsel %vm1921_vm4, %v1987_v4, %v1988_v22  ;;  %v9542_v4 = vld [vmem:[#allocation2 + $0x3d0] sm:$0xff]  ;;  %v2000_v22 = vrot.slane %v511_v42, 1 }
  0xe3   : > { %12156 = vst [vmem:[#allocation48_spill] sm:$0xff] %v9525_v0  ;;  %12158 = vst [vmem:[#allocation50_spill] sm:$0xff] %v9542_v4  ;;  %v9558_v40 = vsel %vm1921_vm4, %v1993_v58, %v1995_v57  ;;  %v9584_v57 = vld [vmem:[#allocation2 + $0x410] sm:$0xff] }
  0xe4   : > { %7490 = vmatmul.mubr.msk.f32.gmra.mrb[20].mxu0 %vm857_vm2, %v9498_v55  ;;  %v1992_v55 = vrot.slane %v9233_v41, 1  ;;  %v9549_v41 = vld [vmem:[#allocation2 + $0x3e8] sm:$0xff]  ;;  %12161 = vst [vmem:[#allocation53_spill] sm:$0xff] %v9558_v40  ;;  %12166 = vst [vmem:[#allocation58_spill] sm:$0xff] %v9584_v57 }
  0xe5   : > { %7048 = vmatmul.mubr.msk.f32.gmra.mrb[52].mxu1 %vm857_vm2, %v9502_v61  ;;  %7492 = vmatprep.mubr.msk.f32.mxu0 %vm857_vm2, %v9505_v48  ;;  %v1998_v48 = vrot.slane %v9253_v44, 1  ;;  %12160 = vst [vmem:[#allocation52_spill] sm:$0xff] %v9549_v41  ;;  %v515_v44 = vld [vmem:[#allocation2 + $0x218] sm:$0xff] }
  0xe6   : > { %7050 = vmatprep.mubr.msk.f32.mxu1 %vm857_vm2, %v9509_v37  ;;  %v9545_v9 = vsel %vm1921_vm4, %v1992_v55, %v1993_v58  ;;  %v3600_v55 = vrot.slane %v9259_v47, 1  ;;  %v448_v58 = vld [vmem:[#allocation2] sm:$0xff]  ;;  %v3603_v47 = vrot.slane %v515_v44, 1 }
  0xe7   : > { %12159 = vst [vmem:[#allocation51_spill] sm:$0xff] %v9545_v9  ;;  %v9578_v42 = vsel %vm1921_vm4, %v1998_v48, %v2000_v22  ;;  %v452_v44 = vld [vmem:[#allocation2 + $0x20] sm:$0xff] }
  0xe8   : > { %7493 = vmatmul.mubr.msk.f32.gmra.mrb[22].mxu0 %vm857_vm2, %v9518_v36  ;;  %v1997_v36 = vrot.slane %v9245_v43, 1  ;;  %v9569_v43 = vld [vmem:[#allocation2 + $0x408] sm:$0xff]  ;;  %12165 = vst [vmem:[#allocation57_spill] sm:$0xff] %v9578_v42 }
  0xe9   : > { %7051 = vmatmul.mubr.msk.f32.gmra.mrb[54].mxu1 %vm857_vm2, %v9522_v51  ;;  %7495 = vmatprep.mubr.msk.f32.mxu0 %vm857_vm2, %v9525_v0  ;;  %v9564_v0 = vld [vmem:[#allocation2 + $0x3f0] sm:$0xff]  ;;  %12164 = vst [vmem:[#allocation56_spill] sm:$0xff] %v9569_v43 }
  0xea   : > { %7053 = vmatprep.mubr.msk.f32.mxu1 %vm857_vm2, %v9529_v39  ;;  %12162 = vst [vmem:[#allocation54_spill] sm:$0xff] %v9564_v0 }
  0xec   : > { %7496 = vmatmul.mubr.msk.f32.gmra.mrb[24].mxu0 %vm857_vm2, %v9538_v38  ;;  %v9567_v38 = vsel %vm1921_vm4, %v1997_v36, %v1998_v48  ;;  %v2008_v36 = vrot.slane %v9319_v20, 1  ;;  %v9598_v48 = vsel %vm1921_vm4, %v3601_v53, %v3603_v47  ;;  %v2013_v20 = vrot.slane %v9342_v54, 1 }
  0xed   : > { %7054 = vmatmul.mubr.msk.f32.gmra.mrb[56].mxu1 %vm857_vm2, %v9542_v4  ;;  %7498 = vmatprep.mubr.msk.f32.mxu0 %vm857_vm2, %v9545_v9  ;;  %12163 = vst [vmem:[#allocation55_spill] sm:$0xff] %v9567_v38  ;;  %v527_v9 = vld [vmem:[#allocation2 + $0x278] sm:$0xff]  ;;  %12169 = vst [vmem:[#allocation61_spill] sm:$0xff] %v9598_v48  ;;  %v2015_v54 = vrot.slane %v531_v3, 1  ;;  %v11983_v47 = vrot.slane %v9171_v31, 4  ;;  %v706_v3 = vrot.slane %v9059_v8, 7 }
  0xee   : > { %7056 = vmatprep.mubr.msk.f32.mxu1 %vm857_vm2, %v9549_v41  ;;  %v2010_v22 = vrot.slane %v527_v9, 1  ;;  %v1922_v9 = vrot.slane %v9052_v6, 1 }
  0xf0   : > { %7499 = vmatmul.mubr.msk.f32.gmra.mrb[26].mxu0 %vm857_vm2, %v9558_v40  ;;  %v9587_v40 = vsel %vm1921_vm4, %v3600_v55, %v3601_v53  ;;  %v9602_v55 = vld [vmem:[#allocation2 + $0x430] sm:$0xff]  ;;  %v700_v53 = vrot.slane %v452_v44, 7  ;;  %v535_v44 = vld [vmem:[#allocation2 + $0x2b8] sm:$0xff] }
  0xf1   : > { %7057 = vmatmul.mubr.msk.f32.gmra.mrb[58].mxu1 %vm857_vm2, %v9564_v0  ;;  %7501 = vmatprep.mubr.msk.f32.mxu0 %vm857_vm2, %v9567_v38  ;;  %12167 = vst [vmem:[#allocation59_spill] sm:$0xff] %v9587_v40  ;;  %v9589_v0 = vld [vmem:[#allocation2 + $0x428] sm:$0xff]  ;;  %v695_v38 = vrot.slane %v448_v58, 7  ;;  %12170 = vst [vmem:[#allocation62_spill] sm:$0xff] %v9602_v55  ;;  %v9605_v58 = vsel %vm1921_vm4, %v2007_v49, %v2008_v36  ;;  %v9621_v49 = vsel %vm1921_vm4, %v2008_v36, %v2010_v22 }
  0xf2   : > { %7059 = vmatprep.mubr.msk.f32.mxu1 %vm857_vm2, %v9569_v43  ;;  %12168 = vst [vmem:[#allocation60_spill] sm:$0xff] %v9589_v0  ;;  %12171 = vst [vmem:[#allocation63_spill] sm:$0xff] %v9605_v58 }
  0xf3   : > { %12173 = vst [vmem:[#allocation64_spill] sm:$0xff] %v9621_v49 }
  0xf4   : > { %7502 = vmatmul.mubr.msk.f32.gmra.mrb[28].mxu0 %vm857_vm2, %v9578_v42  ;;  %v2012_v42 = vrot.slane %v9326_v50, 1 }
  0xf5   : > { %7060 = vmatmul.mubr.msk.f32.gmra.mrb[60].mxu1 %vm857_vm2, %v9584_v57  ;;  %7504 = vmatprep.mubr.msk.f32.mxu0 %vm857_vm2, %v9587_v40  ;;  %v12172_v57 = vrot.slane %v9052_v6, 7 }
  0xf6   : > { %7062 = vmatprep.mubr.msk.f32.mxu1 %vm857_vm2, %v9589_v0  ;;  %v456_v0 = vld [vmem:[#allocation2 + $0x40] sm:$0xff]  ;;  %v9625_v6 = vsel %vm1921_vm4, %v2012_v42, %v2013_v20  ;;  %v12177_v42 = vrot.slane %v9057_v7, 1  ;;  %v12212_v7 = vld [vmem:[#allocation58_spill] sm:$0xff] }
  0xf7   : > { %v697_v40 = vsel %vm694_vm3, %v695_v38, %v12172_v57  ;;  %12174 = vst [vmem:[#allocation65_spill] sm:$0xff] %v9625_v6  ;;  %v2017_v38 = vrot.slane %v9349_v1, 1  ;;  %v2018_v57 = vrot.slane %v9362_v45, 1  ;;  %v705_v36 = vrot.slane %v456_v0, 7 }
  0xf8   : > { %7505 = vmatmul.mubr.msk.f32.gmra.mrb[30].mxu0 %vm857_vm2, %v9598_v48  ;;  %v12175_v48 = vrot.slane %v9044_v2, 7  ;;  %v9641_v22 = vsel %vm1921_vm4, %v1922_v9, %v12177_v42  ;;  %v9648_v2 = vsel %vm1921_vm4, %v2013_v20, %v2015_v54  ;;  %v2020_v0 = vrot.slane %v535_v44, 1  ;;  %v539_v9 = vld [vmem:[#allocation2 + $0x2d8] sm:$0xff] }
  0xf9   : > { %7063 = vmatmul.mubr.msk.f32.gmra.mrb[62].mxu1 %vm857_vm2, %v9602_v55  ;;  %7507 = vmatprep.mubr.msk.f32.mxu0 %vm857_vm2, %v9605_v58  ;;  %12178 = vst [vmem:[#allocation67_spill] sm:$0xff] %v9641_v22  ;;  %12179 = vst [vmem:[#allocation68_spill] sm:$0xff] %v9648_v2  ;;  %v9655_v8 = vsel %vm1921_vm4, %v2017_v38, %v2018_v57  ;;  %v9661_v20 = vsel %vm694_vm3, %v705_v36, %v706_v3  ;;  %v711_v44 = vrot.slane %v9074_v11, 7  ;;  %v464_v38 = vld [vmem:[#allocation2 + $0x80] sm:$0xff] }
  0xfa   : > { %7067 = vmatprep.mubr.msk.f32.mxu1 %vm857_vm2, %v697_v40  ;;  %v9633_v58 = vsel %vm694_vm3, %v700_v53, %v12175_v48  ;;  %v460_v40 = vld [vmem:[#allocation2 + $0x60] sm:$0xff]  ;;  %12180 = vst [vmem:[#allocation69_spill] sm:$0xff] %v9655_v8  ;;  %v708_v48 = vrot.slane %v9070_v10, 7  ;;  %v2023_v53 = vrot.slane %v9382_v60, 1  ;;  %v9674_v10 = vsel %vm1921_vm4, %v2018_v57, %v2020_v0 }
  0xfb   : > { %12176 = vst [vmem:[#allocation66_spill] sm:$0xff] %v9633_v58  ;;  %v710_v54 = vrot.slane %v460_v40, 7  ;;  %12181 = vst [vmem:[#allocation70_spill] sm:$0xff] %v9674_v10  ;;  %v2025_v36 = vrot.slane %v539_v9, 1  ;;  %v713_v11 = vrot.slane %v9085_v12, 7  ;;  %v715_v0 = vrot.slane %v464_v38, 7 }
  0xfc   : > { %7508 = vmatmul.mubr.msk.f32.gmra.mrb[32].mxu0 %vm857_vm2, %v9621_v49  ;;  %v9680_v40 = vsel %vm694_vm3, %v706_v3, %v708_v48  ;;  %v716_v12 = vrot.slane %v9089_v13, 7  ;;  %v468_v9 = vld [vmem:[#allocation2 + $0xa0] sm:$0xff]  ;;  %v2032_v38 = vrot.slane %v9409_v59, 1  ;;  %v2073_v22 = vrot.slane %v12212_v7, 1  ;;  %v12216_v7 = vld [vmem:[#allocation13_spill] sm:$0xff] }
  0xfd   : > { %7068 = vmatmul.mubr.msk.f32.vlgmr.msra.gmra.mrb[0].mxu1 %vm857_vm2, %v9139_v25  ;;  %7510 = vmatprep.mubr.msk.f32.mxu0 %vm857_vm2, %v9625_v6  ;;  %v2022_v25 = vrot.slane %v9369_v52, 1  ;;  %v9688_v57 = vsel %vm694_vm3, %v710_v54, %v711_v44  ;;  %v9698_v3 = vsel %vm1921_vm4, %v2023_v53, %v2025_v36  ;;  %v9701_v48 = vsel %vm694_vm3, %v711_v44, %v713_v11  ;;  %v12205_v6 = vld [vmem:[#allocation54_spill] sm:$0xff] }
  0xfe   : > { %7164 = vmatpush3.msk.msra.mxu1 %vm986_vm1, %v9171_v31  ;;  %7070 = vmatprep.mubr.msk.f32.mxu1 %vm857_vm2, %v9633_v58  ;;  %v543_v58 = vld [vmem:[#allocation2 + $0x2f8] sm:$0xff]  ;;  %12183 = vst [vmem:[#allocation72_spill] sm:$0xff] %v9698_v3  ;;  %v718_v54 = vrot.slane %v9097_v14, 7  ;;  %v720_v36 = vrot.slane %v468_v9, 7  ;;  %v721_v44 = vrot.slane %v9104_v16, 7  ;;  %v723_v11 = vrot.slane %v9114_v17, 7 }
  0xff   : > { %7261 = vmatprep.subr.msk.mxu1 %vm986_vm1, %v11983_v47  ;;  %v9683_v42 = vsel %vm1921_vm4, %v2022_v25, %v2023_v53  ;;  %v2027_v47 = vrot.slane %v9389_v5, 1  ;;  %v2030_v25 = vrot.slane %v543_v58, 1  ;;  %v9712_v53 = vsel %vm694_vm3, %v715_v0, %v716_v12  ;;  %v472_v58 = vld [vmem:[#allocation2 + $0xc0] sm:$0xff] }
 0x100   : > { %7511 = vmatmul.mubr.msk.f32.gmra.mrb[34].mxu0 %vm857_vm2, %v9648_v2  ;;  %12182 = vst [vmem:[#allocation71_spill] sm:$0xff] %v9683_v42  ;;  %v9728_v16 = vsel %vm694_vm3, %v716_v12, %v718_v54  ;;  %v2037_v9 = vrot.slane %v9429_v15, 1  ;;  %v726_v17 = vrot.slane %v9118_v18, 7  ;;  %v9749_v54 = vsel %vm694_vm3, %v721_v44, %v723_v11  ;;  %v12202_v2 = vld [vmem:[#allocation9_spill] sm:$0xff]  ;;  %v500_v31 = vld [vmem:[#allocation2 + $0x1a0] sm:$0xff] }
 0x101   : > { %7071 = vmatmul.mubr.msk.f32.gmra.mrb[2].mxu1 %vm857_vm2, %v9146_v26  ;;  %7513 = vmatprep.mubr.msk.f32.mxu0 %vm857_vm2, %v9655_v8  ;;  %v2028_v26 = vrot.slane %v9402_v62, 1  ;;  %v2063_v8 = vrot.slane %v9542_v4, 1  ;;  %v2068_v49 = vrot.slane %v12205_v6, 1  ;;  %v2078_v6 = vrot.slane %v9602_v55, 1  ;;  %v9933_v4 = vld [vmem:[#allocation2 + $0x450] sm:$0xff] }
 0x102   : > { %7073 = vmatprep.mubr.msk.f32.mxu1 %vm857_vm2, %v9661_v20  ;;  %12223 = vst [vmem:[#allocation93_spill] sm:$0xff] %v9933_v4 }
 0x103   : > { %v9706_v13 = vsel %vm1921_vm4, %v2027_v47, %v2028_v26  ;;  %v9722_v14 = vsel %vm1921_vm4, %v2028_v26, %v2030_v25  ;;  %v9736_v26 = vsel %vm694_vm3, %v720_v36, %v721_v44  ;;  %v476_v25 = vld [vmem:[#allocation2 + $0xe0] sm:$0xff]  ;;  %v728_v36 = vrot.slane %v9130_v23, 7 }
 0x104   : > { %7514 = vmatmul.mubr.msk.f32.gmra.mrb[36].mxu0 %vm857_vm2, %v9674_v10  ;;  %12184 = vst [vmem:[#allocation73_spill] sm:$0xff] %v9706_v13  ;;  %v2033_v10 = vrot.slane %v9422_v63, 1  ;;  %12185 = vst [vmem:[#allocation74_spill] sm:$0xff] %v9722_v14  ;;  %v731_v44 = vrot.slane %v9134_v24, 7 }
 0x105   : > { %7074 = vmatmul.mubr.msk.f32.gmra.mrb[4].mxu1 %vm857_vm2, %v9680_v40  ;;  %7516 = vmatprep.mubr.msk.f32.mxu0 %vm857_vm2, %v9683_v42  ;;  %v547_v42 = vld [vmem:[#allocation2 + $0x318] sm:$0xff]  ;;  %v9776_v24 = vsel %vm694_vm3, %v726_v17, %v728_v36 }
 0x106   : > { %7076 = vmatprep.mubr.msk.f32.mxu1 %vm857_vm2, %v9688_v57  ;;  %v2035_v47 = vrot.slane %v547_v42, 1  ;;  %v9731_v0 = vsel %vm1921_vm4, %v2032_v38, %v2033_v10  ;;  %v725_v42 = vrot.slane %v472_v58, 7  ;;  %v2042_v58 = vrot.slane %v9449_v56, 1 }
 0x107   : > { %12186 = vst [vmem:[#allocation75_spill] sm:$0xff] %v9731_v0 }
 0x108   : > { %7517 = vmatmul.mubr.msk.f32.gmra.mrb[38].mxu0 %vm857_vm2, %v9698_v3  ;;  %v2038_v3 = vrot.slane %v9442_v46, 1  ;;  %v9746_v12 = vsel %vm1921_vm4, %v2033_v10, %v2035_v47  ;;  %v9760_v10 = vsel %vm694_vm3, %v725_v42, %v726_v17  ;;  %v730_v47 = vrot.slane %v476_v25, 7 }
 0x109   : > { %7077 = vmatmul.mubr.msk.f32.gmra.mrb[6].mxu1 %vm857_vm2, %v9701_v48  ;;  %7519 = vmatprep.mubr.msk.f32.mxu0 %vm857_vm2, %v9706_v13  ;;  %v551_v13 = vld [vmem:[#allocation2 + $0x338] sm:$0xff]  ;;  %12187 = vst [vmem:[#allocation76_spill] sm:$0xff] %v9746_v12  ;;  %v2047_v25 = vrot.slane %v9469_v34, 1 }
 0x10a   : > { %7079 = vmatprep.mubr.msk.f32.mxu1 %vm857_vm2, %v9712_v53  ;;  %v2040_v38 = vrot.slane %v551_v13, 1  ;;  %v9754_v18 = vsel %vm1921_vm4, %v2037_v9, %v2038_v3  ;;  %v480_v13 = vld [vmem:[#allocation2 + $0x100] sm:$0xff]  ;;  %v733_v9 = vrot.slane %v9152_v27, 7  ;;  %v736_v27 = vrot.slane %v9156_v28, 7 }
 0x10b   : > { %12188 = vst [vmem:[#allocation77_spill] sm:$0xff] %v9754_v18 }
 0x10c   : > { %7520 = vmatmul.mubr.msk.f32.gmra.mrb[40].mxu0 %vm857_vm2, %v9722_v14  ;;  %v2043_v14 = vrot.slane %v9462_v19, 1  ;;  %v9770_v23 = vsel %vm1921_vm4, %v2038_v3, %v2040_v38  ;;  %v9784_v3 = vsel %vm694_vm3, %v730_v47, %v731_v44  ;;  %v484_v38 = vld [vmem:[#allocation2 + $0x120] sm:$0xff]  ;;  %v9797_v36 = vsel %vm694_vm3, %v731_v44, %v733_v9 }
 0x10d   : > { %7080 = vmatmul.mubr.msk.f32.gmra.mrb[8].mxu1 %vm857_vm2, %v9728_v16  ;;  %7522 = vmatprep.mubr.msk.f32.mxu0 %vm857_vm2, %v9731_v0  ;;  %v555_v0 = vld [vmem:[#allocation2 + $0x358] sm:$0xff]  ;;  %12189 = vst [vmem:[#allocation78_spill] sm:$0xff] %v9770_v23  ;;  %v738_v47 = vrot.slane %v9164_v29, 7  ;;  %v741_v44 = vrot.slane %v9168_v30, 7 }
 0x10e   : > { %7082 = vmatprep.mubr.msk.f32.mxu1 %vm857_vm2, %v9736_v26  ;;  %v2045_v11 = vrot.slane %v555_v0, 1  ;;  %v9779_v42 = vsel %vm1921_vm4, %v2042_v58, %v2043_v14  ;;  %v735_v0 = vrot.slane %v480_v13, 7  ;;  %v2052_v13 = vrot.slane %v9489_v35, 1 }
 0x10f   : > { %12190 = vst [vmem:[#allocation79_spill] sm:$0xff] %v9779_v42  ;;  %v9824_v30 = vsel %vm694_vm3, %v736_v27, %v738_v47 }
 0x110   : > { %7523 = vmatmul.mubr.msk.f32.gmra.mrb[42].mxu0 %vm857_vm2, %v9746_v12  ;;  %v2048_v12 = vrot.slane %v9482_v21, 1  ;;  %v9794_v17 = vsel %vm1921_vm4, %v2043_v14, %v2045_v11  ;;  %v9808_v14 = vsel %vm694_vm3, %v735_v0, %v736_v27  ;;  %v740_v11 = vrot.slane %v484_v38, 7 }
 0x111   : > { %7083 = vmatmul.mubr.msk.f32.gmra.mrb[10].mxu1 %vm857_vm2, %v9749_v54  ;;  %7525 = vmatprep.mubr.msk.f32.mxu0 %vm857_vm2, %v9754_v18  ;;  %v559_v18 = vld [vmem:[#allocation2 + $0x378] sm:$0xff]  ;;  %12191 = vst [vmem:[#allocation80_spill] sm:$0xff] %v9794_v17  ;;  %v2057_v38 = vrot.slane %v9509_v37, 1 }
 0x112   : > { %7085 = vmatprep.mubr.msk.f32.mxu1 %vm857_vm2, %v9760_v10  ;;  %v2050_v58 = vrot.slane %v559_v18, 1  ;;  %v9802_v28 = vsel %vm1921_vm4, %v2047_v25, %v2048_v12  ;;  %v488_v18 = vld [vmem:[#allocation2 + $0x140] sm:$0xff]  ;;  %v743_v25 = vrot.slane %v9181_v32, 7  ;;  %v746_v32 = vrot.slane %v9185_v33, 7 }
 0x113   : > { %12192 = vst [vmem:[#allocation81_spill] sm:$0xff] %v9802_v28 }
 0x114   : > { %7526 = vmatmul.mubr.msk.f32.gmra.mrb[44].mxu0 %vm857_vm2, %v9770_v23  ;;  %v2053_v23 = vrot.slane %v9502_v61, 1  ;;  %v9818_v29 = vsel %vm1921_vm4, %v2048_v12, %v2050_v58  ;;  %v9832_v12 = vsel %vm694_vm3, %v740_v11, %v741_v44  ;;  %v492_v58 = vld [vmem:[#allocation2 + $0x160] sm:$0xff]  ;;  %v9845_v47 = vsel %vm694_vm3, %v741_v44, %v743_v25  ;;  %v12200_v44 = vld [vmem:[#allocation8_spill] sm:$0xff] }
 0x115   : > { %7086 = vmatmul.mubr.msk.f32.gmra.mrb[12].mxu1 %vm857_vm2, %v9776_v24  ;;  %7528 = vmatprep.mubr.msk.f32.mxu0 %vm857_vm2, %v9779_v42  ;;  %v563_v42 = vld [vmem:[#allocation2 + $0x398] sm:$0xff]  ;;  %12193 = vst [vmem:[#allocation82_spill] sm:$0xff] %v9818_v29  ;;  %12196 = vst [vmem:[#allocation85_spill] sm:$0xff] %v9845_v47  ;;  %v12198_v11 = vld [vmem:[#allocation7_spill] sm:$0xff]  ;;  %v751_v25 = vrot.slane %v12200_v44, 7 }
 0x116   : > { %7088 = vmatprep.mubr.msk.f32.mxu1 %vm857_vm2, %v9784_v3  ;;  %v2055_v9 = vrot.slane %v563_v42, 1  ;;  %v9827_v0 = vsel %vm1921_vm4, %v2052_v13, %v2053_v23  ;;  %v745_v42 = vrot.slane %v488_v18, 7  ;;  %v748_v18 = vrot.slane %v12198_v11, 7 }
 0x117   : > { %12194 = vst [vmem:[#allocation83_spill] sm:$0xff] %v9827_v0 }
 0x118   : > { %7529 = vmatmul.mubr.msk.f32.gmra.mrb[46].mxu0 %vm857_vm2, %v9794_v17  ;;  %v2058_v17 = vrot.slane %v9522_v51, 1  ;;  %v9842_v27 = vsel %vm1921_vm4, %v2053_v23, %v2055_v9  ;;  %v9856_v23 = vsel %vm694_vm3, %v745_v42, %v746_v32  ;;  %v750_v9 = vrot.slane %v492_v58, 7 }
 0x119   : > { %7089 = vmatmul.mubr.msk.f32.gmra.mrb[14].mxu1 %vm857_vm2, %v9797_v36  ;;  %7531 = vmatprep.mubr.msk.f32.mxu0 %vm857_vm2, %v9802_v28  ;;  %v567_v28 = vld [vmem:[#allocation2 + $0x3b8] sm:$0xff]  ;;  %12195 = vst [vmem:[#allocation84_spill] sm:$0xff] %v9842_v27  ;;  %12199 = vst [vmem:[#allocation7_spill] sm:$0xff] %v9856_v23  ;;  %v753_v42 = vrot.slane %v12202_v2, 7  ;;  %v9872_v58 = vsel %vm694_vm3, %v746_v32, %v748_v18 }
 0x11a   : > { %7091 = vmatprep.mubr.msk.f32.mxu1 %vm857_vm2, %v9808_v14  ;;  %v2060_v13 = vrot.slane %v567_v28, 1  ;;  %v9850_v33 = vsel %vm1921_vm4, %v2057_v38, %v2058_v17  ;;  %v496_v28 = vld [vmem:[#allocation2 + $0x180] sm:$0xff]  ;;  %12203 = vst [vmem:[#allocation9_spill] sm:$0xff] %v9872_v58 }
 0x11b   : > { %12197 = vst [vmem:[#allocation86_spill] sm:$0xff] %v9850_v33  ;;  %v9893_v32 = vsel %vm694_vm3, %v751_v25, %v753_v42 }
 0x11c   : > { %7532 = vmatmul.mubr.msk.f32.gmra.mrb[48].mxu0 %vm857_vm2, %v9818_v29  ;;  %v2062_v29 = vrot.slane %v9529_v39, 1  ;;  %v9866_v38 = vsel %vm1921_vm4, %v2058_v17, %v2060_v13  ;;  %v9880_v17 = vsel %vm694_vm3, %v750_v9, %v751_v25  ;;  %v12207_v13 = vld [vmem:[#allocation10_spill] sm:$0xff]  ;;  %12209 = vst [vmem:[#allocation89_spill] sm:$0xff] %v9893_v32  ;;  %v12214_v25 = vld [vmem:[#allocation12_spill] sm:$0xff] }
 0x11d   : > { %7092 = vmatmul.mubr.msk.f32.gmra.mrb[16].mxu1 %vm857_vm2, %v9824_v30  ;;  %7534 = vmatprep.mubr.msk.f32.mxu0 %vm857_vm2, %v9827_v0  ;;  %v571_v0 = vld [vmem:[#allocation2 + $0x3d8] sm:$0xff]  ;;  %12201 = vst [vmem:[#allocation8_spill] sm:$0xff] %v9866_v38  ;;  %12206 = vst [vmem:[#allocation88_spill] sm:$0xff] %v9880_v17  ;;  %v756_v2 = vrot.slane %v12207_v13, 7  ;;  %v761_v42 = vrot.slane %v12214_v25, 7 }
 0x11e   : > { %7094 = vmatprep.mubr.msk.f32.mxu1 %vm857_vm2, %v9832_v12  ;;  %v2065_v11 = vrot.slane %v571_v0, 1  ;;  %v9875_v44 = vsel %vm1921_vm4, %v2062_v29, %v2063_v8  ;;  %v755_v0 = vrot.slane %v496_v28, 7  ;;  %v12211_v28 = vld [vmem:[#allocation11_spill] sm:$0xff] }
 0x11f   : > { %12204 = vst [vmem:[#allocation87_spill] sm:$0xff] %v9875_v44  ;;  %v758_v13 = vrot.slane %v12211_v28, 7 }
 0x120   : > { %7535 = vmatmul.mubr.msk.f32.gmra.mrb[50].mxu0 %vm857_vm2, %v9842_v27  ;;  %v2067_v27 = vrot.slane %v9549_v41, 1  ;;  %v9890_v29 = vsel %vm1921_vm4, %v2063_v8, %v2065_v11  ;;  %v9904_v8 = vsel %vm694_vm3, %v755_v0, %v756_v2  ;;  %v760_v11 = vrot.slane %v500_v31, 7  ;;  %v9931_v41 = vld [vmem:[#allocation2 + $0x448] sm:$0xff] }
 0x121   : > { %7095 = vmatmul.mubr.msk.f32.gmra.mrb[18].mxu1 %vm857_vm2, %v9845_v47  ;;  %7537 = vmatprep.mubr.msk.f32.mxu0 %vm857_vm2, %v9850_v33  ;;  %v575_v33 = vld [vmem:[#allocation2 + $0x3f8] sm:$0xff]  ;;  %12208 = vst [vmem:[#allocation10_spill] sm:$0xff] %v9890_v29  ;;  %12213 = vst [vmem:[#allocation11_spill] sm:$0xff] %v9904_v8  ;;  %v763_v0 = vrot.slane %v12216_v7, 7  ;;  %v9920_v31 = vsel %vm694_vm3, %v756_v2, %v758_v13  ;;  %v3605_v55 = vrot.slane %v9931_v41, 1 }
 0x122   : > { %7097 = vmatprep.mubr.msk.f32.mxu1 %vm857_vm2, %v9856_v23  ;;  %v2070_v18 = vrot.slane %v575_v33, 1  ;;  %v9898_v9 = vsel %vm1921_vm4, %v2067_v27, %v2068_v49  ;;  %v504_v33 = vld [vmem:[#allocation2 + $0x1c0] sm:$0xff]  ;;  %12217 = vst [vmem:[#allocation13_spill] sm:$0xff] %v9920_v31 }
 0x123   : > { %12210 = vst [vmem:[#allocation90_spill] sm:$0xff] %v9898_v9  ;;  %v9945_v13 = vsel %vm694_vm3, %v761_v42, %v763_v0 }
 0x124   : > { %7538 = vmatmul.mubr.msk.f32.gmra.mrb[52].mxu0 %vm857_vm2, %v9866_v38  ;;  %v2072_v38 = vrot.slane %v9569_v43, 1  ;;  %v9914_v27 = vsel %vm1921_vm4, %v2068_v49, %v2070_v18  ;;  %v9928_v49 = vsel %vm694_vm3, %v760_v11, %v761_v42  ;;  %v12221_v18 = vld [vmem:[#allocation14_spill] sm:$0xff]  ;;  %12225 = vst [vmem:[#allocation95_spill] sm:$0xff] %v9945_v13  ;;  %v12229_v42 = vld [vmem:[#allocation16_spill] sm:$0xff] }
 0x125   : > { %7098 = vmatmul.mubr.msk.f32.gmra.mrb[20].mxu1 %vm857_vm2, %v9872_v58  ;;  %7540 = vmatprep.mubr.msk.f32.mxu0 %vm857_vm2, %v9875_v44  ;;  %v579_v44 = vld [vmem:[#allocation2 + $0x418] sm:$0xff]  ;;  %12215 = vst [vmem:[#allocation12_spill] sm:$0xff] %v9914_v27  ;;  %12220 = vst [vmem:[#allocation92_spill] sm:$0xff] %v9928_v49  ;;  %v766_v7 = vrot.slane %v12221_v18, 7  ;;  %v12227_v18 = vld [vmem:[#allocation15_spill] sm:$0xff]  ;;  %v771_v0 = vrot.slane %v12229_v42, 7 }
 0x126   : > { %7100 = vmatprep.mubr.msk.f32.mxu1 %vm857_vm2, %v9880_v17  ;;  %v2075_v28 = vrot.slane %v579_v44, 1  ;;  %v9923_v25 = vsel %vm1921_vm4, %v2072_v38, %v2073_v22  ;;  %v765_v44 = vrot.slane %v504_v33, 7  ;;  %12222 = vst [vmem:[#allocation14_spill] sm:$0xff] %v9931_v41  ;;  %v508_v38 = vld [vmem:[#allocation2 + $0x1e0] sm:$0xff]  ;;  %v12233_v42 = vld [vmem:[#allocation17_spill] sm:$0xff] }
 0x127   : > { %12218 = vst [vmem:[#allocation91_spill] sm:$0xff] %v9923_v25 }
 0x128   : > { %7541 = vmatmul.mubr.msk.f32.gmra.mrb[54].mxu0 %vm857_vm2, %v9890_v29  ;;  %v12219_v29 = vld [vmem:[#allocation60_spill] sm:$0xff]  ;;  %v9942_v2 = vsel %vm1921_vm4, %v2073_v22, %v2075_v28  ;;  %v9956_v22 = vsel %vm694_vm3, %v765_v44, %v766_v7  ;;  %v770_v28 = vrot.slane %v508_v38, 7 }
 0x129   : > { %7101 = vmatmul.mubr.msk.f32.gmra.mrb[22].mxu1 %vm857_vm2, %v9893_v32  ;;  %7543 = vmatprep.mubr.msk.f32.mxu0 %vm857_vm2, %v9898_v9  ;;  %v2077_v43 = vrot.slane %v12219_v29, 1  ;;  %v583_v9 = vld [vmem:[#allocation2 + $0x438] sm:$0xff]  ;;  %12224 = vst [vmem:[#allocation94_spill] sm:$0xff] %v9942_v2  ;;  %v3606_v29 = vrot.slane %v9933_v4, 1  ;;  %12228 = vst [vmem:[#allocation15_spill] sm:$0xff] %v9956_v22 }
 0x12a   : > { %7103 = vmatprep.mubr.msk.f32.mxu1 %vm857_vm2, %v9904_v8  ;;  %v2080_v11 = vrot.slane %v583_v9, 1  ;;  %v520_v9 = vld [vmem:[#allocation2 + $0x240] sm:$0xff]  ;;  %v9978_v4 = vsel %vm694_vm3, %v770_v28, %v771_v0 }
 0x12b   : > { %v9950_v33 = vsel %vm1921_vm4, %v2077_v43, %v2078_v6  ;;  %v9974_v38 = vsel %vm1921_vm4, %v3605_v55, %v3606_v29  ;;  %12234 = vst [vmem:[#allocation17_spill] sm:$0xff] %v9978_v4  ;;  %v775_v41 = vrot.slane %v520_v9, 7 }
 0x12c   : > { %7544 = vmatmul.mubr.msk.f32.gmra.mrb[56].mxu0 %vm857_vm2, %v9914_v27  ;;  %12226 = vst [vmem:[#allocation96_spill] sm:$0xff] %v9950_v33  ;;  %v768_v27 = vrot.slane %v12227_v18, 7  ;;  %v9966_v43 = vsel %vm1921_vm4, %v2078_v6, %v2080_v11  ;;  %12232 = vst [vmem:[#allocation98_spill] sm:$0xff] %v9974_v38  ;;  %v524_v6 = vld [vmem:[#allocation2 + $0x260] sm:$0xff] }
 0x12d   : > { %7104 = vmatmul.mubr.msk.f32.gmra.mrb[24].mxu1 %vm857_vm2, %v9920_v31  ;;  %7546 = vmatprep.mubr.msk.f32.mxu0 %vm857_vm2, %v9923_v25  ;;  %v587_v25 = vld [vmem:[#allocation2 + $0x458] sm:$0xff]  ;;  %12230 = vst [vmem:[#allocation16_spill] sm:$0xff] %v9966_v43  ;;  %v12238_v11 = vld [vmem:[#allocation19_spill] sm:$0xff] }
 0x12e   : > { %7106 = vmatprep.mubr.msk.f32.mxu1 %vm857_vm2, %v9928_v49  ;;  %v3608_v18 = vrot.slane %v587_v25, 1  ;;  %v9971_v44 = vsel %vm694_vm3, %v766_v7, %v768_v27  ;;  %v12237_v25 = vld [vmem:[#allocation23_spill] sm:$0xff]  ;;  %v12239_v28 = vrot.slane %v12238_v11, 7 }
 0x12f   : > { %12231 = vst [vmem:[#allocation97_spill] sm:$0xff] %v9971_v44  ;;  %v781_v7 = vrot.slane %v12237_v25, 7  ;;  %v532_v25 = vld [vmem:[#allocation2 + $0x2a0] sm:$0xff] }
 0x130   : > { %7547 = vmatmul.mubr.msk.f32.gmra.mrb[58].mxu0 %vm857_vm2, %v9942_v2  ;;  %v773_v2 = vrot.slane %v12233_v42, 7  ;;  %v9987_v27 = vsel %vm1921_vm4, %v3606_v29, %v3608_v18  ;;  %v777_v9 = vsel %vm694_vm3, %v775_v41, %v12239_v28  ;;  %v780_v42 = vrot.slane %v524_v6, 7  ;;  %v528_v29 = vld [vmem:[#allocation2 + $0x280] sm:$0xff]  ;;  %v12243_v28 = vld [vmem:[#allocation24_spill] sm:$0xff] }
 0x131   : > { %7107 = vmatmul.mubr.msk.f32.gmra.mrb[26].mxu1 %vm857_vm2, %v9945_v13  ;;  %7549 = vmatprep.mubr.msk.f32.mxu0 %vm857_vm2, %v9950_v33  ;;  %12235 = vst [vmem:[#allocation99_spill] sm:$0xff] %v9987_v27  ;;  %v12240_v33 = vld [vmem:[#allocation20_spill] sm:$0xff]  ;;  %v785_v18 = vrot.slane %v528_v29, 7  ;;  %v786_v6 = vrot.slane %v9326_v50, 7 }
 0x132   : > { %7109 = vmatprep.mubr.msk.f32.mxu1 %vm857_vm2, %v9956_v22  ;;  %v9992_v55 = vsel %vm694_vm3, %v771_v0, %v773_v2  ;;  %v12241_v2 = vld [vmem:[#allocation26_spill] sm:$0xff]  ;;  %v10009_v41 = vsel %vm694_vm3, %v780_v42, %v781_v7  ;;  %v12244_v42 = vld [vmem:[#allocation4_spill] sm:$0xff] }
 0x133   : > { %12236 = vst [vmem:[#allocation100_spill] sm:$0xff] %v9992_v55  ;;  %v783_v0 = vrot.slane %v12241_v2, 7  ;;  %12242 = vst [vmem:[#allocation23_spill] sm:$0xff] %v10009_v41  ;;  %v12245_v29 = vrot.slane %v12244_v42, 4  ;;  %v536_v42 = vld [vmem:[#allocation2 + $0x2c0] sm:$0xff] }
 0x134   : > { %7550 = vmatmul.mubr.msk.f32.gmra.mrb[60].mxu0 %vm857_vm2, %v9966_v43  ;;  %v2002_v43 = vrot.slane %v12238_v11, 1 }
 0x135   : > { %7110 = vmatmul.mubr.msk.f32.gmra.mrb[28].mxu1 %vm857_vm2, %v9971_v44  ;;  %7552 = vmatprep.mubr.msk.f32.mxu0 %vm857_vm2, %v9974_v38  ;;  %v12054_v38 = vrot.slane %v12240_v33, 1  ;;  %v10032_v50 = vsel %vm694_vm3, %v781_v7, %v783_v0 }
 0x136   : > { %7112 = vmatprep.mubr.msk.f32.mxu1 %vm857_vm2, %v9978_v4  ;;  %12246 = vst [vmem:[#allocation19_spill] sm:$0xff] %v10032_v50 }
 0x137   : > { %v10017_v11 = vsel %vm1921_vm4, %v2002_v43, %v12054_v38  ;;  %v12247_v43 = vld [vmem:[#allocation29_spill] sm:$0xff]  ;;  %v10036_v38 = vsel %vm694_vm3, %v785_v18, %v786_v6  ;;  %v795_v18 = vrot.slane %v536_v42, 7 }
 0x138   : > { %7553 = vmatmul.mubr.msk.f32.gmra.mrb[62].mxu0 %vm857_vm2, %v9987_v27  ;;  %v788_v2 = vrot.slane %v12247_v43, 7  ;;  %v791_v27 = vrot.slane %v9349_v1, 7  ;;  %v793_v1 = vrot.slane %v9362_v45, 7 }
 0x139   : > { %7113 = vmatmul.mubr.msk.f32.gmra.mrb[30].mxu1 %vm857_vm2, %v9992_v55  ;;  %7557 = vmatprep.mubr.msk.f32.mxu0 %vm857_vm2, %v9661_v20 }
 0x13a   : > { %7115 = vmatprep.mubr.msk.f32.mxu1 %vm857_vm2, %v777_v9  ;;  %v10024_v9 = vld [vmem:[%s8487_s21 + $0x20] sm:$0xf]  ;;  %v10050_v7 = vsel %vm694_vm3, %v786_v6, %v788_v2  ;;  %v10066_v45 = vsel %vm694_vm3, %v791_v27, %v793_v1  ;;  %v798_v6 = vrot.slane %v9382_v60, 7  ;;  %v801_v2 = vrot.slane %v9389_v5, 7 }
 0x13b   : > { %v806_v1 = vrot.slane %v9409_v59, 7 }
 0x13c   : > { %7558 = vmatmul.mubr.msk.f32.vlgmr.msra.gmra.mrb[0].mxu0 %vm857_vm2, %v9680_v40 }
 0x13d   : > { %7116 = vmatmul.mubr.msk.f32.gmra.mrb[32].mxu1 %vm857_vm2, %v12243_v28  ;;  %7560 = vmatprep.mubr.msk.f32.mxu0 %vm857_vm2, %v9688_v57  ;;  %v790_v28 = vrot.slane %v532_v25, 7  ;;  %v796_v25 = vrot.slane %v9369_v52, 7 }
 0x13e   : > { %7654 = vmatpush3.msk.msra.mxu0 %vm986_vm1, %v12245_v29  ;;  %7118 = vmatprep.mubr.msk.f32.mxu1 %vm857_vm2, %v10009_v41  ;;  %v540_v29 = vld [vmem:[#allocation2 + $0x2e0] sm:$0xff] }
 0x13f   : > { %7751 = vmatprep.subr.msk.mxu0 %vm986_vm1, %v10024_v9  ;;  %v10054_v0 = vsel %vm694_vm3, %v790_v28, %v791_v27  ;;  %v10070_v52 = vsel %vm694_vm3, %v795_v18, %v796_v25  ;;  %v800_v43 = vrot.slane %v540_v29, 7  ;;  %v544_v28 = vld [vmem:[#allocation2 + $0x300] sm:$0xff]  ;;  %v10082_v60 = vsel %vm694_vm3, %v796_v25, %v798_v6 }
 0x140   : > { %7561 = vmatmul.mubr.msk.f32.gmra.mrb[2].mxu0 %vm857_vm2, %v9701_v48  ;;  %v803_v27 = vrot.slane %v9402_v62, 7  ;;  %v805_v42 = vrot.slane %v544_v28, 7  ;;  %v548_v18 = vld [vmem:[#allocation2 + $0x320] sm:$0xff]  ;;  %v808_v25 = vrot.slane %v9422_v63, 7  ;;  %v811_v6 = vrot.slane %v9429_v15, 7 }
 0x141   : > { %7119 = vmatmul.mubr.msk.f32.gmra.mrb[34].mxu1 %vm857_vm2, %v10032_v50  ;;  %7563 = vmatprep.mubr.msk.f32.mxu0 %vm857_vm2, %v9712_v53  ;;  %v10086_v5 = vsel %vm694_vm3, %v800_v43, %v801_v2  ;;  %v810_v29 = vrot.slane %v548_v18, 7  ;;  %v552_v43 = vld [vmem:[#allocation2 + $0x340] sm:$0xff] }
 0x142   : > { %7121 = vmatprep.mubr.msk.f32.mxu1 %vm857_vm2, %v10036_v38  ;;  %v10098_v62 = vsel %vm694_vm3, %v801_v2, %v803_v27  ;;  %v10102_v59 = vsel %vm694_vm3, %v805_v42, %v806_v1  ;;  %v10114_v63 = vsel %vm694_vm3, %v806_v1, %v808_v25  ;;  %v813_v2 = vrot.slane %v9442_v46, 7  ;;  %v556_v42 = vld [vmem:[#allocation2 + $0x360] sm:$0xff] }
 0x143   : > { %v10118_v15 = vsel %vm694_vm3, %v810_v29, %v811_v6  ;;  %v815_v28 = vrot.slane %v552_v43, 7  ;;  %v816_v27 = vrot.slane %v9449_v56, 7  ;;  %v818_v1 = vrot.slane %v9462_v19, 7  ;;  %v560_v29 = vld [vmem:[#allocation2 + $0x380] sm:$0xff] }
 0x144   : > { %7564 = vmatmul.mubr.msk.f32.gmra.mrb[4].mxu0 %vm857_vm2, %v9728_v16  ;;  %12248 = vst [vmem:[#allocation20_spill] sm:$0xff] %v10118_v15  ;;  %v10130_v46 = vsel %vm694_vm3, %v811_v6, %v813_v2  ;;  %v820_v18 = vrot.slane %v556_v42, 7  ;;  %v821_v25 = vrot.slane %v9469_v34, 7  ;;  %v823_v6 = vrot.slane %v9482_v21, 7  ;;  %v512_v50 = vld [vmem:[#allocation2 + $0x200] sm:$0xff] }
 0x145   : > { %7122 = vmatmul.mubr.msk.f32.gmra.mrb[36].mxu1 %vm857_vm2, %v10050_v7  ;;  %7566 = vmatprep.mubr.msk.f32.mxu0 %vm857_vm2, %v9736_v26  ;;  %12249 = vst [vmem:[#allocation26_spill] sm:$0xff] %v10130_v46  ;;  %v10134_v56 = vsel %vm694_vm3, %v815_v28, %v816_v27  ;;  %v10146_v19 = vsel %vm694_vm3, %v816_v27, %v818_v1  ;;  %v825_v43 = vrot.slane %v560_v29, 7  ;;  %v826_v2 = vrot.slane %v9489_v35, 7  ;;  %v564_v28 = vld [vmem:[#allocation2 + $0x3a0] sm:$0xff] }
 0x146   : > { %7124 = vmatprep.mubr.msk.f32.mxu1 %vm857_vm2, %v10054_v0  ;;  %12250 = vst [vmem:[#allocation24_spill] sm:$0xff] %v10134_v56  ;;  %12251 = vst [vmem:[#allocation4_spill] sm:$0xff] %v10146_v19  ;;  %v10150_v34 = vsel %vm694_vm3, %v820_v18, %v821_v25  ;;  %v10162_v21 = vsel %vm694_vm3, %v821_v25, %v823_v6  ;;  %v828_v27 = vrot.slane %v9502_v61, 7  ;;  %v830_v42 = vrot.slane %v564_v28, 7  ;;  %v568_v18 = vld [vmem:[#allocation2 + $0x3c0] sm:$0xff] }
 0x147   : > { %12252 = vst [vmem:[#allocation29_spill] sm:$0xff] %v10150_v34  ;;  %12253 = vst [vmem:[#allocation101_spill] sm:$0xff] %v10162_v21  ;;  %v10166_v35 = vsel %vm694_vm3, %v825_v43, %v826_v2  ;;  %v831_v1 = vrot.slane %v9509_v37, 7  ;;  %v833_v25 = vrot.slane %v9522_v51, 7  ;;  %v835_v29 = vrot.slane %v568_v18, 7  ;;  %v572_v43 = vld [vmem:[#allocation2 + $0x3e0] sm:$0xff] }
 0x148   : > { %7567 = vmatmul.mubr.msk.f32.gmra.mrb[6].mxu0 %vm857_vm2, %v9749_v54  ;;  %12254 = vst [vmem:[#allocation102_spill] sm:$0xff] %v10166_v35  ;;  %v10178_v61 = vsel %vm694_vm3, %v826_v2, %v828_v27  ;;  %v836_v6 = vrot.slane %v9529_v39, 7  ;;  %v12258_v2 = vld [vmem:[#allocation50_spill] sm:$0xff]  ;;  %v840_v27 = vrot.slane %v572_v43, 7  ;;  %v576_v41 = vld [vmem:[#allocation2 + $0x400] sm:$0xff] }
 0x149   : > { %7125 = vmatmul.mubr.msk.f32.gmra.mrb[38].mxu1 %vm857_vm2, %v10066_v45  ;;  %7569 = vmatprep.mubr.msk.f32.mxu0 %vm857_vm2, %v9760_v10  ;;  %12255 = vst [vmem:[#allocation103_spill] sm:$0xff] %v10178_v61  ;;  %v10182_v37 = vsel %vm694_vm3, %v830_v42, %v831_v1  ;;  %v10194_v51 = vsel %vm694_vm3, %v831_v1, %v833_v25  ;;  %v838_v28 = vrot.slane %v12258_v2, 7  ;;  %v12260_v42 = vld [vmem:[#allocation52_spill] sm:$0xff]  ;;  %v12261_v1 = vld [vmem:[#allocation54_spill] sm:$0xff] }
 0x14a   : > { %7127 = vmatprep.mubr.msk.f32.mxu1 %vm857_vm2, %v10070_v52  ;;  %12256 = vst [vmem:[#allocation104_spill] sm:$0xff] %v10182_v37  ;;  %12257 = vst [vmem:[#allocation105_spill] sm:$0xff] %v10194_v51  ;;  %v10198_v39 = vsel %vm694_vm3, %v835_v29, %v836_v6  ;;  %v841_v18 = vrot.slane %v12260_v42, 7  ;;  %v843_v25 = vrot.slane %v12261_v1, 7  ;;  %v10208_v2 = vld [vmem:[#allocation2 + $0x208] sm:$0xff]  ;;  %v2668_v42 = vrot.slane %v512_v50, 7 }
 0x14b   : > { %12259 = vst [vmem:[#allocation50_spill] sm:$0xff] %v10198_v39  ;;  %v2669_v29 = vrot.slane %v10208_v2, 7  ;;  %v10214_v43 = vsel %vm694_vm3, %v836_v6, %v838_v28  ;;  %v580_v1 = vld [vmem:[#allocation2 + $0x420] sm:$0xff]  ;;  %v12266_v50 = vld [vmem:[#allocation58_spill] sm:$0xff] }
 0x14c   : > { %7570 = vmatmul.mubr.msk.f32.gmra.mrb[8].mxu0 %vm857_vm2, %v9776_v24  ;;  %12262 = vst [vmem:[#allocation52_spill] sm:$0xff] %v10214_v43  ;;  %v848_v6 = vrot.slane %v12266_v50, 7 }
 0x14d   : > { %7128 = vmatmul.mubr.msk.f32.gmra.mrb[40].mxu1 %vm857_vm2, %v10082_v60  ;;  %7572 = vmatprep.mubr.msk.f32.mxu0 %vm857_vm2, %v9784_v3 }
 0x14e   : > { %7130 = vmatprep.mubr.msk.f32.mxu1 %vm857_vm2, %v10086_v5 }
 0x150   : > { %7573 = vmatmul.mubr.msk.f32.gmra.mrb[10].mxu0 %vm857_vm2, %v9797_v36 }
 0x151   : > { %7131 = vmatmul.mubr.msk.f32.gmra.mrb[42].mxu1 %vm857_vm2, %v10098_v62  ;;  %7575 = vmatprep.mubr.msk.f32.mxu0 %vm857_vm2, %v9808_v14 }
 0x152   : > { %7133 = vmatprep.mubr.msk.f32.mxu1 %vm857_vm2, %v10102_v59 }
 0x154   : > { %7576 = vmatmul.mubr.msk.f32.gmra.mrb[12].mxu0 %vm857_vm2, %v9824_v30 }
 0x155   : > { %7134 = vmatmul.mubr.msk.f32.gmra.mrb[44].mxu1 %vm857_vm2, %v10114_v63  ;;  %7578 = vmatprep.mubr.msk.f32.mxu0 %vm857_vm2, %v9832_v12 }
 0x156   : > { %7136 = vmatprep.mubr.msk.f32.mxu1 %vm857_vm2, %v10118_v15 }
 0x158   : > { %7579 = vmatmul.mubr.msk.f32.gmra.mrb[14].mxu0 %vm857_vm2, %v9845_v47  ;;  %v12268_v47 = vld [vmem:[#allocation60_spill] sm:$0xff] }
 0x159   : > { %7137 = vmatmul.mubr.msk.f32.gmra.mrb[46].mxu1 %vm857_vm2, %v10130_v46  ;;  %7581 = vmatprep.mubr.msk.f32.mxu0 %vm857_vm2, %v9856_v23 }
 0x15a   : > { %7139 = vmatprep.mubr.msk.f32.mxu1 %vm857_vm2, %v10134_v56 }
 0x15c   : > { %7582 = vmatmul.mubr.msk.f32.gmra.mrb[16].mxu0 %vm857_vm2, %v9872_v58 }
 0x15d   : > { %7140 = vmatmul.mubr.msk.f32.gmra.mrb[48].mxu1 %vm857_vm2, %v10146_v19  ;;  %7584 = vmatprep.mubr.msk.f32.mxu0 %vm857_vm2, %v9880_v17  ;;  %v10224_v17 = vld [vmem:[#allocation2 + $0x210] sm:$0xff] }
 0x15e   : > { %7142 = vmatprep.mubr.msk.f32.mxu1 %vm857_vm2, %v10150_v34  ;;  %v2671_v58 = vrot.slane %v10224_v17, 7 }
 0x160   : > { %7585 = vmatmul.mubr.msk.f32.gmra.mrb[18].mxu0 %vm857_vm2, %v9893_v32  ;;  %v10220_v32 = vld [vmem:[#allocation2 + $0x228] sm:$0xff] }
 0x161   : > { %7143 = vmatmul.mubr.msk.f32.gmra.mrb[50].mxu1 %vm857_vm2, %v10162_v21  ;;  %7587 = vmatprep.mubr.msk.f32.mxu0 %vm857_vm2, %v9904_v8 }
 0x162   : > { %7145 = vmatprep.mubr.msk.f32.mxu1 %vm857_vm2, %v10166_v35 }
 0x164   : > { %7588 = vmatmul.mubr.msk.f32.gmra.mrb[20].mxu0 %vm857_vm2, %v9920_v31  ;;  %v12264_v31 = vld [vmem:[#allocation56_spill] sm:$0xff] }
 0x165   : > { %7146 = vmatmul.mubr.msk.f32.gmra.mrb[52].mxu1 %vm857_vm2, %v10178_v61  ;;  %7590 = vmatprep.mubr.msk.f32.mxu0 %vm857_vm2, %v9928_v49  ;;  %v845_v49 = vrot.slane %v576_v41, 7  ;;  %v846_v8 = vrot.slane %v12264_v31, 7  ;;  %v10232_v41 = vsel %vm694_vm3, %v841_v18, %v843_v25  ;;  %v10237_v31 = vsel %vm694_vm3, %v2668_v42, %v2669_v29  ;;  %v12270_v42 = vld [vmem:[#allocation62_spill] sm:$0xff] }
 0x166   : > { %7148 = vmatprep.mubr.msk.f32.mxu1 %vm857_vm2, %v10182_v37  ;;  %12265 = vst [vmem:[#allocation56_spill] sm:$0xff] %v10232_v41 }
 0x167   : > { %v10244_v23 = vsel %vm694_vm3, %v845_v49, %v846_v8  ;;  %v10260_v49 = vsel %vm694_vm3, %v846_v8, %v848_v6  ;;  %v12274_v6 = vld [vmem:[#allocation3_spill] sm:$0xff] }
 0x168   : > { %7591 = vmatmul.mubr.msk.f32.gmra.mrb[22].mxu0 %vm857_vm2, %v9945_v13  ;;  %v10217_v13 = vsel %vm694_vm3, %v840_v27, %v841_v18  ;;  %v4077_v27 = vrot.slane %v10220_v32, 7  ;;  %12267 = vst [vmem:[#allocation58_spill] sm:$0xff] %v10244_v23  ;;  %v851_v18 = vrot.slane %v12268_v47, 7  ;;  %12269 = vst [vmem:[#allocation60_spill] sm:$0xff] %v10260_v49 }
 0x169   : > { %7149 = vmatmul.mubr.msk.f32.gmra.mrb[54].mxu1 %vm857_vm2, %v10194_v51  ;;  %7593 = vmatprep.mubr.msk.f32.mxu0 %vm857_vm2, %v9956_v22  ;;  %12263 = vst [vmem:[#allocation54_spill] sm:$0xff] %v10217_v13  ;;  %v516_v22 = vld [vmem:[#allocation2 + $0x220] sm:$0xff] }
 0x16a   : > { %7151 = vmatprep.mubr.msk.f32.mxu1 %vm857_vm2, %v10198_v39  ;;  %v4076_v28 = vrot.slane %v516_v22, 7  ;;  %v10254_v22 = vsel %vm694_vm3, %v2669_v29, %v2671_v58  ;;  %v12273_v29 = vld [vmem:[#allocation67_spill] sm:$0xff] }
 0x16c   : > { %7594 = vmatmul.mubr.msk.f32.gmra.mrb[24].mxu0 %vm857_vm2, %v9971_v44  ;;  %v10241_v44 = vld [vmem:[#allocation2 + $0x230] sm:$0xff]  ;;  %v4078_v47 = vsel %vm694_vm3, %v4076_v28, %v4077_v27  ;;  %v12275_v28 = vrot.slane %v12274_v6, 1  ;;  %v12284_v6 = vld [vmem:[#allocation30_spill] sm:$0xff] }
 0x16d   : > { %7152 = vmatmul.mubr.msk.f32.gmra.mrb[56].mxu1 %vm857_vm2, %v10214_v43  ;;  %7596 = vmatprep.mubr.msk.f32.mxu0 %vm857_vm2, %v9978_v4  ;;  %v850_v4 = vrot.slane %v580_v1, 7  ;;  %v4079_v25 = vrot.slane %v10241_v44, 7  ;;  %v853_v1 = vrot.slane %v12270_v42, 7  ;;  %v12279_v42 = vld [vmem:[#allocation21_spill] sm:$0xff] }
 0x16e   : > { %7154 = vmatprep.mubr.msk.f32.mxu1 %vm857_vm2, %v10217_v13 }
 0x16f   : > { %v10265_v50 = vsel %vm694_vm3, %v850_v4, %v851_v18  ;;  %v4080_v58 = vsel %vm694_vm3, %v4077_v27, %v4079_v25  ;;  %v10276_v8 = vsel %vm694_vm3, %v851_v18, %v853_v1  ;;  %v12278_v25 = vld [vmem:[#allocation18_spill] sm:$0xff] }
 0x170   : > { %7597 = vmatmul.mubr.msk.f32.gmra.mrb[26].mxu0 %vm857_vm2, %v9992_v55  ;;  %12271 = vst [vmem:[#allocation62_spill] sm:$0xff] %v10265_v50  ;;  %v451_v55 = vld [vmem:[#allocation2 + $0x18] sm:$0xff]  ;;  %12272 = vst [vmem:[#allocation106_spill] sm:$0xff] %v10276_v8 }
 0x171   : > { %7155 = vmatmul.mubr.msk.f32.gmra.mrb[58].mxu1 %vm857_vm2, %v10232_v41  ;;  %7599 = vmatprep.mubr.msk.f32.mxu0 %vm857_vm2, %v10237_v31  ;;  %v1925_v4 = vrot.slane %v451_v55, 1  ;;  %v12276_v55 = vld [vmem:[#allocation6_spill] sm:$0xff] }
 0x172   : > { %7157 = vmatprep.mubr.msk.f32.mxu1 %vm857_vm2, %v10244_v23  ;;  %v12277_v18 = vrot.slane %v12276_v55, 4  ;;  %v12280_v1 = vld [vmem:[#allocation22_spill] sm:$0xff]  ;;  %v12287_v55 = vld [vmem:[#allocation33_spill] sm:$0xff] }
 0x173   : > { %v1926_v27 = vsel %vm1921_vm4, %v12275_v28, %v1925_v4  ;;  %v12282_v4 = vld [vmem:[#allocation27_spill] sm:$0xff] }
 0x174   : > { %7600 = vmatmul.mubr.msk.f32.gmra.mrb[28].mxu0 %vm857_vm2, %v10254_v22  ;;  %v12285_v28 = vld [vmem:[#allocation31_spill] sm:$0xff] }
 0x175   : > { %7158 = vmatmul.mubr.msk.f32.gmra.mrb[60].mxu1 %vm857_vm2, %v10260_v49  ;;  %7602 = vmatprep.mubr.msk.f32.mxu0 %vm857_vm2, %v4078_v47  ;;  %v10299_v47 = vld [vmem:[%s8487_s21 + $0x10] sm:$0xff] }
 0x176   : > { %7160 = vmatprep.mubr.msk.f32.mxu1 %vm857_vm2, %v10265_v50 }
 0x178   : > { %7603 = vmatmul.mubr.msk.f32.gmra.mrb[30].mxu0 %vm857_vm2, %v4080_v58  ;;  %v12281_v58 = vld [vmem:[#allocation25_spill] sm:$0xff] }
 0x179   : > { %7161 = vmatmul.mubr.msk.f32.gmra.mrb[62].mxu1 %vm857_vm2, %v10276_v8  ;;  %7605 = vmatprep.mubr.msk.f32.mxu0 %vm857_vm2, %v10036_v38 }
 0x17a   : > { %7165 = vmatprep.mubr.msk.f32.mxu1 %vm857_vm2, %v12273_v29  ;;  %v12283_v29 = vld [vmem:[#allocation28_spill] sm:$0xff] }
 0x17c   : > { %7606 = vmatmul.mubr.msk.f32.gmra.mrb[32].mxu0 %vm857_vm2, %v10050_v7 }
 0x17d   : > { %7166 = vmatmul.mubr.msk.f32.vlgmr.msra.gmra.mrb[0].mxu1 %vm857_vm2, %v1926_v27  ;;  %7608 = vmatprep.mubr.msk.f32.mxu0 %vm857_vm2, %v10054_v0  ;;  %v12286_v27 = vld [vmem:[#allocation32_spill] sm:$0xff] }
 0x17e   : > { %7262 = vmatpush3.msk.msra.mxu1 %vm986_vm1, %v12277_v18  ;;  %7168 = vmatprep.mubr.msk.f32.mxu1 %vm857_vm2, %v12278_v25  ;;  %v12288_v18 = vld [vmem:[#allocation34_spill] sm:$0xff]  ;;  %v12289_v25 = vld [vmem:[#allocation35_spill] sm:$0xff] }
 0x17f   : > { %7849 = vmatprep.subr.msk.mxu1 %vm986_vm1, %v10299_v47 }
 0x180   : > { %7609 = vmatmul.mubr.msk.f32.gmra.mrb[34].mxu0 %vm857_vm2, %v10066_v45 }
 0x181   : > { %7169 = vmatmul.mubr.msk.f32.gmra.mrb[2].mxu1 %vm857_vm2, %v12279_v42  ;;  %7611 = vmatprep.mubr.msk.f32.mxu0 %vm857_vm2, %v10070_v52  ;;  %v12290_v42 = vld [vmem:[#allocation36_spill] sm:$0xff] }
 0x182   : > { %7171 = vmatprep.mubr.msk.f32.mxu1 %vm857_vm2, %v12280_v1 }
 0x184   : > { %7612 = vmatmul.mubr.msk.f32.gmra.mrb[36].mxu0 %vm857_vm2, %v10082_v60 }
 0x185   : > { %7172 = vmatmul.mubr.msk.f32.gmra.mrb[4].mxu1 %vm857_vm2, %v12281_v58  ;;  %7614 = vmatprep.mubr.msk.f32.mxu0 %vm857_vm2, %v10086_v5 }
 0x186   : > { %7174 = vmatprep.mubr.msk.f32.mxu1 %vm857_vm2, %v12282_v4 }
 0x188   : > { %7615 = vmatmul.mubr.msk.f32.gmra.mrb[38].mxu0 %vm857_vm2, %v10098_v62 }
 0x189   : > { %7175 = vmatmul.mubr.msk.f32.gmra.mrb[6].mxu1 %vm857_vm2, %v12283_v29  ;;  %7617 = vmatprep.mubr.msk.f32.mxu0 %vm857_vm2, %v10102_v59 }
 0x18a   : > { %7177 = vmatprep.mubr.msk.f32.mxu1 %vm857_vm2, %v12284_v6 }
 0x18c   : > { %7618 = vmatmul.mubr.msk.f32.gmra.mrb[40].mxu0 %vm857_vm2, %v10114_v63 }
 0x18d   : > { %7178 = vmatmul.mubr.msk.f32.gmra.mrb[8].mxu1 %vm857_vm2, %v12285_v28  ;;  %7620 = vmatprep.mubr.msk.f32.mxu0 %vm857_vm2, %v10118_v15  ;;  %v10407_v15 = vld [vmem:[#allocation2 + $0x470] sm:$0xff] }
 0x18e   : > { %7180 = vmatprep.mubr.msk.f32.mxu1 %vm857_vm2, %v12286_v27 }
 0x190   : > { %7621 = vmatmul.mubr.msk.f32.gmra.mrb[42].mxu0 %vm857_vm2, %v10130_v46  ;;  %v12291_v46 = vld [vmem:[#allocation37_spill] sm:$0xff] }
 0x191   : > { %7181 = vmatmul.mubr.msk.f32.gmra.mrb[10].mxu1 %vm857_vm2, %v12287_v55  ;;  %7623 = vmatprep.mubr.msk.f32.mxu0 %vm857_vm2, %v10134_v56  ;;  %v12292_v56 = vld [vmem:[#allocation38_spill] sm:$0xff] }
 0x192   : > { %7183 = vmatprep.mubr.msk.f32.mxu1 %vm857_vm2, %v12288_v18 }
 0x194   : > { %7624 = vmatmul.mubr.msk.f32.gmra.mrb[44].mxu0 %vm857_vm2, %v10146_v19  ;;  %v12293_v19 = vld [vmem:[#allocation39_spill] sm:$0xff] }
 0x195   : > { %7184 = vmatmul.mubr.msk.f32.gmra.mrb[12].mxu1 %vm857_vm2, %v12289_v25  ;;  %7626 = vmatprep.mubr.msk.f32.mxu0 %vm857_vm2, %v10150_v34  ;;  %v12294_v34 = vld [vmem:[#allocation40_spill] sm:$0xff] }
 0x196   : > { %7186 = vmatprep.mubr.msk.f32.mxu1 %vm857_vm2, %v12290_v42 }
 0x198   : > { %7627 = vmatmul.mubr.msk.f32.gmra.mrb[46].mxu0 %vm857_vm2, %v10162_v21  ;;  %v12295_v21 = vld [vmem:[#allocation41_spill] sm:$0xff] }
 0x199   : > { %7187 = vmatmul.mubr.msk.f32.gmra.mrb[14].mxu1 %vm857_vm2, %v12291_v46  ;;  %7629 = vmatprep.mubr.msk.f32.mxu0 %vm857_vm2, %v10166_v35  ;;  %v12296_v35 = vld [vmem:[#allocation42_spill] sm:$0xff] }
 0x19a   : > { %7189 = vmatprep.mubr.msk.f32.mxu1 %vm857_vm2, %v12292_v56 }
 0x19c   : > { %7630 = vmatmul.mubr.msk.f32.gmra.mrb[48].mxu0 %vm857_vm2, %v10178_v61  ;;  %v12297_v61 = vld [vmem:[#allocation43_spill] sm:$0xff] }
 0x19d   : > { %7190 = vmatmul.mubr.msk.f32.gmra.mrb[16].mxu1 %vm857_vm2, %v12293_v19  ;;  %7632 = vmatprep.mubr.msk.f32.mxu0 %vm857_vm2, %v10182_v37  ;;  %v12298_v37 = vld [vmem:[#allocation44_spill] sm:$0xff] }
 0x19e   : > { %7192 = vmatprep.mubr.msk.f32.mxu1 %vm857_vm2, %v12294_v34  ;;  %v10392_v34 = vld [vmem:[#allocation2 + $0x468] sm:$0xff] }
 0x19f   : > { %v4082_v19 = vrot.slane %v10392_v34, 7 }
 0x1a0   : > { %7633 = vmatmul.mubr.msk.f32.gmra.mrb[50].mxu0 %vm857_vm2, %v10194_v51  ;;  %v584_v51 = vld [vmem:[#allocation2 + $0x440] sm:$0xff] }
 0x1a1   : > { %7193 = vmatmul.mubr.msk.f32.gmra.mrb[18].mxu1 %vm857_vm2, %v12295_v21  ;;  %7635 = vmatprep.mubr.msk.f32.mxu0 %vm857_vm2, %v10198_v39  ;;  %v12299_v39 = vld [vmem:[#allocation45_spill] sm:$0xff] }
 0x1a2   : > { %7195 = vmatprep.mubr.msk.f32.mxu1 %vm857_vm2, %v12296_v35  ;;  %v12301_v35 = vld [vmem:[#allocation14_spill] sm:$0xff] }
 0x1a3   : > { %v2674_v21 = vrot.slane %v12301_v35, 7 }
 0x1a4   : > { %7636 = vmatmul.mubr.msk.f32.gmra.mrb[52].mxu0 %vm857_vm2, %v10214_v43  ;;  %v12300_v43 = vld [vmem:[#allocation46_spill] sm:$0xff] }
 0x1a5   : > { %7196 = vmatmul.mubr.msk.f32.gmra.mrb[20].mxu1 %vm857_vm2, %v12297_v61  ;;  %7638 = vmatprep.mubr.msk.f32.mxu0 %vm857_vm2, %v10217_v13  ;;  %v2673_v61 = vrot.slane %v584_v51, 7  ;;  %v588_v13 = vld [vmem:[#allocation2 + $0x460] sm:$0xff] }
 0x1a6   : > { %7198 = vmatprep.mubr.msk.f32.mxu1 %vm857_vm2, %v12298_v37  ;;  %v12302_v37 = vld [vmem:[#allocation47_spill] sm:$0xff] }
 0x1a7   : > { %v10404_v51 = vsel %vm694_vm3, %v2673_v61, %v2674_v21  ;;  %v4084_v61 = vrot.slane %v10407_v15, 7 }
 0x1a8   : > { %7639 = vmatmul.mubr.msk.f32.gmra.mrb[54].mxu0 %vm857_vm2, %v10232_v41  ;;  %v12303_v41 = vld [vmem:[#allocation93_spill] sm:$0xff]  ;;  %12305 = vst [vmem:[#allocation67_spill] sm:$0xff] %v10404_v51 }
 0x1a9   : > { %7199 = vmatmul.mubr.msk.f32.gmra.mrb[22].mxu1 %vm857_vm2, %v12299_v39  ;;  %7641 = vmatprep.mubr.msk.f32.mxu0 %vm857_vm2, %v10244_v23  ;;  %v2676_v23 = vrot.slane %v12303_v41, 7  ;;  %v12304_v39 = vld [vmem:[#allocation48_spill] sm:$0xff] }
 0x1aa   : > { %7201 = vmatprep.mubr.msk.f32.mxu1 %vm857_vm2, %v12300_v43  ;;  %v4081_v43 = vrot.slane %v588_v13, 7 }
 0x1ac   : > { %7642 = vmatmul.mubr.msk.f32.gmra.mrb[56].mxu0 %vm857_vm2, %v10260_v49  ;;  %v12306_v49 = vld [vmem:[#allocation49_spill] sm:$0xff]  ;;  %v4083_v13 = vsel %vm694_vm3, %v4081_v43, %v4082_v19  ;;  %v8376_v43 = vld [vmem:[#allocation2 + $0x48] sm:$0xff] }
 0x1ad   : > { %7202 = vmatmul.mubr.msk.f32.gmra.mrb[24].mxu1 %vm857_vm2, %v12302_v37  ;;  %7644 = vmatprep.mubr.msk.f32.mxu0 %vm857_vm2, %v10265_v50  ;;  %v10416_v50 = vsel %vm694_vm3, %v2674_v21, %v2676_v23  ;;  %v523_v37 = vld [vmem:[#allocation2 + $0x258] sm:$0xff]  ;;  %v12310_v23 = vld [vmem:[#allocation55_spill] sm:$0xff] }
 0x1ae   : > { %7204 = vmatprep.mubr.msk.f32.mxu1 %vm857_vm2, %v12304_v39  ;;  %12307 = vst [vmem:[#allocation3_spill] sm:$0xff] %v10416_v50  ;;  %v12308_v39 = vld [vmem:[#allocation51_spill] sm:$0xff]  ;;  %v2005_v21 = vrot.slane %v523_v37, 1  ;;  %v8378_v37 = vld [vmem:[#allocation2 + $0x68] sm:$0xff] }
 0x1b0   : > { %7645 = vmatmul.mubr.msk.f32.gmra.mrb[58].mxu0 %vm857_vm2, %v10276_v8  ;;  %v12309_v8 = vld [vmem:[#allocation53_spill] sm:$0xff] }
 0x1b1   : > { %7205 = vmatmul.mubr.msk.f32.gmra.mrb[26].mxu1 %vm857_vm2, %v12306_v49  ;;  %7647 = vmatprep.mubr.msk.f32.mxu0 %vm857_vm2, %v10404_v51  ;;  %v4085_v51 = vsel %vm694_vm3, %v4082_v19, %v4084_v61  ;;  %v8377_v19 = vld [vmem:[#allocation2 + $0x50] sm:$0xff] }
 0x1b2   : > { %7207 = vmatprep.mubr.msk.f32.mxu1 %vm857_vm2, %v12308_v39  ;;  %v12311_v39 = vld [vmem:[#allocation57_spill] sm:$0xff] }
 0x1b3   : > { %v8379_v61 = vld [vmem:[#allocation2 + $0x70] sm:$0xff] }
 0x1b4   : > { %7648 = vmatmul.mubr.msk.f32.gmra.mrb[60].mxu0 %vm857_vm2, %v10416_v50  ;;  %v12312_v50 = vrot.slane %v12240_v33, 1  ;;  %v12314_v33 = vld [vmem:[#allocation64_spill] sm:$0xff] }
 0x1b5   : > { %7208 = vmatmul.mubr.msk.f32.gmra.mrb[28].mxu1 %vm857_vm2, %v12309_v8  ;;  %7650 = vmatprep.mubr.msk.f32.mxu0 %vm857_vm2, %v4083_v13 }
 0x1b6   : > { %7210 = vmatprep.mubr.msk.f32.mxu1 %vm857_vm2, %v12310_v23  ;;  %v2006_v13 = vsel %vm1921_vm4, %v12312_v50, %v2005_v21  ;;  %v12315_v50 = vld [vmem:[#allocation65_spill] sm:$0xff] }
 0x1b7   : > { %v8381_v21 = vld [vmem:[#allocation2 + $0x90] sm:$0xff] }
 0x1b8   : > { %7651 = vmatmul.mubr.msk.f32.gmra.mrb[62].mxu0 %vm857_vm2, %v4085_v51  ;;  %v12313_v51 = vld [vmem:[#allocation63_spill] sm:$0xff] }
 0x1b9   : > { %7211 = vmatmul.mubr.msk.f32.gmra.mrb[30].mxu1 %vm857_vm2, %v12311_v39  ;;  %7655 = vmatprep.mubr.msk.f32.mxu0 %vm857_vm2, %v8376_v43  ;;  %v12316_v43 = vld [vmem:[#allocation68_spill] sm:$0xff] }
 0x1ba   : > { %7213 = vmatprep.mubr.msk.f32.mxu1 %vm857_vm2, %v10017_v11  ;;  %v8380_v11 = vld [vmem:[#allocation2 + $0x88] sm:$0xff] }
 0x1bc   : > { %7656 = vmatmul.mubr.msk.f32.vlgmr.msra.gmra.mrb[0].mxu0 %vm857_vm2, %v8377_v19  ;;  %v8383_v19 = vld [vmem:[#allocation2 + $0xb0] sm:$0xff] }
 0x1bd   : > { %7214 = vmatmul.mubr.msk.f32.gmra.mrb[32].mxu1 %vm857_vm2, %v2006_v13  ;;  %7658 = vmatprep.mubr.msk.f32.mxu0 %vm857_vm2, %v8378_v37  ;;  %v12317_v13 = vld [vmem:[#allocation69_spill] sm:$0xff]  ;;  %v12318_v37 = vld [vmem:[#allocation70_spill] sm:$0xff] }
 0x1be   : > { %7752 = vmatpush3.msk.msra.mxu0 %vm986_vm1, %v10024_v9  ;;  %7216 = vmatprep.mubr.msk.f32.mxu1 %vm857_vm2, %v12313_v51  ;;  %v8382_v9 = vld [vmem:[#allocation2 + $0xa8] sm:$0xff] }
 0x1bf   : > { %v8384_v51 = vld [vmem:[#allocation2 + $0xc8] sm:$0xff] }
 0x1c0   : > { %7659 = vmatmul.mubr.msk.f32.gmra.mrb[2].mxu0 %vm857_vm2, %v8379_v61  ;;  %v12319_v61 = vld [vmem:[#allocation71_spill] sm:$0xff] }
 0x1c1   : > { %7217 = vmatmul.mubr.msk.f32.gmra.mrb[34].mxu1 %vm857_vm2, %v12314_v33  ;;  %7661 = vmatprep.mubr.msk.f32.mxu0 %vm857_vm2, %v8380_v11  ;;  %v8385_v33 = vld [vmem:[#allocation2 + $0xd0] sm:$0xff]  ;;  %v12320_v11 = vld [vmem:[#allocation72_spill] sm:$0xff] }
 0x1c2   : > { %7219 = vmatprep.mubr.msk.f32.mxu1 %vm857_vm2, %v12315_v50 }
 0x1c4   : > { %7662 = vmatmul.mubr.msk.f32.gmra.mrb[4].mxu0 %vm857_vm2, %v8381_v21  ;;  %v8386_v21 = vld [vmem:[#allocation2 + $0xe8] sm:$0xff] }
 0x1c5   : > { %7220 = vmatmul.mubr.msk.f32.gmra.mrb[36].mxu1 %vm857_vm2, %v12316_v43  ;;  %7664 = vmatprep.mubr.msk.f32.mxu0 %vm857_vm2, %v8382_v9  ;;  %v12321_v9 = vld [vmem:[#allocation73_spill] sm:$0xff] }
 0x1c6   : > { %7222 = vmatprep.mubr.msk.f32.mxu1 %vm857_vm2, %v12317_v13 }
 0x1c8   : > { %7665 = vmatmul.mubr.msk.f32.gmra.mrb[6].mxu0 %vm857_vm2, %v8383_v19  ;;  %v8387_v19 = vld [vmem:[#allocation2 + $0xf0] sm:$0xff] }
 0x1c9   : > { %7223 = vmatmul.mubr.msk.f32.gmra.mrb[38].mxu1 %vm857_vm2, %v12318_v37  ;;  %7667 = vmatprep.mubr.msk.f32.mxu0 %vm857_vm2, %v8384_v51  ;;  %v12322_v37 = vld [vmem:[#allocation74_spill] sm:$0xff]  ;;  %v8388_v51 = vld [vmem:[#allocation2 + $0x108] sm:$0xff] }
 0x1ca   : > { %7225 = vmatprep.mubr.msk.f32.mxu1 %vm857_vm2, %v12319_v61  ;;  %v12323_v61 = vld [vmem:[#allocation75_spill] sm:$0xff] }
 0x1cc   : > { %7668 = vmatmul.mubr.msk.f32.gmra.mrb[8].mxu0 %vm857_vm2, %v8385_v33  ;;  %v8389_v33 = vld [vmem:[#allocation2 + $0x110] sm:$0xff] }
 0x1cd   : > { %7226 = vmatmul.mubr.msk.f32.gmra.mrb[40].mxu1 %vm857_vm2, %v12320_v11  ;;  %7670 = vmatprep.mubr.msk.f32.mxu0 %vm857_vm2, %v8386_v21  ;;  %v12324_v11 = vld [vmem:[#allocation76_spill] sm:$0xff] }
 0x1ce   : > { %7228 = vmatprep.mubr.msk.f32.mxu1 %vm857_vm2, %v12321_v9  ;;  %v8390_v21 = vld [vmem:[#allocation2 + $0x128] sm:$0xff]  ;;  %v12325_v9 = vld [vmem:[#allocation77_spill] sm:$0xff] }
 0x1d0   : > { %7671 = vmatmul.mubr.msk.f32.gmra.mrb[10].mxu0 %vm857_vm2, %v8387_v19  ;;  %v8391_v19 = vld [vmem:[#allocation2 + $0x130] sm:$0xff] }
 0x1d1   : > { %7229 = vmatmul.mubr.msk.f32.gmra.mrb[42].mxu1 %vm857_vm2, %v12322_v37  ;;  %7673 = vmatprep.mubr.msk.f32.mxu0 %vm857_vm2, %v8388_v51  ;;  %v12326_v37 = vld [vmem:[#allocation78_spill] sm:$0xff]  ;;  %v8392_v51 = vld [vmem:[#allocation2 + $0x148] sm:$0xff] }
 0x1d2   : > { %7231 = vmatprep.mubr.msk.f32.mxu1 %vm857_vm2, %v12323_v61  ;;  %v12327_v61 = vld [vmem:[#allocation79_spill] sm:$0xff] }
 0x1d4   : > { %7674 = vmatmul.mubr.msk.f32.gmra.mrb[12].mxu0 %vm857_vm2, %v8389_v33  ;;  %v8393_v33 = vld [vmem:[#allocation2 + $0x150] sm:$0xff] }
 0x1d5   : > { %7232 = vmatmul.mubr.msk.f32.gmra.mrb[44].mxu1 %vm857_vm2, %v12324_v11  ;;  %7676 = vmatprep.mubr.msk.f32.mxu0 %vm857_vm2, %v8390_v21  ;;  %v12328_v11 = vld [vmem:[#allocation80_spill] sm:$0xff] }
 0x1d6   : > { %7234 = vmatprep.mubr.msk.f32.mxu1 %vm857_vm2, %v12325_v9  ;;  %v8394_v21 = vld [vmem:[#allocation2 + $0x168] sm:$0xff]  ;;  %v12329_v9 = vld [vmem:[#allocation81_spill] sm:$0xff] }
 0x1d8   : > { %7677 = vmatmul.mubr.msk.f32.gmra.mrb[14].mxu0 %vm857_vm2, %v8391_v19  ;;  %v8395_v19 = vld [vmem:[#allocation2 + $0x170] sm:$0xff] }
 0x1d9   : > { %7235 = vmatmul.mubr.msk.f32.gmra.mrb[46].mxu1 %vm857_vm2, %v12326_v37  ;;  %7679 = vmatprep.mubr.msk.f32.mxu0 %vm857_vm2, %v8392_v51  ;;  %v12330_v37 = vld [vmem:[#allocation82_spill] sm:$0xff]  ;;  %v8396_v51 = vld [vmem:[#allocation2 + $0x188] sm:$0xff] }
 0x1da   : > { %7237 = vmatprep.mubr.msk.f32.mxu1 %vm857_vm2, %v12327_v61  ;;  %v12331_v61 = vld [vmem:[#allocation83_spill] sm:$0xff] }
 0x1dc   : > { %7680 = vmatmul.mubr.msk.f32.gmra.mrb[16].mxu0 %vm857_vm2, %v8393_v33  ;;  %v8397_v33 = vld [vmem:[#allocation2 + $0x190] sm:$0xff] }
 0x1dd   : > { %7238 = vmatmul.mubr.msk.f32.gmra.mrb[48].mxu1 %vm857_vm2, %v12328_v11  ;;  %7682 = vmatprep.mubr.msk.f32.mxu0 %vm857_vm2, %v8394_v21  ;;  %v12332_v11 = vld [vmem:[#allocation84_spill] sm:$0xff] }
 0x1de   : > { %7240 = vmatprep.mubr.msk.f32.mxu1 %vm857_vm2, %v12329_v9  ;;  %v8398_v21 = vld [vmem:[#allocation2 + $0x1a8] sm:$0xff]  ;;  %v12333_v9 = vld [vmem:[#allocation86_spill] sm:$0xff] }
 0x1e0   : > { %7683 = vmatmul.mubr.msk.f32.gmra.mrb[18].mxu0 %vm857_vm2, %v8395_v19  ;;  %v8399_v19 = vld [vmem:[#allocation2 + $0x1b0] sm:$0xff] }
 0x1e1   : > { %7241 = vmatmul.mubr.msk.f32.gmra.mrb[50].mxu1 %vm857_vm2, %v12330_v37  ;;  %7685 = vmatprep.mubr.msk.f32.mxu0 %vm857_vm2, %v8396_v51  ;;  %v12334_v37 = vld [vmem:[#allocation8_spill] sm:$0xff] }
 0x1e2   : > { %7243 = vmatprep.mubr.msk.f32.mxu1 %vm857_vm2, %v12331_v61  ;;  %v8400_v51 = vld [vmem:[#allocation2 + $0x1c8] sm:$0xff]  ;;  %v12335_v61 = vld [vmem:[#allocation87_spill] sm:$0xff] }
 0x1e4   : > { %7686 = vmatmul.mubr.msk.f32.gmra.mrb[20].mxu0 %vm857_vm2, %v8397_v33  ;;  %v8401_v33 = vld [vmem:[#allocation2 + $0x1d0] sm:$0xff] }
 0x1e5   : > { %7244 = vmatmul.mubr.msk.f32.gmra.mrb[52].mxu1 %vm857_vm2, %v12332_v11  ;;  %7688 = vmatprep.mubr.msk.f32.mxu0 %vm857_vm2, %v8398_v21  ;;  %v12336_v11 = vld [vmem:[#allocation10_spill] sm:$0xff]  ;;  %v8402_v21 = vld [vmem:[#allocation2 + $0x1e8] sm:$0xff] }
 0x1e6   : > { %7246 = vmatprep.mubr.msk.f32.mxu1 %vm857_vm2, %v12333_v9  ;;  %v12337_v9 = vld [vmem:[#allocation90_spill] sm:$0xff] }
 0x1e8   : > { %7689 = vmatmul.mubr.msk.f32.gmra.mrb[22].mxu0 %vm857_vm2, %v8399_v19  ;;  %v8403_v19 = vld [vmem:[#allocation2 + $0x1f0] sm:$0xff] }
 0x1e9   : > { %7247 = vmatmul.mubr.msk.f32.gmra.mrb[54].mxu1 %vm857_vm2, %v12334_v37  ;;  %7691 = vmatprep.mubr.msk.f32.mxu0 %vm857_vm2, %v8400_v51  ;;  %v12338_v37 = vld [vmem:[#allocation12_spill] sm:$0xff]  ;;  %v12339_v51 = vld [vmem:[#allocation91_spill] sm:$0xff] }
 0x1ea   : > { %7249 = vmatprep.mubr.msk.f32.mxu1 %vm857_vm2, %v12335_v61 }
 0x1ec   : > { %7692 = vmatmul.mubr.msk.f32.gmra.mrb[24].mxu0 %vm857_vm2, %v8401_v33  ;;  %v12340_v33 = vld [vmem:[#allocation94_spill] sm:$0xff] }
 0x1ed   : > { %7250 = vmatmul.mubr.msk.f32.gmra.mrb[56].mxu1 %vm857_vm2, %v12336_v11  ;;  %7694 = vmatprep.mubr.msk.f32.mxu0 %vm857_vm2, %v8402_v21  ;;  %v12341_v21 = vld [vmem:[#allocation96_spill] sm:$0xff]  ;;  %v10665_v11 = vld [vmem:[#allocation2 + $0x3d0] sm:$0xff] }
 0x1ee   : > { %7252 = vmatprep.mubr.msk.f32.mxu1 %vm857_vm2, %v12337_v9  ;;  %v10659_v9 = vld [vmem:[#allocation2 + $0x3c8] sm:$0xff]  ;;  %12351 = vst [vmem:[#allocation21_spill] sm:$0xff] %v10665_v11 }
 0x1ef   : > { %12349 = vst [vmem:[#allocation18_spill] sm:$0xff] %v10659_v9 }
 0x1f0   : > { %7695 = vmatmul.mubr.msk.f32.gmra.mrb[26].mxu0 %vm857_vm2, %v8403_v19  ;;  %v12342_v19 = vld [vmem:[#allocation16_spill] sm:$0xff] }
 0x1f1   : > { %7253 = vmatmul.mubr.msk.f32.gmra.mrb[58].mxu1 %vm857_vm2, %v12338_v37  ;;  %7697 = vmatprep.mubr.msk.f32.mxu0 %vm857_vm2, %v10208_v2  ;;  %v10537_v2 = vld [vmem:[#allocation2 + $0x288] sm:$0xff]  ;;  %v10653_v37 = vld [vmem:[#allocation2 + $0x3b0] sm:$0xff] }
 0x1f2   : > { %7255 = vmatprep.mubr.msk.f32.mxu1 %vm857_vm2, %v12339_v51  ;;  %v10549_v51 = vld [vmem:[#allocation2 + $0x2a8] sm:$0xff]  ;;  %12347 = vst [vmem:[#allocation6_spill] sm:$0xff] %v10653_v37 }
 0x1f4   : > { %7698 = vmatmul.mubr.msk.f32.gmra.mrb[28].mxu0 %vm857_vm2, %v10224_v17  ;;  %v12343_v17 = vld [vmem:[#allocation66_spill] sm:$0xff] }
 0x1f5   : > { %7256 = vmatmul.mubr.msk.f32.gmra.mrb[60].mxu1 %vm857_vm2, %v12340_v33  ;;  %7700 = vmatprep.mubr.msk.f32.mxu0 %vm857_vm2, %v10220_v32  ;;  %v10543_v33 = vld [vmem:[#allocation2 + $0x290] sm:$0xff] }
 0x1f6   : > { %7258 = vmatprep.mubr.msk.f32.mxu1 %vm857_vm2, %v12341_v21  ;;  %v12344_v21 = vld [vmem:[#allocation5_spill] sm:$0xff] }
 0x1f8   : > { %7701 = vmatmul.mubr.msk.f32.gmra.mrb[30].mxu0 %vm857_vm2, %v10241_v44 }
 0x1f9   : > { %7259 = vmatmul.mubr.msk.f32.gmra.mrb[62].mxu1 %vm857_vm2, %v12342_v19  ;;  %7703 = vmatprep.mubr.msk.f32.mxu0 %vm857_vm2, %v10537_v2  ;;  %v10647_v19 = vld [vmem:[#allocation2 + $0x3a8] sm:$0xff] }
 0x1fa   : > { %7263 = vmatprep.mubr.msk.f32.mxu1 %vm857_vm2, %v12343_v17  ;;  %v10557_v17 = vld [vmem:[#allocation2 + $0x2b0] sm:$0xff] }
 0x1fc   : > { %7704 = vmatmul.mubr.msk.f32.gmra.mrb[32].mxu0 %vm857_vm2, %v10543_v33 }
 0x1fd   : > { %7264 = vmatmul.mubr.msk.f32.vlgmr.msra.gmra.mrb[0].mxu1 %vm857_vm2, %v12344_v21  ;;  %7706 = vmatprep.mubr.msk.f32.mxu0 %vm857_vm2, %v10549_v51  ;;  %v10563_v21 = vld [vmem:[#allocation2 + $0x2c8] sm:$0xff] }
 0x1fe   : > { %7850 = vmatpush3.msk.msra.mxu1 %vm986_vm1, %v10299_v47  ;;  %7266 = vmatprep.mubr.msk.f32.mxu1 %vm857_vm2, %v9661_v20  ;;  %v10569_v47 = vld [vmem:[#allocation2 + $0x2d0] sm:$0xff]  ;;  %v10575_v20 = vld [vmem:[#allocation2 + $0x2e8] sm:$0xff] }
 0x200   : > { %7707 = vmatmul.mubr.msk.f32.gmra.mrb[34].mxu0 %vm857_vm2, %v10557_v17 }
 0x201   : > { %7267 = vmatmul.mubr.msk.f32.gmra.mrb[2].mxu1 %vm857_vm2, %v9680_v40  ;;  %7709 = vmatprep.mubr.msk.f32.mxu0 %vm857_vm2, %v10563_v21  ;;  %v10581_v40 = vld [vmem:[#allocation2 + $0x2f0] sm:$0xff] }
 0x202   : > { %7269 = vmatprep.mubr.msk.f32.mxu1 %vm857_vm2, %v9688_v57  ;;  %v10587_v57 = vld [vmem:[#allocation2 + $0x308] sm:$0xff] }
 0x204   : > { %7710 = vmatmul.mubr.msk.f32.gmra.mrb[36].mxu0 %vm857_vm2, %v10569_v47 }
 0x205   : > { %7270 = vmatmul.mubr.msk.f32.gmra.mrb[4].mxu1 %vm857_vm2, %v9701_v48  ;;  %7712 = vmatprep.mubr.msk.f32.mxu0 %vm857_vm2, %v10575_v20  ;;  %v10593_v48 = vld [vmem:[#allocation2 + $0x310] sm:$0xff] }
 0x206   : > { %7272 = vmatprep.mubr.msk.f32.mxu1 %vm857_vm2, %v9712_v53  ;;  %v10599_v53 = vld [vmem:[#allocation2 + $0x328] sm:$0xff] }
 0x208   : > { %7713 = vmatmul.mubr.msk.f32.gmra.mrb[38].mxu0 %vm857_vm2, %v10581_v40 }
 0x209   : > { %7273 = vmatmul.mubr.msk.f32.gmra.mrb[6].mxu1 %vm857_vm2, %v9728_v16  ;;  %7715 = vmatprep.mubr.msk.f32.mxu0 %vm857_vm2, %v10587_v57  ;;  %v10605_v16 = vld [vmem:[#allocation2 + $0x330] sm:$0xff] }
 0x20a   : > { %7275 = vmatprep.mubr.msk.f32.mxu1 %vm857_vm2, %v9736_v26  ;;  %v10611_v26 = vld [vmem:[#allocation2 + $0x348] sm:$0xff] }
 0x20c   : > { %7716 = vmatmul.mubr.msk.f32.gmra.mrb[40].mxu0 %vm857_vm2, %v10593_v48 }
 0x20d   : > { %7276 = vmatmul.mubr.msk.f32.gmra.mrb[8].mxu1 %vm857_vm2, %v9749_v54  ;;  %7718 = vmatprep.mubr.msk.f32.mxu0 %vm857_vm2, %v10599_v53  ;;  %v10617_v54 = vld [vmem:[#allocation2 + $0x350] sm:$0xff] }
 0x20e   : > { %7278 = vmatprep.mubr.msk.f32.mxu1 %vm857_vm2, %v9760_v10  ;;  %v10623_v10 = vld [vmem:[#allocation2 + $0x368] sm:$0xff] }
 0x210   : > { %7719 = vmatmul.mubr.msk.f32.gmra.mrb[42].mxu0 %vm857_vm2, %v10605_v16 }
 0x211   : > { %7279 = vmatmul.mubr.msk.f32.gmra.mrb[10].mxu1 %vm857_vm2, %v9776_v24  ;;  %7721 = vmatprep.mubr.msk.f32.mxu0 %vm857_vm2, %v10611_v26  ;;  %v10629_v24 = vld [vmem:[#allocation2 + $0x370] sm:$0xff] }
 0x212   : > { %7281 = vmatprep.mubr.msk.f32.mxu1 %vm857_vm2, %v9784_v3  ;;  %v10635_v3 = vld [vmem:[#allocation2 + $0x388] sm:$0xff] }
 0x214   : > { %7722 = vmatmul.mubr.msk.f32.gmra.mrb[44].mxu0 %vm857_vm2, %v10617_v54 }
 0x215   : > { %7282 = vmatmul.mubr.msk.f32.gmra.mrb[12].mxu1 %vm857_vm2, %v9797_v36  ;;  %7724 = vmatprep.mubr.msk.f32.mxu0 %vm857_vm2, %v10623_v10  ;;  %v10641_v36 = vld [vmem:[#allocation2 + $0x390] sm:$0xff] }
 0x216   : > { %7284 = vmatprep.mubr.msk.f32.mxu1 %vm857_vm2, %v9808_v14  ;;  %v12345_v14 = vld [vmem:[#allocation85_spill] sm:$0xff] }
 0x218   : > { %7725 = vmatmul.mubr.msk.f32.gmra.mrb[46].mxu0 %vm857_vm2, %v10629_v24 }
 0x219   : > { %7285 = vmatmul.mubr.msk.f32.gmra.mrb[14].mxu1 %vm857_vm2, %v9824_v30  ;;  %7727 = vmatprep.mubr.msk.f32.mxu0 %vm857_vm2, %v10635_v3  ;;  %v12346_v30 = vld [vmem:[#allocation7_spill] sm:$0xff] }
 0x21a   : > { %7287 = vmatprep.mubr.msk.f32.mxu1 %vm857_vm2, %v9832_v12  ;;  %v12348_v12 = vld [vmem:[#allocation9_spill] sm:$0xff] }
 0x21c   : > { %7728 = vmatmul.mubr.msk.f32.gmra.mrb[48].mxu0 %vm857_vm2, %v10641_v36 }
 0x21d   : > { %7288 = vmatmul.mubr.msk.f32.gmra.mrb[16].mxu1 %vm857_vm2, %v12345_v14  ;;  %7730 = vmatprep.mubr.msk.f32.mxu0 %vm857_vm2, %v10647_v19  ;;  %v12350_v14 = vld [vmem:[#allocation88_spill] sm:$0xff] }
 0x21e   : > { %7290 = vmatprep.mubr.msk.f32.mxu1 %vm857_vm2, %v12346_v30  ;;  %v12352_v30 = vld [vmem:[#allocation89_spill] sm:$0xff] }
 0x220   : > { %7731 = vmatmul.mubr.msk.f32.gmra.mrb[50].mxu0 %vm857_vm2, %v10653_v37  ;;  %v10671_v37 = vld [vmem:[#allocation2 + $0x3e8] sm:$0xff] }
 0x221   : > { %7291 = vmatmul.mubr.msk.f32.gmra.mrb[18].mxu1 %vm857_vm2, %v12348_v12  ;;  %7733 = vmatprep.mubr.msk.f32.mxu0 %vm857_vm2, %v10659_v9  ;;  %12353 = vst [vmem:[#allocation22_spill] sm:$0xff] %v10671_v37  ;;  %v12354_v12 = vld [vmem:[#allocation11_spill] sm:$0xff]  ;;  %v10677_v9 = vld [vmem:[#allocation2 + $0x3f0] sm:$0xff] }
 0x222   : > { %7293 = vmatprep.mubr.msk.f32.mxu1 %vm857_vm2, %v12350_v14  ;;  %12355 = vst [vmem:[#allocation25_spill] sm:$0xff] %v10677_v9  ;;  %v12356_v14 = vld [vmem:[#allocation13_spill] sm:$0xff] }
 0x224   : > { %7734 = vmatmul.mubr.msk.f32.gmra.mrb[52].mxu0 %vm857_vm2, %v10665_v11  ;;  %v10683_v11 = vld [vmem:[#allocation2 + $0x408] sm:$0xff] }
 0x225   : > { %7294 = vmatmul.mubr.msk.f32.gmra.mrb[20].mxu1 %vm857_vm2, %v12352_v30  ;;  %7736 = vmatprep.mubr.msk.f32.mxu0 %vm857_vm2, %v10671_v37  ;;  %12357 = vst [vmem:[#allocation27_spill] sm:$0xff] %v10683_v11  ;;  %v12358_v30 = vld [vmem:[#allocation92_spill] sm:$0xff]  ;;  %v10689_v37 = vld [vmem:[#allocation2 + $0x410] sm:$0xff] }
 0x226   : > { %7296 = vmatprep.mubr.msk.f32.mxu1 %vm857_vm2, %v12354_v12  ;;  %v12359_v12 = vld [vmem:[#allocation95_spill] sm:$0xff] }
 0x228   : > { %7737 = vmatmul.mubr.msk.f32.gmra.mrb[54].mxu0 %vm857_vm2, %v10677_v9  ;;  %v10695_v9 = vld [vmem:[#allocation2 + $0x428] sm:$0xff] }
 0x229   : > { %7297 = vmatmul.mubr.msk.f32.gmra.mrb[22].mxu1 %vm857_vm2, %v12356_v14  ;;  %7739 = vmatprep.mubr.msk.f32.mxu0 %vm857_vm2, %v10683_v11  ;;  %12360 = vst [vmem:[#allocation28_spill] sm:$0xff] %v10695_v9  ;;  %v12361_v14 = vld [vmem:[#allocation15_spill] sm:$0xff]  ;;  %v10701_v11 = vld [vmem:[#allocation2 + $0x430] sm:$0xff] }
 0x22a   : > { %7299 = vmatprep.mubr.msk.f32.mxu1 %vm857_vm2, %v12358_v30  ;;  %v12362_v30 = vld [vmem:[#allocation97_spill] sm:$0xff] }
 0x22c   : > { %7740 = vmatmul.mubr.msk.f32.gmra.mrb[56].mxu0 %vm857_vm2, %v10689_v37 }
 0x22d   : > { %7300 = vmatmul.mubr.msk.f32.gmra.mrb[24].mxu1 %vm857_vm2, %v12359_v12  ;;  %7742 = vmatprep.mubr.msk.f32.mxu0 %vm857_vm2, %v10695_v9  ;;  %v12363_v12 = vld [vmem:[#allocation17_spill] sm:$0xff]  ;;  %v12364_v9 = vld [vmem:[#allocation100_spill] sm:$0xff] }
 0x22e   : > { %7302 = vmatprep.mubr.msk.f32.mxu1 %vm857_vm2, %v12361_v14  ;;  %v5009_v14 = vrot.slane %v10241_v44, 1 }
 0x230   : > { %7743 = vmatmul.mubr.msk.f32.gmra.mrb[58].mxu0 %vm857_vm2, %v10701_v11 }
 0x231   : > { %7303 = vmatmul.mubr.msk.f32.gmra.mrb[26].mxu1 %vm857_vm2, %v12362_v30  ;;  %7745 = vmatprep.mubr.msk.f32.mxu0 %vm857_vm2, %v12301_v35  ;;  %v12365_v35 = vld [vmem:[#allocation23_spill] sm:$0xff]  ;;  %v519_v30 = vld [vmem:[#allocation2 + $0x238] sm:$0xff] }
 0x232   : > { %7305 = vmatprep.mubr.msk.f32.mxu1 %vm857_vm2, %v12363_v12  ;;  %v12393_v12 = vld [vmem:[#allocation60_spill] sm:$0xff] }
 0x234   : > { %7746 = vmatmul.mubr.msk.f32.gmra.mrb[60].mxu0 %vm857_vm2, %v12303_v41  ;;  %v12366_v41 = vld [vmem:[#allocation19_spill] sm:$0xff] }
 0x235   : > { %7306 = vmatmul.mubr.msk.f32.gmra.mrb[28].mxu1 %vm857_vm2, %v12364_v9  ;;  %7748 = vmatprep.mubr.msk.f32.mxu0 %vm857_vm2, %v10392_v34  ;;  %v12392_v9 = vld [vmem:[#allocation58_spill] sm:$0xff] }
 0x236   : > { %7308 = vmatprep.mubr.msk.f32.mxu1 %vm857_vm2, %v10237_v31  ;;  %v12379_v31 = vld [vmem:[#allocation102_spill] sm:$0xff] }
 0x238   : > { %7749 = vmatmul.mubr.msk.f32.gmra.mrb[62].mxu0 %vm857_vm2, %v10407_v15 }
 0x239   : > { %7309 = vmatmul.mubr.msk.f32.gmra.mrb[30].mxu1 %vm857_vm2, %v10254_v22  ;;  %7753 = vmatprep.mubr.msk.f32.mxu0 %vm857_vm2, %v12280_v1  ;;  %v12380_v22 = vld [vmem:[#allocation45_spill] sm:$0xff]  ;;  %v12381_v1 = vld [vmem:[#allocation103_spill] sm:$0xff] }
 0x23a   : > { %7311 = vmatprep.mubr.msk.f32.mxu1 %vm857_vm2, %v12365_v35  ;;  %v5011_v35 = vrot.slane %v519_v30, 1 }
 0x23c   : > { %7754 = vmatmul.mubr.msk.f32.vlgmr.msra.gmra.mrb[0].mxu0 %vm857_vm2, %v12281_v58  ;;  %v12382_v58 = vld [vmem:[#allocation46_spill] sm:$0xff]  ;;  %v5012_v44 = vsel %vm1921_vm4, %v5009_v14, %v5011_v35 }
 0x23d   : > { %7312 = vmatmul.mubr.msk.f32.gmra.mrb[32].mxu1 %vm857_vm2, %v12366_v41  ;;  %7756 = vmatprep.mubr.msk.f32.mxu0 %vm857_vm2, %v12282_v4  ;;  %v12383_v4 = vld [vmem:[#allocation104_spill] sm:$0xff]  ;;  %v12395_v41 = vld [vmem:[#allocation62_spill] sm:$0xff] }
 0x23e   : > { %7314 = vmatprep.mubr.msk.f32.mxu1 %vm857_vm2, %v10036_v38  ;;  %v12367_v38 = vld [vmem:[#allocation20_spill] sm:$0xff] }
 0x240   : > { %7757 = vmatmul.mubr.msk.f32.gmra.mrb[2].mxu0 %vm857_vm2, %v12283_v29  ;;  %v12384_v29 = vld [vmem:[#allocation47_spill] sm:$0xff] }
 0x241   : > { %7315 = vmatmul.mubr.msk.f32.gmra.mrb[34].mxu1 %vm857_vm2, %v10050_v7  ;;  %7759 = vmatprep.mubr.msk.f32.mxu0 %vm857_vm2, %v12284_v6  ;;  %v12368_v7 = vld [vmem:[#allocation39_spill] sm:$0xff]  ;;  %v12385_v6 = vld [vmem:[#allocation105_spill] sm:$0xff] }
 0x242   : > { %7317 = vmatprep.mubr.msk.f32.mxu1 %vm857_vm2, %v10054_v0  ;;  %v12369_v0 = vld [vmem:[#allocation26_spill] sm:$0xff] }
 0x244   : > { %7760 = vmatmul.mubr.msk.f32.gmra.mrb[4].mxu0 %vm857_vm2, %v12285_v28  ;;  %v12386_v28 = vld [vmem:[#allocation48_spill] sm:$0xff] }
 0x245   : > { %7318 = vmatmul.mubr.msk.f32.gmra.mrb[36].mxu1 %vm857_vm2, %v10066_v45  ;;  %7762 = vmatprep.mubr.msk.f32.mxu0 %vm857_vm2, %v12286_v27  ;;  %v12370_v45 = vld [vmem:[#allocation40_spill] sm:$0xff]  ;;  %v12387_v27 = vld [vmem:[#allocation50_spill] sm:$0xff] }
 0x246   : > { %7320 = vmatprep.mubr.msk.f32.mxu1 %vm857_vm2, %v10070_v52  ;;  %v12371_v52 = vld [vmem:[#allocation24_spill] sm:$0xff] }
 0x248   : > { %7763 = vmatmul.mubr.msk.f32.gmra.mrb[6].mxu0 %vm857_vm2, %v12287_v55  ;;  %v12388_v55 = vld [vmem:[#allocation52_spill] sm:$0xff] }
 0x249   : > { %7321 = vmatmul.mubr.msk.f32.gmra.mrb[38].mxu1 %vm857_vm2, %v10082_v60  ;;  %7765 = vmatprep.mubr.msk.f32.mxu0 %vm857_vm2, %v12288_v18  ;;  %v12372_v60 = vld [vmem:[#allocation41_spill] sm:$0xff]  ;;  %v12389_v18 = vld [vmem:[#allocation51_spill] sm:$0xff] }
 0x24a   : > { %7323 = vmatprep.mubr.msk.f32.mxu1 %vm857_vm2, %v10086_v5  ;;  %v12373_v5 = vld [vmem:[#allocation4_spill] sm:$0xff] }
 0x24c   : > { %7766 = vmatmul.mubr.msk.f32.gmra.mrb[8].mxu0 %vm857_vm2, %v12289_v25  ;;  %v12390_v25 = vld [vmem:[#allocation54_spill] sm:$0xff] }
 0x24d   : > { %7324 = vmatmul.mubr.msk.f32.gmra.mrb[40].mxu1 %vm857_vm2, %v10098_v62  ;;  %7768 = vmatprep.mubr.msk.f32.mxu0 %vm857_vm2, %v12290_v42  ;;  %v12374_v62 = vld [vmem:[#allocation42_spill] sm:$0xff]  ;;  %v12391_v42 = vld [vmem:[#allocation56_spill] sm:$0xff] }
 0x24e   : > { %7326 = vmatprep.mubr.msk.f32.mxu1 %vm857_vm2, %v10102_v59  ;;  %v12375_v59 = vld [vmem:[#allocation29_spill] sm:$0xff] }
 0x250   : > { %7769 = vmatmul.mubr.msk.f32.gmra.mrb[10].mxu0 %vm857_vm2, %v12291_v46  ;;  %v12377_v46 = vld [vmem:[#allocation101_spill] sm:$0xff] }
 0x251   : > { %7327 = vmatmul.mubr.msk.f32.gmra.mrb[42].mxu1 %vm857_vm2, %v10114_v63  ;;  %7771 = vmatprep.mubr.msk.f32.mxu0 %vm857_vm2, %v12292_v56  ;;  %v12376_v63 = vld [vmem:[#allocation43_spill] sm:$0xff]  ;;  %v12378_v56 = vld [vmem:[#allocation44_spill] sm:$0xff] }
 0x252   : > { %7329 = vmatprep.mubr.msk.f32.mxu1 %vm857_vm2, %v12367_v38  ;;  %v12396_v38 = vld [vmem:[#allocation61_spill] sm:$0xff] }
 0x254   : > { %7772 = vmatmul.mubr.msk.f32.gmra.mrb[12].mxu0 %vm857_vm2, %v12368_v7  ;;  %v12399_v7 = vld [vmem:[#allocation3_spill] sm:$0xff] }
 0x255   : > { %7330 = vmatmul.mubr.msk.f32.gmra.mrb[44].mxu1 %vm857_vm2, %v12369_v0  ;;  %7774 = vmatprep.mubr.msk.f32.mxu0 %vm857_vm2, %v12370_v45  ;;  %v8432_v0 = vld [vmem:[#allocation2 + $0x268] sm:$0xff]  ;;  %v8433_v45 = vld [vmem:[#allocation2 + $0x270] sm:$0xff] }
 0x256   : > { %7332 = vmatprep.mubr.msk.f32.mxu1 %vm857_vm2, %v12371_v52  ;;  %v12400_v52 = vld [vmem:[#allocation70_spill] sm:$0xff] }
 0x258   : > { %7775 = vmatmul.mubr.msk.f32.gmra.mrb[14].mxu0 %vm857_vm2, %v12372_v60  ;;  %v12421_v60 = vld [vmem:[#allocation12_spill] sm:$0xff] }
 0x259   : > { %7333 = vmatmul.mubr.msk.f32.gmra.mrb[46].mxu1 %vm857_vm2, %v12373_v5  ;;  %7777 = vmatprep.mubr.msk.f32.mxu0 %vm857_vm2, %v12374_v62  ;;  %v12425_v5 = vld [vmem:[#allocation94_spill] sm:$0xff]  ;;  %v12426_v62 = vld [vmem:[#allocation25_spill] sm:$0xff] }
 0x25a   : > { %7335 = vmatprep.mubr.msk.f32.mxu1 %vm857_vm2, %v12375_v59  ;;  %v12427_v59 = vld [vmem:[#allocation96_spill] sm:$0xff] }
 0x25c   : > { %7778 = vmatmul.mubr.msk.f32.gmra.mrb[16].mxu0 %vm857_vm2, %v12376_v63  ;;  %v12428_v63 = vld [vmem:[#allocation27_spill] sm:$0xff] }
 0x25d   : > { %7336 = vmatmul.mubr.msk.f32.gmra.mrb[48].mxu1 %vm857_vm2, %v12377_v46  ;;  %7780 = vmatprep.mubr.msk.f32.mxu0 %vm857_vm2, %v12378_v56  ;;  %v5013_v46 = vrot.slane %v10392_v34, 1  ;;  %v5014_v56 = vrot.slane %v10407_v15, 1  ;;  %v8434_v34 = vld [vmem:[#allocation2 + $0x448] sm:$0xff] }
 0x25e   : > { %7338 = vmatprep.mubr.msk.f32.mxu1 %vm857_vm2, %v12379_v31  ;;  %v591_v31 = vld [vmem:[#allocation2 + $0x478] sm:$0xff] }
 0x260   : > { %7781 = vmatmul.mubr.msk.f32.gmra.mrb[18].mxu0 %vm857_vm2, %v12380_v22  ;;  %v12429_v22 = vld [vmem:[#allocation16_spill] sm:$0xff] }
 0x261   : > { %7339 = vmatmul.mubr.msk.f32.gmra.mrb[50].mxu1 %vm857_vm2, %v12381_v1  ;;  %7783 = vmatprep.mubr.msk.f32.mxu0 %vm857_vm2, %v12382_v58  ;;  %v12430_v1 = vld [vmem:[#allocation98_spill] sm:$0xff]  ;;  %v5016_v58 = vrot.slane %v591_v31, 1 }
 0x262   : > { %7341 = vmatprep.mubr.msk.f32.mxu1 %vm857_vm2, %v12383_v4  ;;  %v12431_v4 = vld [vmem:[#allocation28_spill] sm:$0xff] }
 0x263   : > { %v5017_v15 = vsel %vm1921_vm4, %v5014_v56, %v5016_v58 }
 0x264   : > { %7784 = vmatmul.mubr.msk.f32.gmra.mrb[20].mxu0 %vm857_vm2, %v12384_v29  ;;  %v5015_v29 = vsel %vm1921_vm4, %v5013_v46, %v5014_v56 }
 0x265   : > { %7342 = vmatmul.mubr.msk.f32.gmra.mrb[52].mxu1 %vm857_vm2, %v12385_v6  ;;  %7786 = vmatprep.mubr.msk.f32.mxu0 %vm857_vm2, %v12386_v28  ;;  %v12432_v6 = vld [vmem:[#allocation99_spill] sm:$0xff] }
 0x266   : > { %7344 = vmatprep.mubr.msk.f32.mxu1 %vm857_vm2, %v12387_v27 }
 0x268   : > { %7787 = vmatmul.mubr.msk.f32.gmra.mrb[22].mxu0 %vm857_vm2, %v12306_v49  ;;  %v5008_v49 = vrot.slane %v10220_v32, 1  ;;  %v12397_v32 = vld [vmem:[#allocation106_spill] sm:$0xff] }
 0x269   : > { %7345 = vmatmul.mubr.msk.f32.gmra.mrb[54].mxu1 %vm857_vm2, %v12388_v55  ;;  %7789 = vmatprep.mubr.msk.f32.mxu0 %vm857_vm2, %v12389_v18 }
 0x26a   : > { %7347 = vmatprep.mubr.msk.f32.mxu1 %vm857_vm2, %v12390_v25 }
 0x26c   : > { %7790 = vmatmul.mubr.msk.f32.gmra.mrb[24].mxu0 %vm857_vm2, %v12309_v8  ;;  %v12394_v8 = vld [vmem:[#allocation59_spill] sm:$0xff] }
 0x26d   : > { %7348 = vmatmul.mubr.msk.f32.gmra.mrb[56].mxu1 %vm857_vm2, %v12391_v42  ;;  %7792 = vmatprep.mubr.msk.f32.mxu0 %vm857_vm2, %v12310_v23  ;;  %v5010_v23 = vsel %vm1921_vm4, %v5008_v49, %v5009_v14 }
 0x26e   : > { %7350 = vmatprep.mubr.msk.f32.mxu1 %vm857_vm2, %v12392_v9 }
 0x270   : > { %7793 = vmatmul.mubr.msk.f32.gmra.mrb[26].mxu0 %vm857_vm2, %v12311_v39  ;;  %v12398_v39 = vld [vmem:[#allocation67_spill] sm:$0xff] }
 0x271   : > { %7351 = vmatmul.mubr.msk.f32.gmra.mrb[58].mxu1 %vm857_vm2, %v12393_v12  ;;  %7795 = vmatprep.mubr.msk.f32.mxu0 %vm857_vm2, %v12394_v8 }
 0x272   : > { %7353 = vmatprep.mubr.msk.f32.mxu1 %vm857_vm2, %v12395_v41 }
 0x274   : > { %7796 = vmatmul.mubr.msk.f32.gmra.mrb[28].mxu0 %vm857_vm2, %v12396_v38 }
 0x275   : > { %7354 = vmatmul.mubr.msk.f32.gmra.mrb[60].mxu1 %vm857_vm2, %v12397_v32  ;;  %7798 = vmatprep.mubr.msk.f32.mxu0 %vm857_vm2, %v5010_v23 }
 0x276   : > { %7356 = vmatprep.mubr.msk.f32.mxu1 %vm857_vm2, %v12398_v39 }
 0x278   : > { %7799 = vmatmul.mubr.msk.f32.gmra.mrb[30].mxu0 %vm857_vm2, %v5012_v44 }
 0x279   : > { %7357 = vmatmul.mubr.msk.f32.gmra.mrb[62].mxu1 %vm857_vm2, %v12399_v7  ;;  %7801 = vmatprep.mubr.msk.f32.mxu0 %vm857_vm2, %v12315_v50  ;;  %v12401_v50 = vld [vmem:[#allocation71_spill] sm:$0xff] }
 0x27a   : > { %7409 = vmatprep.mubr.msk.f32.mxu1 %vm857_vm2, %v8432_v0 }
 0x27c   : > { %7802 = vmatmul.mubr.msk.f32.gmra.mrb[32].mxu0 %vm857_vm2, %v12316_v43  ;;  %v12402_v43 = vld [vmem:[#allocation72_spill] sm:$0xff] }
 0x27d   : > { %7410 = vmatmul.mubr.msk.f32.vlgmr.msra.gmra.mrb[32].mxu1 %vm857_vm2, %v8433_v45  ;;  %7804 = vmatprep.mubr.msk.f32.mxu0 %vm857_vm2, %v12317_v13  ;;  %v12403_v13 = vld [vmem:[#allocation73_spill] sm:$0xff] }
 0x27e   : > { %7412 = vmatprep.mubr.msk.f32.mxu1 %vm857_vm2, %v10537_v2  ;;  %v12404_v2 = vld [vmem:[#allocation74_spill] sm:$0xff] }
 0x280   : > { %7805 = vmatmul.mubr.msk.f32.gmra.mrb[34].mxu0 %vm857_vm2, %v12400_v52 }
 0x281   : > { %7413 = vmatmul.mubr.msk.f32.gmra.mrb[34].mxu1 %vm857_vm2, %v10543_v33  ;;  %7807 = vmatprep.mubr.msk.f32.mxu0 %vm857_vm2, %v12401_v50  ;;  %v12405_v33 = vld [vmem:[#allocation75_spill] sm:$0xff] }
 0x282   : > { %7415 = vmatprep.mubr.msk.f32.mxu1 %vm857_vm2, %v10549_v51  ;;  %v12406_v51 = vld [vmem:[#allocation76_spill] sm:$0xff] }
 0x284   : > { %7808 = vmatmul.mubr.msk.f32.gmra.mrb[36].mxu0 %vm857_vm2, %v12402_v43 }
 0x285   : > { %7416 = vmatmul.mubr.msk.f32.gmra.mrb[36].mxu1 %vm857_vm2, %v10557_v17  ;;  %7810 = vmatprep.mubr.msk.f32.mxu0 %vm857_vm2, %v12403_v13  ;;  %v12407_v17 = vld [vmem:[#allocation77_spill] sm:$0xff] }
 0x286   : > { %7418 = vmatprep.mubr.msk.f32.mxu1 %vm857_vm2, %v10563_v21  ;;  %v12408_v21 = vld [vmem:[#allocation78_spill] sm:$0xff] }
 0x288   : > { %7811 = vmatmul.mubr.msk.f32.gmra.mrb[38].mxu0 %vm857_vm2, %v12404_v2 }
 0x289   : > { %7419 = vmatmul.mubr.msk.f32.gmra.mrb[38].mxu1 %vm857_vm2, %v10569_v47  ;;  %7813 = vmatprep.mubr.msk.f32.mxu0 %vm857_vm2, %v12405_v33  ;;  %v12409_v47 = vld [vmem:[#allocation79_spill] sm:$0xff] }
 0x28a   : > { %7421 = vmatprep.mubr.msk.f32.mxu1 %vm857_vm2, %v10575_v20  ;;  %v12410_v20 = vld [vmem:[#allocation80_spill] sm:$0xff] }
 0x28c   : > { %7814 = vmatmul.mubr.msk.f32.gmra.mrb[40].mxu0 %vm857_vm2, %v12406_v51 }
 0x28d   : > { %7422 = vmatmul.mubr.msk.f32.gmra.mrb[40].mxu1 %vm857_vm2, %v10581_v40  ;;  %7816 = vmatprep.mubr.msk.f32.mxu0 %vm857_vm2, %v12407_v17  ;;  %v12411_v40 = vld [vmem:[#allocation81_spill] sm:$0xff] }
 0x28e   : > { %7424 = vmatprep.mubr.msk.f32.mxu1 %vm857_vm2, %v10587_v57  ;;  %v12412_v57 = vld [vmem:[#allocation82_spill] sm:$0xff] }
 0x290   : > { %7817 = vmatmul.mubr.msk.f32.gmra.mrb[42].mxu0 %vm857_vm2, %v12408_v21 }
 0x291   : > { %7425 = vmatmul.mubr.msk.f32.gmra.mrb[42].mxu1 %vm857_vm2, %v10593_v48  ;;  %7819 = vmatprep.mubr.msk.f32.mxu0 %vm857_vm2, %v12409_v47  ;;  %v12413_v48 = vld [vmem:[#allocation83_spill] sm:$0xff] }
 0x292   : > { %7427 = vmatprep.mubr.msk.f32.mxu1 %vm857_vm2, %v10599_v53  ;;  %v12414_v53 = vld [vmem:[#allocation84_spill] sm:$0xff]  ;;  %v11028_v47 = vld [vmem:[%s169_s18] ss:$0 sm:$0xff] }
 0x294   : > { %7820 = vmatmul.mubr.msk.f32.gmra.mrb[44].mxu0 %vm857_vm2, %v12410_v20 }
 0x295   : > { %7428 = vmatmul.mubr.msk.f32.gmra.mrb[44].mxu1 %vm857_vm2, %v10605_v16  ;;  %7822 = vmatprep.mubr.msk.f32.mxu0 %vm857_vm2, %v12411_v40  ;;  %v12415_v16 = vld [vmem:[#allocation86_spill] sm:$0xff] }
 0x296   : > { %7430 = vmatprep.mubr.msk.f32.mxu1 %vm857_vm2, %v10611_v26  ;;  %v12416_v26 = vld [vmem:[#allocation8_spill] sm:$0xff] }
 0x298   : > { %7823 = vmatmul.mubr.msk.f32.gmra.mrb[46].mxu0 %vm857_vm2, %v12412_v57 }
 0x299   : > { %7431 = vmatmul.mubr.msk.f32.gmra.mrb[46].mxu1 %vm857_vm2, %v10617_v54  ;;  %7825 = vmatprep.mubr.msk.f32.mxu0 %vm857_vm2, %v12413_v48  ;;  %v12417_v54 = vld [vmem:[#allocation10_spill] sm:$0xff] }
 0x29a   : > { %7433 = vmatprep.mubr.msk.f32.mxu1 %vm857_vm2, %v10623_v10  ;;  %v12418_v10 = vld [vmem:[#allocation6_spill] sm:$0xff] }
 0x29c   : > { %7826 = vmatmul.mubr.msk.f32.gmra.mrb[48].mxu0 %vm857_vm2, %v12414_v53 }
 0x29d   : > { %7434 = vmatmul.mubr.msk.f32.gmra.mrb[48].mxu1 %vm857_vm2, %v10629_v24  ;;  %7828 = vmatprep.mubr.msk.f32.mxu0 %vm857_vm2, %v12415_v16  ;;  %v12419_v24 = vld [vmem:[#allocation90_spill] sm:$0xff] }
 0x29e   : > { %7436 = vmatprep.mubr.msk.f32.mxu1 %vm857_vm2, %v10635_v3  ;;  %v12420_v3 = vld [vmem:[#allocation18_spill] sm:$0xff] }
 0x2a0   : > { %7829 = vmatmul.mubr.msk.f32.gmra.mrb[50].mxu0 %vm857_vm2, %v12416_v26 }
 0x2a1   : > { %7437 = vmatmul.mubr.msk.f32.gmra.mrb[50].mxu1 %vm857_vm2, %v10641_v36  ;;  %7831 = vmatprep.mubr.msk.f32.mxu0 %vm857_vm2, %v12335_v61  ;;  %v12422_v36 = vld [vmem:[#allocation21_spill] sm:$0xff]  ;;  %v12423_v61 = vld [vmem:[#allocation91_spill] sm:$0xff] }
 0x2a2   : > { %7439 = vmatprep.mubr.msk.f32.mxu1 %vm857_vm2, %v10647_v19  ;;  %v12424_v19 = vld [vmem:[#allocation22_spill] sm:$0xff] }
 0x2a4   : > { %7832 = vmatmul.mubr.msk.f32.gmra.mrb[52].mxu0 %vm857_vm2, %v12417_v54 }
 0x2a5   : > { %7440 = vmatmul.mubr.msk.f32.gmra.mrb[52].mxu1 %vm857_vm2, %v12418_v10  ;;  %7834 = vmatprep.mubr.msk.f32.mxu0 %vm857_vm2, %v12419_v24 }
 0x2a6   : > { %7442 = vmatprep.mubr.msk.f32.mxu1 %vm857_vm2, %v12420_v3 }
 0x2a8   : > { %7835 = vmatmul.mubr.msk.f32.gmra.mrb[54].mxu0 %vm857_vm2, %v12421_v60 }
 0x2a9   : > { %7443 = vmatmul.mubr.msk.f32.gmra.mrb[54].mxu1 %vm857_vm2, %v12422_v36  ;;  %7837 = vmatprep.mubr.msk.f32.mxu0 %vm857_vm2, %v12423_v61 }
 0x2aa   : > { %7445 = vmatprep.mubr.msk.f32.mxu1 %vm857_vm2, %v12424_v19 }
 0x2ac   : > { %7838 = vmatmul.mubr.msk.f32.gmra.mrb[56].mxu0 %vm857_vm2, %v12425_v5 }
 0x2ad   : > { %7446 = vmatmul.mubr.msk.f32.gmra.mrb[56].mxu1 %vm857_vm2, %v12426_v62  ;;  %7840 = vmatprep.mubr.msk.f32.mxu0 %vm857_vm2, %v12427_v59 }
 0x2ae   : > { %7448 = vmatprep.mubr.msk.f32.mxu1 %vm857_vm2, %v12428_v63 }
 0x2b0   : > { %7841 = vmatmul.mubr.msk.f32.gmra.mrb[58].mxu0 %vm857_vm2, %v12429_v22 }
 0x2b1   : > { %7449 = vmatmul.mubr.msk.f32.gmra.mrb[58].mxu1 %vm857_vm2, %v10689_v37  ;;  %7843 = vmatprep.mubr.msk.f32.mxu0 %vm857_vm2, %v12430_v1  ;;  %v8435_v37 = vld [vmem:[#allocation2 + $0x450] sm:$0xff] }
 0x2b2   : > { %7451 = vmatprep.mubr.msk.f32.mxu1 %vm857_vm2, %v12431_v4 }
 0x2b4   : > { %7844 = vmatmul.mubr.msk.f32.gmra.mrb[60].mxu0 %vm857_vm2, %v12432_v6 }
 0x2b5   : > { %7452 = vmatmul.mubr.msk.f32.gmra.mrb[60].mxu1 %vm857_vm2, %v10701_v11  ;;  %7846 = vmatprep.mubr.msk.f32.mxu0 %vm857_vm2, %v5015_v29 }
 0x2b6   : > { %7454 = vmatprep.mubr.msk.f32.mxu1 %vm857_vm2, %v8434_v34 }
 0x2b8   : > { %7847 = vmatmul.mubr.msk.f32.gmra.mrb[62].mxu0 %vm857_vm2, %v5017_v15 }
 0x2b9   : > { %7455 = vmatmul.mubr.msk.f32.gmra.mrb[62].mxu1 %vm857_vm2, %v8435_v37 }
 0x2d0   : > { %v7265_v28 = vpop.f32.mrb[0].mxu1 }
 0x2d1   : > { %v2755_v27 = vpop.f32.mrb[1].mxu1 }
 0x2d4   : > { %v7268_v55 = vpop.f32.mrb[2].mxu1 }
 0x2d5   : > { %v2765_v18 = vpop.f32.mrb[3].mxu1 }
 0x2d8   : > { %v7271_v25 = vpop.f32.mrb[4].mxu1 }
 0x2d9   : > { %v2775_v42 = vpop.f32.mrb[5].mxu1 }
 0x2dc   : > { %v7274_v9 = vpop.f32.mrb[6].mxu1 }
 0x2dd   : > { %v2785_v11 = vpop.f32.mrb[7].mxu1 }
 0x2e0   : > { %v7277_v49 = vpop.f32.mrb[8].mxu1 }
 0x2e1   : > { %v2795_v14 = vpop.f32.mrb[9].mxu1 }
 0x2e4   : > { %v10979_v30 = vpop.f32.mrb[10].mxu1 }
 0x2e5   : > { %v10981_v12 = vpop.f32.mrb[11].mxu1 }
 0x2e8   : > { %v10983_v8 = vpop.f32.mrb[12].mxu1 }
 0x2e9   : > { %v10985_v35 = vpop.f32.mrb[13].mxu1 }
 0x2ec   : > { %v10987_v41 = vpop.f32.mrb[14].mxu1 }
 0x2ed   : > { %v10989_v23 = vpop.f32.mrb[15].mxu1 }
 0x2f0   : > { %v10991_v38 = vpop.f32.mrb[16].mxu1 }
 0x2f1   : > { %v10993_v32 = vpop.f32.mrb[17].mxu1 }
 0x2f4   : > { %v10995_v44 = vpop.f32.mrb[18].mxu1 }
 0x2f5   : > { %v10997_v39 = vpop.f32.mrb[19].mxu1 }
 0x2f8   : > { %v10999_v7 = vpop.f32.mrb[20].mxu1 }
 0x2f9   : > { %v11001_v0 = vpop.f32.mrb[21].mxu1 }
 0x2fc   : > { %v11003_v45 = vpop.f32.mrb[22].mxu1 }
 0x2fd   : > { %v11005_v52 = vpop.f32.mrb[23].mxu1 }
 0x300   : > { %v11007_v50 = vpop.f32.mrb[24].mxu1 }
 0x301   : > { %v11009_v43 = vpop.f32.mrb[25].mxu1 }
 0x304   : > { %v11011_v13 = vpop.f32.mrb[26].mxu1 }
 0x305   : > { %v11013_v2 = vpop.f32.mrb[27].mxu1 }
 0x308   : > { %v11015_v33 = vpop.f32.mrb[28].mxu1 }
 0x309   : > { %v11017_v51 = vpop.f32.mrb[29].mxu1 }
 0x30c   : > { %v11019_v17 = vpop.f32.mrb[30].mxu1 }
 0x30d   : > { %v11021_v21 = vpop.f32.mrb[31].mxu1 }
 0x30f   : > { %v7755_v20 = vpop.f32.mrb[0].mxu0 }
 0x310   : > { %v7851_v40 = vadd.f32 %v7755_v20, %v7265_v28  ;;  %v5095_v57 = vpop.f32.mrb[1].mxu0 }
 0x311   : > { %v7852_v48 = vadd.f32 %v5095_v57, %v2755_v27 }
 0x312   : > { %v11031_v53 = vadd.f32 %v7851_v40, %v11028_v47 }
 0x313   : > { %v11034_v16 = vadd.f32 %v7852_v48, %v11028_v47  ;;  %v7758_v26 = vpop.f32.mrb[2].mxu0 }
 0x314   : > { %v7853_v10 = vadd.f32 %v7758_v26, %v7268_v55  ;;  %v5105_v24 = vpop.f32.mrb[3].mxu0 }
 0x315   : > { %v7854_v60 = vadd.f32 %v5105_v24, %v2765_v18 }
 0x316   : > { %v11039_v36 = vadd.f32 %v7853_v10, %v11028_v47 }
 0x317   : > { %v11042_v61 = vadd.f32 %v7854_v60, %v11028_v47  ;;  %v7761_v19 = vpop.f32.mrb[4].mxu0 }
 0x318   : > { %v7855_v62 = vadd.f32 %v7761_v19, %v7271_v25  ;;  %v5115_v59 = vpop.f32.mrb[5].mxu0 }
 0x319   : > { %v7856_v46 = vadd.f32 %v5115_v59, %v2775_v42 }
 0x31a   : > { %v11047_v56 = vadd.f32 %v7855_v62, %v11028_v47 }
 0x31b   : > { %v11050_v31 = vadd.f32 %v7856_v46, %v11028_v47  ;;  %v7764_v22 = vpop.f32.mrb[6].mxu0 }
 0x31c   : > { %v7857_v58 = vadd.f32 %v7764_v22, %v7274_v9  ;;  %v5125_v4 = vpop.f32.mrb[7].mxu0 }
 0x31d   : > { %v7858_v6 = vadd.f32 %v5125_v4, %v2785_v11 }
 0x31e   : > { %v11055_v15 = vadd.f32 %v7857_v58, %v11028_v47 }
 0x31f   : > { %v11058_v34 = vadd.f32 %v7858_v6, %v11028_v47  ;;  %v7767_v37 = vpop.f32.mrb[8].mxu0 }
 0x320   : > { %v7859_v27 = vadd.f32 %v7767_v37, %v7277_v49  ;;  %v5135_v55 = vpop.f32.mrb[9].mxu0 }
 0x321   : > { %v7860_v25 = vadd.f32 %v5135_v55, %v2795_v14 }
 0x322   : > { %v11063_v42 = vadd.f32 %v7859_v27, %v11028_v47 }
 0x323   : > { %v11066_v9 = vadd.f32 %v7860_v25, %v11028_v47  ;;  %v7770_v11 = vpop.f32.mrb[10].mxu0 }
 0x324   : > { %v7861_v40 = vadd.f32 %v7770_v11, %v10979_v30  ;;  %v5145_v57 = vpop.f32.mrb[11].mxu0 }
 0x325   : > { %v7862_v49 = vadd.f32 %v5145_v57, %v10981_v12 }
 0x326   : > { %v11073_v26 = vadd.f32 %v7861_v40, %v11028_v47 }
 0x327   : > { %v11076_v14 = vadd.f32 %v7862_v49, %v11028_v47  ;;  %v7773_v10 = vpop.f32.mrb[12].mxu0 }
 0x328   : > { %v7863_v60 = vadd.f32 %v7773_v10, %v10983_v8  ;;  %v5155_v19 = vpop.f32.mrb[13].mxu0 }
 0x329   : > { %v7864_v30 = vadd.f32 %v5155_v19, %v10985_v35 }
 0x32a   : > { %v11083_v59 = vadd.f32 %v7863_v60, %v11028_v47 }
 0x32b   : > { %v11086_v12 = vadd.f32 %v7864_v30, %v11028_v47  ;;  %v7776_v46 = vpop.f32.mrb[14].mxu0 }
 0x32c   : > { %v7865_v58 = vadd.f32 %v7776_v46, %v10987_v41  ;;  %v5165_v4 = vpop.f32.mrb[15].mxu0 }
 0x32d   : > { %v7866_v8 = vadd.f32 %v5165_v4, %v10989_v23 }
 0x32e   : > { %v11093_v37 = vadd.f32 %v7865_v58, %v11028_v47 }
 0x32f   : > { %v11096_v35 = vadd.f32 %v7866_v8, %v11028_v47  ;;  %v7779_v27 = vpop.f32.mrb[16].mxu0 }
 0x330   : > { %v7867_v25 = vadd.f32 %v7779_v27, %v10991_v38  ;;  %v5175_v11 = vpop.f32.mrb[17].mxu0 }
 0x331   : > { %v7868_v41 = vadd.f32 %v5175_v11, %v10993_v32 }
 0x332   : > { %v11103_v57 = vadd.f32 %v7867_v25, %v11028_v47 }
 0x333   : > { %v11106_v23 = vadd.f32 %v7868_v41, %v11028_v47  ;;  %v7782_v49 = vpop.f32.mrb[18].mxu0 }
 0x334   : > { %v7869_v60 = vadd.f32 %v7782_v49, %v10995_v44  ;;  %v5185_v19 = vpop.f32.mrb[19].mxu0 }
 0x335   : > { %v7870_v38 = vadd.f32 %v5185_v19, %v10997_v39 }
 0x336   : > { %v11113_v46 = vadd.f32 %v7869_v60, %v11028_v47 }
 0x337   : > { %v11116_v32 = vadd.f32 %v7870_v38, %v11028_v47  ;;  %v7785_v58 = vpop.f32.mrb[20].mxu0 }
 0x338   : > { %v7871_v8 = vadd.f32 %v7785_v58, %v10999_v7  ;;  %v5195_v27 = vpop.f32.mrb[21].mxu0 }
 0x339   : > { %v7872_v44 = vadd.f32 %v5195_v27, %v11001_v0 }
 0x33a   : > { %v11123_v11 = vadd.f32 %v7871_v8, %v11028_v47 }
 0x33b   : > { %v11126_v39 = vadd.f32 %v7872_v44, %v11028_v47  ;;  %v7788_v41 = vpop.f32.mrb[22].mxu0 }
 0x33c   : > { %v7873_v60 = vadd.f32 %v7788_v41, %v11003_v45  ;;  %v5205_v19 = vpop.f32.mrb[23].mxu0 }
 0x33d   : > { %v7874_v7 = vadd.f32 %v5205_v19, %v11005_v52 }
 0x33e   : > { %v11133_v58 = vadd.f32 %v7873_v60, %v11028_v47 }
 0x33f   : > { %v11136_v0 = vadd.f32 %v7874_v7, %v11028_v47  ;;  %v7791_v8 = vpop.f32.mrb[24].mxu0 }
 0x340   : > { %v7875_v44 = vadd.f32 %v7791_v8, %v11007_v50  ;;  %v5215_v4 = vpop.f32.mrb[25].mxu0 }
 0x341   : > { %v7876_v45 = vadd.f32 %v5215_v4, %v11009_v43 }
 0x342   : > { %v11143_v41 = vadd.f32 %v7875_v44, %v11028_v47 }
 0x343   : > { %v11146_v52 = vadd.f32 %v7876_v45, %v11028_v47  ;;  %v7794_v60 = vpop.f32.mrb[26].mxu0 }
 0x344   : > { %v7877_v7 = vadd.f32 %v7794_v60, %v11011_v13  ;;  %v5225_v38 = vpop.f32.mrb[27].mxu0 }
 0x345   : > { %v7878_v50 = vadd.f32 %v5225_v38, %v11013_v2 }
 0x346   : > { %v11153_v8 = vadd.f32 %v7877_v7, %v11028_v47 }
 0x347   : > { %v11156_v43 = vadd.f32 %v7878_v50, %v11028_v47  ;;  %v7797_v4 = vpop.f32.mrb[28].mxu0 }
 0x348   : > { %v7879_v45 = vadd.f32 %v7797_v4, %v11015_v33  ;;  %v5235_v49 = vpop.f32.mrb[29].mxu0 }
 0x349   : > { %v7880_v13 = vadd.f32 %v5235_v49, %v11017_v51 }
 0x34a   : > { %v11163_v60 = vadd.f32 %v7879_v45, %v11028_v47 }
 0x34b   : > { %v11166_v2 = vadd.f32 %v7880_v13, %v11028_v47  ;;  %v7800_v38 = vpop.f32.mrb[30].mxu0 }
 0x34c   : > { %v7881_v50 = vadd.f32 %v7800_v38, %v11019_v17  ;;  %v5245_v27 = vpop.f32.mrb[31].mxu0 }
 0x34d   : > { %v7882_v33 = vadd.f32 %v5245_v27, %v11021_v21 }
 0x34e   : > { %v11173_v4 = vadd.f32 %v7881_v50, %v11028_v47 }
 0x34f   : > { %v11176_v51 = vadd.f32 %v7882_v33, %v11028_v47  ;;  %v7803_v49 = vpop.f32.mrb[32].mxu0 }
 0x350   : > { %v5255_v13 = vpop.f32.mrb[33].mxu0  ;;  %v7411_v19 = vpop.f32.mrb[32].mxu1 }
 0x351   : > { %v7883_v25 = vadd.f32 %v7803_v49, %v7411_v19  ;;  %v3375_v17 = vpop.f32.mrb[33].mxu1 }
 0x352   : > { %v7884_v38 = vadd.f32 %v5255_v13, %v3375_v17 }
 0x353   : > { %v11181_v44 = vadd.f32 %v7883_v25, %v11028_v47  ;;  %v7806_v21 = vpop.f32.mrb[34].mxu0 }
 0x354   : > { %v11184_v27 = vadd.f32 %v7884_v38, %v11028_v47  ;;  %v5265_v50 = vpop.f32.mrb[35].mxu0  ;;  %v7414_v33 = vpop.f32.mrb[34].mxu1 }
 0x355   : > { %v7885_v30 = vadd.f32 %v7806_v21, %v7414_v33  ;;  %v3385_v45 = vpop.f32.mrb[35].mxu1 }
 0x356   : > { %v7886_v40 = vadd.f32 %v5265_v50, %v3385_v45 }
 0x357   : > { %v11189_v19 = vadd.f32 %v7885_v30, %v11028_v47  ;;  %v7809_v49 = vpop.f32.mrb[36].mxu0 }
 0x358   : > { %v11192_v25 = vadd.f32 %v7886_v40, %v11028_v47  ;;  %v5275_v13 = vpop.f32.mrb[37].mxu0  ;;  %v7417_v17 = vpop.f32.mrb[36].mxu1 }
 0x359   : > { %v7887_v7 = vadd.f32 %v7809_v49, %v7417_v17  ;;  %v3395_v22 = vpop.f32.mrb[37].mxu1 }
 0x35a   : > { %v7888_v21 = vadd.f32 %v5275_v13, %v3395_v22 }
 0x35b   : > { %v11197_v33 = vadd.f32 %v7887_v7, %v11028_v47  ;;  %v7812_v45 = vpop.f32.mrb[38].mxu0 }
 0x35c   : > { %v11200_v30 = vadd.f32 %v7888_v21, %v11028_v47  ;;  %v5285_v50 = vpop.f32.mrb[39].mxu0  ;;  %v7420_v55 = vpop.f32.mrb[38].mxu1 }
 0x35d   : > { %v7889_v6 = vadd.f32 %v7812_v45, %v7420_v55  ;;  %v3405_v24 = vpop.f32.mrb[39].mxu1 }
 0x35e   : > { %v7890_v49 = vadd.f32 %v5285_v50, %v3405_v24 }
 0x35f   : > { %v11205_v17 = vadd.f32 %v7889_v6, %v11028_v47  ;;  %v7815_v22 = vpop.f32.mrb[40].mxu0 }
 0x360   : > { %v11208_v7 = vadd.f32 %v7890_v49, %v11028_v47  ;;  %v5295_v13 = vpop.f32.mrb[41].mxu0  ;;  %v7423_v10 = vpop.f32.mrb[40].mxu1 }
 0x361   : > { %v7891_v62 = vadd.f32 %v7815_v22, %v7423_v10  ;;  %v3415_v20 = vpop.f32.mrb[41].mxu1 }
 0x362   : > { %v7892_v55 = vadd.f32 %v5295_v13, %v3415_v20 }
 0x363   : > { %v11213_v45 = vadd.f32 %v7891_v62, %v11028_v47  ;;  %v7818_v24 = vpop.f32.mrb[42].mxu0 }
 0x364   : > { %v11216_v6 = vadd.f32 %v7892_v55, %v11028_v47  ;;  %v5305_v50 = vpop.f32.mrb[43].mxu0  ;;  %v7426_v38 = vpop.f32.mrb[42].mxu1 }
 0x365   : > { %v7893_v48 = vadd.f32 %v7818_v24, %v7426_v38  ;;  %v3425_v28 = vpop.f32.mrb[43].mxu1 }
 0x366   : > { %v7894_v10 = vadd.f32 %v5305_v50, %v3425_v28 }
 0x367   : > { %v11221_v22 = vadd.f32 %v7893_v48, %v11028_v47  ;;  %v7821_v20 = vpop.f32.mrb[44].mxu0 }
 0x368   : > { %v11224_v62 = vadd.f32 %v7894_v10, %v11028_v47  ;;  %v5315_v13 = vpop.f32.mrb[45].mxu0  ;;  %v7429_v40 = vpop.f32.mrb[44].mxu1 }
 0x369   : > { %v7895_v18 = vadd.f32 %v7821_v20, %v7429_v40  ;;  %v3435_v1 = vpop.f32.mrb[45].mxu1 }
 0x36a   : > { %v7896_v38 = vadd.f32 %v5315_v13, %v3435_v1 }
 0x36b   : > { %v11229_v24 = vadd.f32 %v7895_v18, %v11028_v47  ;;  %v7824_v28 = vpop.f32.mrb[46].mxu0 }
 0x36c   : > { %v11232_v48 = vadd.f32 %v7896_v38, %v11028_v47  ;;  %v5325_v50 = vpop.f32.mrb[47].mxu0  ;;  %v7432_v21 = vpop.f32.mrb[46].mxu1 }
 0x36d   : > { %12433 = vst [vmem:[#allocation30_spill] sm:$0xff] %v11229_v24  ;;  %v7897_v29 = vadd.f32 %v7824_v28, %v7432_v21  ;;  %v3445_v5 = vpop.f32.mrb[47].mxu1 }
 0x36e   : > { %v7898_v40 = vadd.f32 %v5325_v50, %v3445_v5 }
 0x36f   : > { %v11237_v20 = vadd.f32 %v7897_v29, %v11028_v47  ;;  %v7827_v1 = vpop.f32.mrb[48].mxu0 }
 0x370   : > { %v11240_v18 = vadd.f32 %v7898_v40, %v11028_v47  ;;  %v5335_v13 = vpop.f32.mrb[49].mxu0  ;;  %v7435_v49 = vpop.f32.mrb[48].mxu1 }
 0x371   : > { %12434 = vst [vmem:[#allocation31_spill] sm:$0xff] %v11237_v20  ;;  %v7899_v63 = vadd.f32 %v7827_v1, %v7435_v49  ;;  %v3455_v54 = vpop.f32.mrb[49].mxu1 }
 0x372   : > { %12435 = vst [vmem:[#allocation32_spill] sm:$0xff] %v11240_v18  ;;  %v7900_v21 = vadd.f32 %v5335_v13, %v3455_v54 }
 0x373   : > { %v11245_v28 = vadd.f32 %v7899_v63, %v11028_v47  ;;  %v7830_v5 = vpop.f32.mrb[50].mxu0 }
 0x374   : > { %v11248_v29 = vadd.f32 %v7900_v21, %v11028_v47  ;;  %v5345_v50 = vpop.f32.mrb[51].mxu0  ;;  %v7438_v55 = vpop.f32.mrb[50].mxu1 }
 0x375   : > { %12436 = vst [vmem:[#allocation33_spill] sm:$0xff] %v11245_v28  ;;  %v7901_v3 = vadd.f32 %v7830_v5, %v7438_v55  ;;  %v3465_v24 = vpop.f32.mrb[51].mxu1 }
 0x376   : > { %12437 = vst [vmem:[#allocation34_spill] sm:$0xff] %v11248_v29  ;;  %v7902_v49 = vadd.f32 %v5345_v50, %v3465_v24 }
 0x377   : > { %v11253_v1 = vadd.f32 %v7901_v3, %v11028_v47  ;;  %v7833_v54 = vpop.f32.mrb[52].mxu0 }
 0x378   : > { %v11256_v63 = vadd.f32 %v7902_v49, %v11028_v47  ;;  %v5355_v13 = vpop.f32.mrb[53].mxu0  ;;  %v7441_v10 = vpop.f32.mrb[52].mxu1 }
 0x379   : > { %12438 = vst [vmem:[#allocation35_spill] sm:$0xff] %v11253_v1  ;;  %v7903_v20 = vadd.f32 %v7833_v54, %v7441_v10  ;;  %v3475_v18 = vpop.f32.mrb[53].mxu1 }
 0x37a   : > { %12439 = vst [vmem:[#allocation36_spill] sm:$0xff] %v11256_v63  ;;  %v7904_v55 = vadd.f32 %v5355_v13, %v3475_v18 }
 0x37b   : > { %v11261_v5 = vadd.f32 %v7903_v20, %v11028_v47  ;;  %v7836_v24 = vpop.f32.mrb[54].mxu0 }
 0x37c   : > { %v11264_v3 = vadd.f32 %v7904_v55, %v11028_v47  ;;  %v5365_v50 = vpop.f32.mrb[55].mxu0  ;;  %v7444_v38 = vpop.f32.mrb[54].mxu1 }
 0x37d   : > { %12440 = vst [vmem:[#allocation37_spill] sm:$0xff] %v11261_v5  ;;  %v7905_v28 = vadd.f32 %v7836_v24, %v7444_v38  ;;  %v3485_v29 = vpop.f32.mrb[55].mxu1 }
 0x37e   : > { %12441 = vst [vmem:[#allocation38_spill] sm:$0xff] %v11264_v3  ;;  %v7906_v10 = vadd.f32 %v5365_v50, %v3485_v29 }
 0x37f   : > { %v11269_v54 = vadd.f32 %v7905_v28, %v11028_v47  ;;  %v7839_v18 = vpop.f32.mrb[56].mxu0 }
 0x380   : > { %v11272_v20 = vadd.f32 %v7906_v10, %v11028_v47  ;;  %v5375_v13 = vpop.f32.mrb[57].mxu0  ;;  %v7447_v40 = vpop.f32.mrb[56].mxu1 }
 0x381   : > { %12442 = vst [vmem:[#allocation14_spill] sm:$0xff] %v11269_v54  ;;  %v7907_v1 = vadd.f32 %v7839_v18, %v7447_v40  ;;  %v3495_v63 = vpop.f32.mrb[57].mxu1 }
 0x382   : > { %12443 = vst [vmem:[#allocation93_spill] sm:$0xff] %v11272_v20  ;;  %v7908_v38 = vadd.f32 %v5375_v13, %v3495_v63 }
 0x383   : > { %v11277_v24 = vadd.f32 %v7907_v1, %v11028_v47  ;;  %v7842_v29 = vpop.f32.mrb[58].mxu0 }
 0x384   : > { %v11280_v28 = vadd.f32 %v7908_v38, %v11028_v47  ;;  %v5385_v50 = vpop.f32.mrb[59].mxu0  ;;  %v7450_v21 = vpop.f32.mrb[58].mxu1 }
 0x385   : > { %12444 = vst [vmem:[#allocation49_spill] sm:$0xff] %v11277_v24  ;;  %v7909_v5 = vadd.f32 %v7842_v29, %v7450_v21  ;;  %v3505_v3 = vpop.f32.mrb[59].mxu1 }
 0x386   : > { %12445 = vst [vmem:[#allocation53_spill] sm:$0xff] %v11280_v28  ;;  %v7910_v40 = vadd.f32 %v5385_v50, %v3505_v3 }
 0x387   : > { %v11285_v18 = vadd.f32 %v7909_v5, %v11028_v47  ;;  %v7845_v63 = vpop.f32.mrb[60].mxu0 }
 0x388   : > { %v11288_v1 = vadd.f32 %v7910_v40, %v11028_v47  ;;  %v5395_v13 = vpop.f32.mrb[61].mxu0  ;;  %v7453_v49 = vpop.f32.mrb[60].mxu1 }
 0x389   : > { %v7911_v54 = vadd.f32 %v7845_v63, %v7453_v49  ;;  %v3515_v20 = vpop.f32.mrb[61].mxu1 }
 0x38a   : > { %v5606_v10 = vmax.f32 %v11288_v1, 0.0  ;;  %v7912_v21 = vadd.f32 %v5395_v13, %v3515_v20  ;;  %5615 = sbr.rel (%p6378_p5) target bundleno = 942 (0x3ae), region = 40 }
 0x38b   : > { %v11293_v29 = vadd.f32 %v7911_v54, %v11028_v47  ;;  %v7848_v3 = vpop.f32.mrb[62].mxu0 }
 0x38c   : > { %v11296_v5 = vadd.f32 %v7912_v21, %v11028_v47  ;;  %v5405_v50 = vpop.f32.mrb[63].mxu0  ;;  %v7456_v55 = vpop.f32.mrb[62].mxu1  ;;  %v12446_v21 = vmax.f32 (!%p6378_p5), %v11034_v16, 0.0  ;;  %5675 = vst.msk [vmem:[#allocation2 + $0x408] sm:$0xff] (!%p6378_p5), %vm857_vm2, %v5606_v10 }
 0x38d   : > { %v7913_v24 = vadd.f32 %v7848_v3, %v7456_v55  ;;  %v3525_v28 = vpop.f32.mrb[63].mxu1  ;;  %v12447_v55 = vmax.f32 (!%p6378_p5), %v11031_v53, 0.0  ;;  %v12451_v3 = vmax.f32 (!%p6378_p5), %v11047_v56, 0.0 }
 0x38e   : > { %v5608_v38 = vmax.f32 %v11296_v5, 0.0  ;;  %v7914_v49 = vadd.f32 %v5405_v50, %v3525_v28  ;;  %5617 = vst.msk [vmem:[#allocation2 + $0x28] sm:$0xff] (!%p6378_p5), %vm857_vm2, %v12446_v21  ;;  %v12450_v28 = vmax.f32 (!%p6378_p5), %v11050_v31, 0.0  ;;  %v12452_v50 = vmax.f32 (!%p6378_p5), %v11058_v34, 0.0 }
 0x38f   : > { %v11301_v63 = vadd.f32 %v7913_v24, %v11028_v47  ;;  %5618 = vst.msk [vmem:[#allocation2 + $0x30] sm:$0xff] (!%p6378_p5), %vm857_vm2, %v12447_v55  ;;  %v12448_v24 = vmax.f32 (!%p6378_p5), %v11042_v61, 0.0  ;;  %5622 = vst.msk [vmem:[#allocation2 + $0x70] sm:$0xff] (!%p6378_p5), %vm857_vm2, %v12451_v3  ;;  %v12454_v21 = vmax.f32 (!%p6378_p5), %v11066_v9, 0.0  ;;  %v12455_v55 = vmax.f32 (!%p6378_p5), %v11063_v42, 0.0 }
 0x390   : > { %v11304_v20 = vadd.f32 %v7914_v49, %v11028_v47  ;;  %v12449_v47 = vmax.f32 (!%p6378_p5), %v11039_v36, 0.0  ;;  %5621 = vst.msk [vmem:[#allocation2 + $0x68] sm:$0xff] (!%p6378_p5), %vm857_vm2, %v12450_v28  ;;  %5623 = vst.msk [vmem:[#allocation2 + $0x88] sm:$0xff] (!%p6378_p5), %vm857_vm2, %v12452_v50  ;;  %v12453_v49 = vmax.f32 (!%p6378_p5), %v11055_v15, 0.0  ;;  %v12458_v28 = vmax.f32 (!%p6378_p5), %v11086_v12, 0.0 }
 0x391   : > { %5619 = vst.msk [vmem:[#allocation2 + $0x48] sm:$0xff] %vm857_vm2, %v12448_v24  ;;  %5625 = vst.msk [vmem:[#allocation2 + $0xa8] sm:$0xff] %vm857_vm2, %v12454_v21  ;;  %v12456_v24 = vmax.f32 %v11076_v14, 0.0  ;;  %v12459_v3 = vmax.f32 %v11083_v59, 0.0  ;;  %v12460_v50 = vmax.f32 %v11096_v35, 0.0  ;;  %v12462_v21 = vmax.f32 %v11106_v23, 0.0 }
 0x392   : > { %5620 = vst.msk [vmem:[#allocation2 + $0x50] sm:$0xff] %vm857_vm2, %v12449_v47  ;;  %5624 = vst.msk [vmem:[#allocation2 + $0x90] sm:$0xff] %vm857_vm2, %v12453_v49  ;;  %v12457_v47 = vmax.f32 %v11073_v26, 0.0  ;;  %v12461_v49 = vmax.f32 %v11093_v37, 0.0 }
 0x393   : > { %5626 = vst.msk [vmem:[#allocation2 + $0xb0] sm:$0xff] %vm857_vm2, %v12455_v55  ;;  %5627 = vst.msk [vmem:[#allocation2 + $0xc8] sm:$0xff] %vm857_vm2, %v12456_v24  ;;  %v12463_v55 = vmax.f32 %v11103_v57, 0.0  ;;  %v12464_v24 = vmax.f32 %v11116_v32, 0.0 }
 0x394   : > { %5628 = vst.msk [vmem:[#allocation2 + $0xd0] sm:$0xff] %vm857_vm2, %v12457_v47  ;;  %5629 = vst.msk [vmem:[#allocation2 + $0xe8] sm:$0xff] %vm857_vm2, %v12458_v28  ;;  %v12465_v47 = vmax.f32 %v11113_v46, 0.0  ;;  %v12466_v28 = vmax.f32 %v11126_v39, 0.0 }
 0x395   : > { %5630 = vst.msk [vmem:[#allocation2 + $0xf0] sm:$0xff] %vm857_vm2, %v12459_v3  ;;  %5631 = vst.msk [vmem:[#allocation2 + $0x108] sm:$0xff] %vm857_vm2, %v12460_v50  ;;  %v12467_v3 = vmax.f32 %v11123_v11, 0.0  ;;  %v12468_v50 = vmax.f32 %v11136_v0, 0.0 }
 0x396   : > { %5632 = vst.msk [vmem:[#allocation2 + $0x110] sm:$0xff] %vm857_vm2, %v12461_v49  ;;  %5633 = vst.msk [vmem:[#allocation2 + $0x128] sm:$0xff] %vm857_vm2, %v12462_v21  ;;  %v12469_v49 = vmax.f32 %v11133_v58, 0.0  ;;  %v12470_v21 = vmax.f32 %v11146_v52, 0.0 }
 0x397   : > { %5634 = vst.msk [vmem:[#allocation2 + $0x130] sm:$0xff] %vm857_vm2, %v12463_v55  ;;  %5635 = vst.msk [vmem:[#allocation2 + $0x148] sm:$0xff] %vm857_vm2, %v12464_v24  ;;  %v12471_v55 = vmax.f32 %v11143_v41, 0.0  ;;  %v12472_v24 = vmax.f32 %v11156_v43, 0.0 }
 0x398   : > { %5636 = vst.msk [vmem:[#allocation2 + $0x150] sm:$0xff] %vm857_vm2, %v12465_v47  ;;  %5637 = vst.msk [vmem:[#allocation2 + $0x168] sm:$0xff] %vm857_vm2, %v12466_v28  ;;  %v12473_v47 = vmax.f32 %v11153_v8, 0.0  ;;  %v12474_v28 = vmax.f32 %v11166_v2, 0.0 }
 0x399   : > { %5638 = vst.msk [vmem:[#allocation2 + $0x170] sm:$0xff] %vm857_vm2, %v12467_v3  ;;  %5639 = vst.msk [vmem:[#allocation2 + $0x188] sm:$0xff] %vm857_vm2, %v12468_v50  ;;  %v12475_v3 = vmax.f32 %v11163_v60, 0.0  ;;  %v12476_v50 = vmax.f32 %v11176_v51, 0.0 }
 0x39a   : > { %5640 = vst.msk [vmem:[#allocation2 + $0x190] sm:$0xff] %vm857_vm2, %v12469_v49  ;;  %5641 = vst.msk [vmem:[#allocation2 + $0x1a8] sm:$0xff] %vm857_vm2, %v12470_v21  ;;  %v12477_v49 = vmax.f32 %v11173_v4, 0.0  ;;  %v12478_v21 = vmax.f32 %v11184_v27, 0.0 }
 0x39b   : > { %5642 = vst.msk [vmem:[#allocation2 + $0x1b0] sm:$0xff] %vm857_vm2, %v12471_v55  ;;  %5643 = vst.msk [vmem:[#allocation2 + $0x1c8] sm:$0xff] %vm857_vm2, %v12472_v24  ;;  %v12479_v55 = vmax.f32 %v11181_v44, 0.0  ;;  %v12480_v24 = vmax.f32 %v11192_v25, 0.0 }
 0x39c   : > { %5644 = vst.msk [vmem:[#allocation2 + $0x1d0] sm:$0xff] %vm857_vm2, %v12473_v47  ;;  %5645 = vst.msk [vmem:[#allocation2 + $0x1e8] sm:$0xff] %vm857_vm2, %v12474_v28  ;;  %v12481_v47 = vmax.f32 %v11189_v19, 0.0  ;;  %v12482_v28 = vmax.f32 %v11200_v30, 0.0 }
 0x39d   : > { %5646 = vst.msk [vmem:[#allocation2 + $0x1f0] sm:$0xff] %vm857_vm2, %v12475_v3  ;;  %5647 = vst.msk [vmem:[#allocation2 + $0x208] sm:$0xff] %vm857_vm2, %v12476_v50  ;;  %v12483_v3 = vmax.f32 %v11197_v33, 0.0  ;;  %v12484_v50 = vmax.f32 %v11208_v7, 0.0 }
 0x39e   : > { %5648 = vst.msk [vmem:[#allocation2 + $0x210] sm:$0xff] %vm857_vm2, %v12477_v49  ;;  %5649 = vst.msk [vmem:[#allocation2 + $0x268] sm:$0xff] %vm857_vm2, %v12478_v21  ;;  %v12485_v49 = vmax.f32 %v11205_v17, 0.0  ;;  %v12486_v21 = vmax.f32 %v11216_v6, 0.0 }
 0x39f   : > { %5650 = vst.msk [vmem:[#allocation2 + $0x270] sm:$0xff] %vm857_vm2, %v12479_v55  ;;  %5651 = vst.msk [vmem:[#allocation2 + $0x288] sm:$0xff] %vm857_vm2, %v12480_v24  ;;  %v12487_v55 = vmax.f32 %v11213_v45, 0.0  ;;  %v12488_v24 = vmax.f32 %v11224_v62, 0.0 }
 0x3a0   : > { %5652 = vst.msk [vmem:[#allocation2 + $0x290] sm:$0xff] %vm857_vm2, %v12481_v47  ;;  %5653 = vst.msk [vmem:[#allocation2 + $0x2a8] sm:$0xff] %vm857_vm2, %v12482_v28  ;;  %v12489_v47 = vmax.f32 %v11221_v22, 0.0  ;;  %v12490_v28 = vmax.f32 %v11232_v48, 0.0 }
 0x3a1   : > { %5654 = vst.msk [vmem:[#allocation2 + $0x2b0] sm:$0xff] %vm857_vm2, %v12483_v3  ;;  %5655 = vst.msk [vmem:[#allocation2 + $0x2c8] sm:$0xff] %vm857_vm2, %v12484_v50  ;;  %v12491_v3 = vld [vmem:[#allocation30_spill] sm:$0xff] }
 0x3a2   : > { %5656 = vst.msk [vmem:[#allocation2 + $0x2d0] sm:$0xff] %vm857_vm2, %v12485_v49  ;;  %5657 = vst.msk [vmem:[#allocation2 + $0x2e8] sm:$0xff] %vm857_vm2, %v12486_v21  ;;  %v12492_v50 = vmax.f32 %v12491_v3, 0.0  ;;  %v12493_v49 = vld [vmem:[#allocation32_spill] sm:$0xff] }
 0x3a3   : > { %5658 = vst.msk [vmem:[#allocation2 + $0x2f0] sm:$0xff] %vm857_vm2, %v12487_v55  ;;  %5659 = vst.msk [vmem:[#allocation2 + $0x308] sm:$0xff] %vm857_vm2, %v12488_v24  ;;  %v12494_v21 = vmax.f32 %v12493_v49, 0.0  ;;  %v12495_v55 = vld [vmem:[#allocation31_spill] sm:$0xff]  ;;  %v12497_v24 = vld [vmem:[#allocation34_spill] sm:$0xff] }
 0x3a4   : > { %5660 = vst.msk [vmem:[#allocation2 + $0x310] sm:$0xff] %vm857_vm2, %v12489_v47  ;;  %5661 = vst.msk [vmem:[#allocation2 + $0x328] sm:$0xff] %vm857_vm2, %v12490_v28  ;;  %v12496_v54 = vmax.f32 %v12495_v55, 0.0  ;;  %v12498_v13 = vmax.f32 %v12497_v24, 0.0  ;;  %v12499_v47 = vld [vmem:[#allocation33_spill] sm:$0xff]  ;;  %v12501_v28 = vld [vmem:[#allocation36_spill] sm:$0xff] }
 0x3a5   : > { %5662 = vst.msk [vmem:[#allocation2 + $0x330] sm:$0xff] %vm857_vm2, %v12492_v50  ;;  %5663 = vst.msk [vmem:[#allocation2 + $0x348] sm:$0xff] %vm857_vm2, %v12494_v21  ;;  %v12500_v40 = vmax.f32 %v12499_v47, 0.0  ;;  %v12502_v3 = vmax.f32 %v12501_v28, 0.0  ;;  %v12503_v50 = vld [vmem:[#allocation35_spill] sm:$0xff]  ;;  %v12505_v21 = vld [vmem:[#allocation38_spill] sm:$0xff] }
 0x3a6   : > { %5664 = vst.msk [vmem:[#allocation2 + $0x350] sm:$0xff] %vm857_vm2, %v12496_v54  ;;  %5665 = vst.msk [vmem:[#allocation2 + $0x368] sm:$0xff] %vm857_vm2, %v12498_v13  ;;  %v12504_v49 = vmax.f32 %v12503_v50, 0.0  ;;  %v12506_v55 = vmax.f32 %v12505_v21, 0.0  ;;  %v12507_v54 = vld [vmem:[#allocation37_spill] sm:$0xff] }
 0x3a7   : > { %5666 = vst.msk [vmem:[#allocation2 + $0x370] sm:$0xff] %vm857_vm2, %v12500_v40  ;;  %5667 = vst.msk [vmem:[#allocation2 + $0x388] sm:$0xff] %vm857_vm2, %v12502_v3  ;;  %v12508_v24 = vmax.f32 %v12507_v54, 0.0  ;;  %v12509_v13 = vld [vmem:[#allocation93_spill] sm:$0xff]  ;;  %v12511_v40 = vld [vmem:[#allocation14_spill] sm:$0xff]  ;;  %v12518_v54 = vmax.f32 %v11293_v29, 0.0 }
 0x3a8   : > { %5668 = vst.msk [vmem:[#allocation2 + $0x390] sm:$0xff] %vm857_vm2, %v12504_v49  ;;  %5669 = vst.msk [vmem:[#allocation2 + $0x3a8] sm:$0xff] %vm857_vm2, %v12506_v55  ;;  %v12510_v47 = vmax.f32 %v12509_v13, 0.0  ;;  %v12512_v28 = vmax.f32 %v12511_v40, 0.0  ;;  %v12513_v3 = vld [vmem:[#allocation53_spill] sm:$0xff]  ;;  %v12517_v55 = vmax.f32 %v11285_v18, 0.0 }
 0x3a9   : > { %5670 = vst.msk [vmem:[#allocation2 + $0x3b0] sm:$0xff] %vm857_vm2, %v12508_v24  ;;  %v12514_v50 = vmax.f32 %v12513_v3, 0.0  ;;  %v12515_v49 = vld [vmem:[#allocation49_spill] sm:$0xff]  ;;  %5677 = vst.msk [vmem:[#allocation2 + $0x428] sm:$0xff] %vm857_vm2, %v5608_v38  ;;  %v12519_v24 = vmax.f32 %v11304_v20, 0.0  ;;  %v12520_v13 = vmax.f32 %v11301_v63, 0.0 }
 0x3aa   : > { %5671 = vst.msk [vmem:[#allocation2 + $0x3c8] sm:$0xff] %vm857_vm2, %v12510_v47  ;;  %5672 = vst.msk [vmem:[#allocation2 + $0x3d0] sm:$0xff] %vm857_vm2, %v12512_v28  ;;  %v12516_v21 = vmax.f32 %v12515_v49, 0.0 }
 0x3ab   : > { %5673 = vst.msk [vmem:[#allocation2 + $0x3e8] sm:$0xff] %vm857_vm2, %v12514_v50  ;;  %5676 = vst.msk [vmem:[#allocation2 + $0x410] sm:$0xff] %vm857_vm2, %v12517_v55 }
 0x3ac   : > { %5674 = vst.msk [vmem:[#allocation2 + $0x3f0] sm:$0xff] %vm857_vm2, %v12516_v21  ;;  %5678 = vst.msk [vmem:[#allocation2 + $0x430] sm:$0xff] %vm857_vm2, %v12518_v54 }
 0x3ad   : > { %5679 = vst.msk [vmem:[#allocation2 + $0x448] sm:$0xff] %vm857_vm2, %v12519_v24  ;;  %5680 = vst.msk [vmem:[#allocation2 + $0x450] sm:$0xff] %vm857_vm2, %v12520_v13 }
 0x3ae PF: > { %p6379_p6 = scmp.ne.s32.totalorder %s8471_s13, 2 }
 0x3af   : > { %v12521_v47 = vmax.f32 (!%p6379_p6), %v11034_v16, 0.0  ;;  %v12522_v40 = vmax.f32 (!%p6379_p6), %v11031_v53, 0.0  ;;  %v12523_v28 = vmax.f32 (!%p6379_p6), %v11042_v61, 0.0  ;;  %v12524_v16 = vmax.f32 (!%p6379_p6), %v11039_v36, 0.0  ;;  %v12572_v21 = vld [vmem:[#allocation34_spill] sm:$0xff] (!%p6379_p6)  ;;  %v12574_v54 = vld [vmem:[#allocation33_spill] sm:$0xff] (!%p6379_p6) }
 0x3b0   : > { %5684 = sbr.rel (%p6379_p6) target bundleno = 977 (0x3d1), region = 44  ;;  %v12525_v53 = vmax.f32 (!%p6379_p6), %v11050_v31, 0.0  ;;  %v12526_v61 = vmax.f32 (!%p6379_p6), %v11047_v56, 0.0  ;;  %v12527_v36 = vmax.f32 (!%p6379_p6), %v11058_v34, 0.0  ;;  %v12528_v31 = vmax.f32 (!%p6379_p6), %v11055_v15, 0.0  ;;  %v12576_v13 = vld [vmem:[#allocation36_spill] sm:$0xff] (!%p6379_p6) }
 0x3b1   : > { %5685 = vst.msk [vmem:[%s11892_s3] sm:$0xff] (!%p6379_p6), %vm857_vm2, %v12521_v47  ;;  %5686 = vst.msk [vmem:[%s11892_s3 + $0x8] sm:$0xff] (!%p6379_p6), %vm857_vm2, %v12522_v40  ;;  %v12529_v56 = vmax.f32 (!%p6379_p6), %v11066_v9, 0.0  ;;  %v12530_v34 = vmax.f32 (!%p6379_p6), %v11063_v42, 0.0  ;;  %v12531_v15 = vmax.f32 (!%p6379_p6), %v11076_v14, 0.0  ;;  %v12532_v9 = vmax.f32 (!%p6379_p6), %v11073_v26, 0.0 }
 0x3b2   : > { %5687 = vst.msk [vmem:[%s11892_s3 + $0x10] sm:$0xff] (!%p6379_p6), %vm857_vm2, %v12523_v28  ;;  %5688 = vst.msk [vmem:[%s11892_s3 + $0x18] sm:$0xff] (!%p6379_p6), %vm857_vm2, %v12524_v16  ;;  %v12533_v42 = vmax.f32 (!%p6379_p6), %v11086_v12, 0.0  ;;  %v12534_v14 = vmax.f32 (!%p6379_p6), %v11083_v59, 0.0  ;;  %v12535_v26 = vmax.f32 (!%p6379_p6), %v11096_v35, 0.0  ;;  %v12536_v12 = vmax.f32 (!%p6379_p6), %v11093_v37, 0.0 }
 0x3b3   : > { %5689 = vst.msk [vmem:[%s11892_s3 + $0x20] sm:$0xff] (!%p6379_p6), %vm857_vm2, %v12525_v53  ;;  %5690 = vst.msk [vmem:[%s11892_s3 + $0x28] sm:$0xff] (!%p6379_p6), %vm857_vm2, %v12526_v61  ;;  %v12537_v59 = vmax.f32 (!%p6379_p6), %v11106_v23, 0.0  ;;  %v12538_v35 = vmax.f32 (!%p6379_p6), %v11103_v57, 0.0  ;;  %v12539_v37 = vmax.f32 (!%p6379_p6), %v11116_v32, 0.0  ;;  %v12540_v23 = vmax.f32 (!%p6379_p6), %v11113_v46, 0.0 }
 0x3b4   : > { %5691 = vst.msk [vmem:[%s11892_s3 + $0x30] sm:$0xff] (!%p6379_p6), %vm857_vm2, %v12527_v36  ;;  %5692 = vst.msk [vmem:[%s11892_s3 + $0x38] sm:$0xff] (!%p6379_p6), %vm857_vm2, %v12528_v31  ;;  %v12541_v57 = vmax.f32 (!%p6379_p6), %v11126_v39, 0.0  ;;  %v12542_v32 = vmax.f32 (!%p6379_p6), %v11123_v11, 0.0  ;;  %v12543_v46 = vmax.f32 (!%p6379_p6), %v11136_v0, 0.0  ;;  %v12544_v39 = vmax.f32 (!%p6379_p6), %v11133_v58, 0.0 }
 0x3b5   : > { %5693 = vst.msk [vmem:[%s11892_s3 + $0x40] sm:$0xff] (!%p6379_p6), %vm857_vm2, %v12529_v56  ;;  %5694 = vst.msk [vmem:[%s11892_s3 + $0x48] sm:$0xff] (!%p6379_p6), %vm857_vm2, %v12530_v34  ;;  %v12545_v11 = vmax.f32 (!%p6379_p6), %v11146_v52, 0.0  ;;  %v12546_v0 = vmax.f32 (!%p6379_p6), %v11143_v41, 0.0  ;;  %v12547_v58 = vmax.f32 (!%p6379_p6), %v11156_v43, 0.0  ;;  %v12548_v52 = vmax.f32 (!%p6379_p6), %v11153_v8, 0.0 }
 0x3b6   : > { %5695 = vst.msk [vmem:[%s11892_s3 + $0x50] sm:$0xff] (!%p6379_p6), %vm857_vm2, %v12531_v15  ;;  %5696 = vst.msk [vmem:[%s11892_s3 + $0x58] sm:$0xff] (!%p6379_p6), %vm857_vm2, %v12532_v9  ;;  %v12549_v41 = vmax.f32 (!%p6379_p6), %v11166_v2, 0.0  ;;  %v12550_v43 = vmax.f32 (!%p6379_p6), %v11163_v60, 0.0  ;;  %v12551_v8 = vmax.f32 (!%p6379_p6), %v11176_v51, 0.0  ;;  %v12552_v2 = vmax.f32 (!%p6379_p6), %v11173_v4, 0.0 }
 0x3b7   : > { %5697 = vst.msk [vmem:[%s11892_s3 + $0x60] sm:$0xff] %vm857_vm2, %v12533_v42  ;;  %5698 = vst.msk [vmem:[%s11892_s3 + $0x68] sm:$0xff] %vm857_vm2, %v12534_v14  ;;  %v12553_v60 = vmax.f32 %v11184_v27, 0.0  ;;  %v12554_v51 = vmax.f32 %v11181_v44, 0.0  ;;  %v12555_v4 = vmax.f32 %v11192_v25, 0.0  ;;  %v12556_v27 = vmax.f32 %v11189_v19, 0.0 }
 0x3b8   : > { %5699 = vst.msk [vmem:[%s11892_s3 + $0x70] sm:$0xff] %vm857_vm2, %v12535_v26  ;;  %5700 = vst.msk [vmem:[%s11892_s3 + $0x78] sm:$0xff] %vm857_vm2, %v12536_v12  ;;  %v12557_v44 = vmax.f32 %v11200_v30, 0.0  ;;  %v12558_v25 = vmax.f32 %v11197_v33, 0.0  ;;  %v12559_v19 = vmax.f32 %v11208_v7, 0.0  ;;  %v12560_v30 = vmax.f32 %v11205_v17, 0.0 }
 0x3b9   : > { %5701 = vst.msk [vmem:[%s11892_s3 + $0x80] sm:$0xff] %vm857_vm2, %v12537_v59  ;;  %5702 = vst.msk [vmem:[%s11892_s3 + $0x88] sm:$0xff] %vm857_vm2, %v12538_v35  ;;  %v12561_v33 = vmax.f32 %v11216_v6, 0.0  ;;  %v12562_v7 = vmax.f32 %v11213_v45, 0.0  ;;  %v12563_v17 = vmax.f32 %v11224_v62, 0.0  ;;  %v12564_v6 = vmax.f32 %v11221_v22, 0.0 }
 0x3ba   : > { %5703 = vst.msk [vmem:[%s11892_s3 + $0x90] sm:$0xff] %vm857_vm2, %v12539_v37  ;;  %5704 = vst.msk [vmem:[%s11892_s3 + $0x98] sm:$0xff] %vm857_vm2, %v12540_v23  ;;  %v12565_v45 = vmax.f32 %v11232_v48, 0.0  ;;  %v12566_v62 = vld [vmem:[#allocation30_spill] sm:$0xff]  ;;  %v12568_v22 = vld [vmem:[#allocation32_spill] sm:$0xff]  ;;  %v12573_v55 = vmax.f32 %v12572_v21, 0.0 }
 0x3bb   : > { %5705 = vst.msk [vmem:[%s11892_s3 + $0xa0] sm:$0xff] %vm857_vm2, %v12541_v57  ;;  %5706 = vst.msk [vmem:[%s11892_s3 + $0xa8] sm:$0xff] %vm857_vm2, %v12542_v32  ;;  %v12567_v3 = vmax.f32 %v12566_v62, 0.0  ;;  %v12569_v50 = vmax.f32 %v12568_v22, 0.0  ;;  %v12570_v48 = vld [vmem:[#allocation31_spill] sm:$0xff]  ;;  %v12575_v24 = vmax.f32 %v12574_v54, 0.0 }
 0x3bc   : > { %5707 = vst.msk [vmem:[%s11892_s3 + $0xb0] sm:$0xff] %vm857_vm2, %v12543_v46  ;;  %5708 = vst.msk [vmem:[%s11892_s3 + $0xb8] sm:$0xff] %vm857_vm2, %v12544_v39  ;;  %v12571_v49 = vmax.f32 %v12570_v48, 0.0  ;;  %v12577_v47 = vmax.f32 %v12576_v13, 0.0  ;;  %v12578_v40 = vld [vmem:[#allocation35_spill] sm:$0xff]  ;;  %v12580_v16 = vld [vmem:[#allocation38_spill] sm:$0xff] }
 0x3bd   : > { %5709 = vst.msk [vmem:[%s11892_s3 + $0xc0] sm:$0xff] %vm857_vm2, %v12545_v11  ;;  %5710 = vst.msk [vmem:[%s11892_s3 + $0xc8] sm:$0xff] %vm857_vm2, %v12546_v0  ;;  %v12579_v28 = vmax.f32 %v12578_v40, 0.0  ;;  %v12581_v53 = vmax.f32 %v12580_v16, 0.0  ;;  %v12582_v61 = vld [vmem:[#allocation37_spill] sm:$0xff]  ;;  %v12586_v34 = vld [vmem:[#allocation14_spill] sm:$0xff] }
 0x3be   : > { %5711 = vst.msk [vmem:[%s11892_s3 + $0xd0] sm:$0xff] %vm857_vm2, %v12547_v58  ;;  %5712 = vst.msk [vmem:[%s11892_s3 + $0xd8] sm:$0xff] %vm857_vm2, %v12548_v52  ;;  %v12583_v36 = vmax.f32 %v12582_v61, 0.0  ;;  %v12584_v31 = vld [vmem:[#allocation93_spill] sm:$0xff]  ;;  %v12587_v15 = vmax.f32 %v12586_v34, 0.0  ;;  %v12592_v12 = vmax.f32 %v11285_v18, 0.0 }
 0x3bf   : > { %5713 = vst.msk [vmem:[%s11892_s3 + $0xe0] sm:$0xff] %vm857_vm2, %v12549_v41  ;;  %5714 = vst.msk [vmem:[%s11892_s3 + $0xe8] sm:$0xff] %vm857_vm2, %v12550_v43  ;;  %v12585_v56 = vmax.f32 %v12584_v31, 0.0  ;;  %v12588_v9 = vld [vmem:[#allocation53_spill] sm:$0xff]  ;;  %v12593_v1 = vmax.f32 %v11293_v29, 0.0  ;;  %v12595_v18 = vmax.f32 %v11301_v63, 0.0 }
 0x3c0   : > { %5715 = vst.msk [vmem:[%s11892_s3 + $0xf0] sm:$0xff] %vm857_vm2, %v12551_v8  ;;  %5716 = vst.msk [vmem:[%s11892_s3 + $0xf8] sm:$0xff] %vm857_vm2, %v12552_v2  ;;  %v12589_v42 = vmax.f32 %v12588_v9, 0.0  ;;  %v12590_v14 = vld [vmem:[#allocation49_spill] sm:$0xff] }
 0x3c1   : > { %5717 = vst.msk [vmem:[%s11892_s3 + $0x100] sm:$0xff] %vm857_vm2, %v12553_v60  ;;  %5718 = vst.msk [vmem:[%s11892_s3 + $0x108] sm:$0xff] %vm857_vm2, %v12554_v51  ;;  %v12591_v26 = vmax.f32 %v12590_v14, 0.0 }
 0x3c2   : > { %5719 = vst.msk [vmem:[%s11892_s3 + $0x110] sm:$0xff] %vm857_vm2, %v12555_v4  ;;  %5720 = vst.msk [vmem:[%s11892_s3 + $0x118] sm:$0xff] %vm857_vm2, %v12556_v27 }
 0x3c3   : > { %5721 = vst.msk [vmem:[%s11892_s3 + $0x120] sm:$0xff] %vm857_vm2, %v12557_v44  ;;  %5722 = vst.msk [vmem:[%s11892_s3 + $0x128] sm:$0xff] %vm857_vm2, %v12558_v25 }
 0x3c4   : > { %5723 = vst.msk [vmem:[%s11892_s3 + $0x130] sm:$0xff] %vm857_vm2, %v12559_v19  ;;  %5724 = vst.msk [vmem:[%s11892_s3 + $0x138] sm:$0xff] %vm857_vm2, %v12560_v30 }
 0x3c5   : > { %5725 = vst.msk [vmem:[%s11892_s3 + $0x140] sm:$0xff] %vm857_vm2, %v12561_v33  ;;  %5726 = vst.msk [vmem:[%s11892_s3 + $0x148] sm:$0xff] %vm857_vm2, %v12562_v7 }
 0x3c6   : > { %5727 = vst.msk [vmem:[%s11892_s3 + $0x150] sm:$0xff] %vm857_vm2, %v12563_v17  ;;  %5728 = vst.msk [vmem:[%s11892_s3 + $0x158] sm:$0xff] %vm857_vm2, %v12564_v6 }
 0x3c7   : > { %5729 = vst.msk [vmem:[%s11892_s3 + $0x160] sm:$0xff] %vm857_vm2, %v12565_v45  ;;  %5730 = vst.msk [vmem:[%s11892_s3 + $0x168] sm:$0xff] %vm857_vm2, %v12567_v3 }
 0x3c8   : > { %5731 = vst.msk [vmem:[%s11892_s3 + $0x170] sm:$0xff] %vm857_vm2, %v12569_v50  ;;  %5732 = vst.msk [vmem:[%s11892_s3 + $0x178] sm:$0xff] %vm857_vm2, %v12571_v49 }
 0x3c9   : > { %5733 = vst.msk [vmem:[%s11892_s3 + $0x180] sm:$0xff] %vm857_vm2, %v12573_v55  ;;  %5734 = vst.msk [vmem:[%s11892_s3 + $0x188] sm:$0xff] %vm857_vm2, %v12575_v24 }
 0x3ca   : > { %5735 = vst.msk [vmem:[%s11892_s3 + $0x190] sm:$0xff] %vm857_vm2, %v12577_v47  ;;  %5736 = vst.msk [vmem:[%s11892_s3 + $0x198] sm:$0xff] %vm857_vm2, %v12579_v28 }
 0x3cb   : > { %5737 = vst.msk [vmem:[%s11892_s3 + $0x1a0] sm:$0xff] %vm857_vm2, %v12581_v53  ;;  %5738 = vst.msk [vmem:[%s11892_s3 + $0x1a8] sm:$0xff] %vm857_vm2, %v12583_v36 }
 0x3cc   : > { %5739 = vst.msk [vmem:[%s11892_s3 + $0x1b0] sm:$0xff] %vm857_vm2, %v12585_v56  ;;  %5740 = vst.msk [vmem:[%s11892_s3 + $0x1b8] sm:$0xff] %vm857_vm2, %v12587_v15 }
 0x3cd   : > { %5741 = vst.msk [vmem:[%s11892_s3 + $0x1c0] sm:$0xff] %vm857_vm2, %v12589_v42  ;;  %5742 = vst.msk [vmem:[%s11892_s3 + $0x1c8] sm:$0xff] %vm857_vm2, %v12591_v26 }
 0x3ce   : > { %5743 = vst.msk [vmem:[%s11892_s3 + $0x1d0] sm:$0xff] %vm857_vm2, %v5606_v10  ;;  %5744 = vst.msk [vmem:[%s11892_s3 + $0x1d8] sm:$0xff] %vm857_vm2, %v12592_v12  ;;  %v12594_v10 = vmax.f32 %v11304_v20, 0.0 }
 0x3cf   : > { %5745 = vst.msk [vmem:[%s11892_s3 + $0x1e0] sm:$0xff] %vm857_vm2, %v5608_v38  ;;  %5746 = vst.msk [vmem:[%s11892_s3 + $0x1e8] sm:$0xff] %vm857_vm2, %v12593_v1 }
 0x3d0   : > { %5747 = vst.msk [vmem:[%s11892_s3 + $0x1f0] sm:$0xff] %vm857_vm2, %v12594_v10  ;;  %5748 = vst.msk [vmem:[%s11892_s3 + $0x1f8] sm:$0xff] %vm857_vm2, %v12595_v18 }
 0x3d1 PF: > { %s13_s12 = sadd.s32 1, %s8442_s12  }
 0x3d2   : > { %p10_p7 = scmp.ge.s32.totalorder %s13_s12, 5  }
 0x3d4   :  { %12 = sbr.rel (!%p10_p7) target bundleno = 1 (0x1), region = 75 }

</bundles_post_ra>
